<compile_context>
chip_gen: v6e
topology: v6e:2x2x1
jax: 0.10.0
libtpu: 0.0.40
codegen_flags: <defaults>
</compile_context>

<pallas_src>
import numpy as np
import jax
import jax.numpy as jnp
from jax.experimental import pallas as pl
from jax.experimental.pallas import tpu as pltpu


# ------------------------------ fused kernel ------------------------------- #

def _lenet_fused_kernel(x_ref, wt1_ref, bt1_ref, s1w_ref, s1h_ref,
                        wt2_ref, bt2_ref, s2w_ref, s2h_ref,
                        w1fc_ref, b1fc_ref, w2fc_ref, b2fc_ref,
                        w3fc_ref, b3fc_ref,
                        o_ref, p1_ref, p2_ref):
    nb = x_ref.shape[0]
    f32 = jnp.float32

    def bmm(a, b):
        # Batched matmul 'nmk,nkp->nmp'; 2-D operands are broadcast over batch.
        if a.ndim == 2:
            a = jnp.broadcast_to(a[None], (nb,) + a.shape)
        if b.ndim == 2:
            b = jnp.broadcast_to(b[None], (nb,) + b.shape)
        return jax.lax.dot_general(
            a, b,
            dimension_numbers=(((2,), (1,)), ((0,), (0,))),
            preferred_element_type=f32)

    def mm(a, b):
        # Plain 2-D matmul; batch rides along the M dimension of the MXU.
        return jnp.dot(a, b, preferred_element_type=f32)

    # ---- conv1 (1->6, 3x3, valid) + bias + ReLU -------------------------------
    # y[n, oh, ow*6 + co]; one batched matmul per kernel row (block-Toeplitz W).
    y = bmm(x_ref[:, 0:26, :], wt1_ref[0])
    y = y + bmm(x_ref[:, 1:27, :], wt1_ref[1])
    y = y + bmm(x_ref[:, 2:28, :], wt1_ref[2])
    y = jnp.maximum(y + bt1_ref[...], 0.0)                        # (nb, 26, 156)

    # ---- maxpool1 2x2 (floor) via even/odd selector matmuls -------------------
    cw = jnp.maximum(bmm(y, s1w_ref[0]), bmm(y, s1w_ref[1]))      # (nb, 26, 78)
    p1_ref[...] = jnp.maximum(bmm(s1h_ref[0], cw),
                              bmm(s1h_ref[1], cw))                # (nb, 13, 78)

    # ---- conv2 (6->16, 3x3, valid) + bias + ReLU ------------------------------
    y2 = bmm(p1_ref[:, 0:11, :], wt2_ref[0])
    y2 = y2 + bmm(p1_ref[:, 1:12, :], wt2_ref[1])
    y2 = y2 + bmm(p1_ref[:, 2:13, :], wt2_ref[2])
    y2 = jnp.maximum(y2 + bt2_ref[...], 0.0)                      # (nb, 11, 176)

    # ---- maxpool2 2x2 (floor: 11 -> 5) ----------------------------------------
    cw2 = jnp.maximum(bmm(y2, s2w_ref[0]), bmm(y2, s2w_ref[1]))   # (nb, 11, 80)
    p2_ref[...] = jnp.maximum(bmm(s2h_ref[0], cw2),
                              bmm(s2h_ref[1], cw2))               # (nb, 5, 80)

    # ---- fc1: 5 batch-as-M matmuls (PyTorch NCHW flatten folded into weights) -
    h1 = mm(p2_ref[:, 0, :], w1fc_ref[0])                         # (nb, 120)
    for r in range(1, 5):
        h1 = h1 + mm(p2_ref[:, r, :], w1fc_ref[r])
    h1 = jnp.maximum(h1 + b1fc_ref[...], 0.0)                     # (nb, 120)

    # ---- fc2 -> relu -> fc3 -> log_softmax (all 2-D, batch is M) --------------
    h2 = jnp.maximum(mm(h1, w2fc_ref[...]) + b2fc_ref[...], 0.0)  # (nb, 84)
    logits = mm(h2, w3fc_ref[...]) + b3fc_ref[...]                # (nb, 10)
    m = jnp.max(logits, axis=-1, keepdims=True)
    lse = m + jnp.log(jnp.sum(jnp.exp(logits - m), axis=-1, keepdims=True))
    o_ref[...] = logits - lse


# -------------------- weight-side preprocessing (hoistable) ----------------- #

def _conv1_toeplitz(w):
    """(6, 1, 3, 3) -> (3, 28, 26*6): Wt[kh, w_in, ow*6+co] = w[co,0,kh,w_in-ow]."""
    co = jnp.arange(26 * 6) % 6
    ow = jnp.arange(26 * 6) // 6
    w_in = jnp.arange(28)
    kw = w_in[:, None] - ow[None, :]
    valid = (kw >= 0) & (kw <= 2)
    kw_c = jnp.clip(kw, 0, 2)
    rows = []
    for kh in range(3):
        w_kh = w[:, 0, kh, :]                          # (6, 3)
        vals = w_kh[co[None, :], kw_c]                 # (28, 156)
        rows.append(jnp.where(valid, vals, 0.0))
    return jnp.stack(rows, axis=0).astype(jnp.float32)


def _conv2_toeplitz(w):
    """(16, 6, 3, 3) -> (3, 13*6, 11*16): Wt[kh, w_in*6+ci, ow*16+co]."""
    ci = jnp.arange(13 * 6) % 6
    w_in = jnp.arange(13 * 6) // 6
    co = jnp.arange(11 * 16) % 16
    ow = jnp.arange(11 * 16) // 16
    kw = w_in[:, None] - ow[None, :]
    valid = (kw >= 0) & (kw <= 2)
    kw_c = jnp.clip(kw, 0, 2)
    rows = []
    for kh in range(3):
        w_kh = w[:, :, kh, :]                          # (16, 6, 3)
        vals = w_kh[co[None, :], ci[:, None], kw_c]    # (78, 176)
        rows.append(jnp.where(valid, vals, 0.0))
    return jnp.stack(rows, axis=0).astype(jnp.float32)


def _fc1_folded(w):
    """(120, 400) -> (5, 80, 120); PyTorch flatten index is c*25 + h*5 + w."""
    c = jnp.arange(80) % 16
    wx = jnp.arange(80) // 16
    blocks = []
    for h in range(5):
        idx = c * 25 + h * 5 + wx                      # (80,)
        blocks.append(w[:, idx].T)                     # (80, 120)
    return jnp.stack(blocks, axis=0).astype(jnp.float32)


def _pool_col_selectors(w_in, ch, w_out):
    se = np.zeros((w_in * ch, w_out * ch), np.float32)
    so = np.zeros((w_in * ch, w_out * ch), np.float32)
    for j in range(w_out):
        for k in range(ch):
            se[(2 * j) * ch + k, j * ch + k] = 1.0
            so[(2 * j + 1) * ch + k, j * ch + k] = 1.0
    return np.stack([se, so])


def _pool_row_selectors(h_in, h_out):
    re_ = np.zeros((h_out, h_in), np.float32)
    ro_ = np.zeros((h_out, h_in), np.float32)
    for i in range(h_out):
        re_[i, 2 * i] = 1.0
        ro_[i, 2 * i + 1] = 1.0
    return np.stack([re_, ro_])


_S1W = _pool_col_selectors(26, 6, 13)      # (2, 156, 78)
_S1H = _pool_row_selectors(26, 13)         # (2, 13, 26)
_S2W = _pool_col_selectors(11, 16, 5)      # (2, 176, 80)
_S2H = _pool_row_selectors(11, 5)          # (2, 5, 11)


# ------------------------------- pallas_call -------------------------------- #

def _pick_batch_block(n):
    for cand in (64, 32, 16, 8, 4, 2, 1):
        if n % cand == 0:
            return cand
    return n


def _fused_lenet_call(x3, operands):
    n = x3.shape[0]
    bn = _pick_batch_block(n)
    grid = (n // bn,)

    def batch_spec(shape):
        nd = len(shape)

        def imap(i):
            return (i,) + (0,) * (nd - 1)

        return pl.BlockSpec((bn,) + tuple(shape[1:]), imap)

    def full_spec(shape):
        nd = len(shape)

        def imap(i):
            return (0,) * nd

        return pl.BlockSpec(tuple(shape), imap)

    in_specs = [batch_spec(x3.shape)] + [full_spec(op.shape) for op in operands]
    out_specs = pl.BlockSpec((bn, 10), lambda i: (i, 0))

    return pl.pallas_call(
        _lenet_fused_kernel,
        out_shape=jax.ShapeDtypeStruct((n, 10), jnp.float32),
        grid=grid,
        in_specs=in_specs,
        out_specs=out_specs,
        scratch_shapes=[pltpu.VMEM((bn, 13, 78), jnp.float32),
                        pltpu.VMEM((bn, 5, 80), jnp.float32)],
        compiler_params=pltpu.CompilerParams(
            dimension_semantics=("parallel",)),
    )(x3, *operands)


def convolutional_network_forward(x, params):
    """x: (N, 1, 28, 28) float32 NCHW -> (N, 10) log-probabilities."""
    n = x.shape[0]
    x3 = x.reshape(n, 28, 28)                          # Cin == 1

    # Weight-side preprocessing (tiny, activation-independent -> hoistable).
    operands = (
        _conv1_toeplitz(params["conv1_w"]),
        jnp.tile(params["conv1_b"], 26).reshape(1, 156).astype(jnp.float32),
        jnp.asarray(_S1W), jnp.asarray(_S1H),
        _conv2_toeplitz(params["conv2_w"]),
        jnp.tile(params["conv2_b"], 11).reshape(1, 176).astype(jnp.float32),
        jnp.asarray(_S2W), jnp.asarray(_S2H),
        _fc1_folded(params["fc1_w"]),
        params["fc1_b"].reshape(1, 120).astype(jnp.float32),
        params["fc2_w"].T.astype(jnp.float32),
        params["fc2_b"].reshape(1, 84).astype(jnp.float32),
        params["fc3_w"].T.astype(jnp.float32),
        params["fc3_b"].reshape(1, 10).astype(jnp.float32),
    )
    return _fused_lenet_call(x3, operands)


# ------------------------------ reference & test ---------------------------- #

def _reference_forward(x, params):
    hi = jax.lax.Precision.HIGHEST
    y = jax.lax.conv_general_dilated(
        x, params["conv1_w"], (1, 1), "VALID",
        dimension_numbers=("NCHW", "OIHW", "NCHW"), precision=hi)
    y = jax.nn.relu(y + params["conv1_b"][None, :, None, None])
    y = jax.lax.reduce_window(y, -jnp.inf, jax.lax.max,
                              (1, 1, 2, 2), (1, 1, 2, 2), "VALID")
    y = jax.lax.conv_general_dilated(
        y, params["conv2_w"], (1, 1), "VALID",
        dimension_numbers=("NCHW", "OIHW", "NCHW"), precision=hi)
    y = jax.nn.relu(y + params["conv2_b"][None, :, None, None])
    y = jax.lax.reduce_window(y, -jnp.inf, jax.lax.max,
                              (1, 1, 2, 2), (1, 1, 2, 2), "VALID")
    flat = y.reshape(y.shape[0], -1)                    # NCHW flatten, like PyTorch
    h = jax.nn.relu(jnp.dot(flat, params["fc1_w"].T, precision=hi) + params["fc1_b"])
    h = jax.nn.relu(jnp.dot(h, params["fc2_w"].T, precision=hi) + params["fc2_b"])
    logits = jnp.dot(h, params["fc3_w"].T, precision=hi) + params["fc3_b"]
    return jax.nn.log_softmax(logits, axis=-1)


def init_params(key):
    ks = jax.random.split(key, 10)
    s = 0.1
    return {
        "conv1_w": s * jax.random.normal(ks[0], (6, 1, 3, 3), jnp.float32),
        "conv1_b": s * jax.random.normal(ks[1], (6,), jnp.float32),
        "conv2_w": s * jax.random.normal(ks[2], (16, 6, 3, 3), jnp.float32),
        "conv2_b": s * jax.random.normal(ks[3], (16,), jnp.float32),
        "fc1_w": s * jax.random.normal(ks[4], (120, 400), jnp.float32),
        "fc1_b": s * jax.random.normal(ks[5], (120,), jnp.float32),
        "fc2_w": s * jax.random.normal(ks[6], (84, 120), jnp.float32),
        "fc2_b": s * jax.random.normal(ks[7], (84,), jnp.float32),
        "fc3_w": s * jax.random.normal(ks[8], (10, 84), jnp.float32),
        "fc3_b": s * jax.random.normal(ks[9], (10,), jnp.float32),
    }


if __name__ == "__main__":
    key = jax.random.PRNGKey(0)
    k_x, k_p = jax.random.split(key)
    x = jax.random.normal(k_x, (2, 1, 28, 28), jnp.float32)   # NCHW, like PyTorch
    params = init_params(k_p)

    out = jax.jit(convolutional_network_forward)(x, params)
    out = jax.block_until_ready(out)

    assert out.shape == (2, 10), out.shape
    assert bool(jnp.all(jnp.isfinite(out)))
    # log_softmax rows should exponentiate-sum to ~1
    assert bool(jnp.allclose(jnp.sum(jnp.exp(out), axis=1), 1.0, atol=1e-4))

    # numerical check against a pure-JAX reference of the PyTorch module
    ref = _reference_forward(x, params)
    assert bool(jnp.allclose(out, ref, atol=1e-3, rtol=1e-3)), (
        float(jnp.max(jnp.abs(out - ref))))

    print("KERNEL_OK")
</pallas_src>

<mosaic_0001>
module attributes {stable_mosaic.version = 11 : i64} {
  func.func @_lenet_fused_kernel(%arg0: i32, %arg1: memref<2x28x28xf32, #tpu.memory_space<vmem>>, %arg2: memref<3x28x156xf32, #tpu.memory_space<vmem>>, %arg3: memref<1x156xf32, #tpu.memory_space<vmem>>, %arg4: memref<2x156x78xf32, #tpu.memory_space<vmem>>, %arg5: memref<2x13x26xf32, #tpu.memory_space<vmem>>, %arg6: memref<3x78x176xf32, #tpu.memory_space<vmem>>, %arg7: memref<1x176xf32, #tpu.memory_space<vmem>>, %arg8: memref<2x176x80xf32, #tpu.memory_space<vmem>>, %arg9: memref<2x5x11xf32, #tpu.memory_space<vmem>>, %arg10: memref<5x80x120xf32, #tpu.memory_space<vmem>>, %arg11: memref<1x120xf32, #tpu.memory_space<vmem>>, %arg12: memref<120x84xf32, #tpu.memory_space<vmem>>, %arg13: memref<1x84xf32, #tpu.memory_space<vmem>>, %arg14: memref<84x10xf32, #tpu.memory_space<vmem>>, %arg15: memref<1x10xf32, #tpu.memory_space<vmem>>, %arg16: memref<2x10xf32, #tpu.memory_space<vmem>>, %arg17: memref<2x13x78xf32, #tpu.memory_space<vmem>>, %arg18: memref<2x5x80xf32, #tpu.memory_space<vmem>>) attributes {dimension_semantics = [#tpu.dimension_semantics<parallel>], iteration_bounds = array<i64: 1>, scalar_prefetch = 0 : i64, scratch_operands = 2 : i64, tpu.core_type = #tpu.core_type<tc>, window_params = [{transform_indices = @transform_0, window_bounds = array<i64: 2, 28, 28>}, {pipeline_mode = #tpu.pipeline_mode<synchronous>, transform_indices = @transform_1, window_bounds = array<i64: 3, 28, 156>}, {pipeline_mode = #tpu.pipeline_mode<synchronous>, transform_indices = @transform_2, window_bounds = array<i64: 1, 156>}, {pipeline_mode = #tpu.pipeline_mode<synchronous>, transform_indices = @transform_3, window_bounds = array<i64: 2, 156, 78>}, {pipeline_mode = #tpu.pipeline_mode<synchronous>, transform_indices = @transform_4, window_bounds = array<i64: 2, 13, 26>}, {pipeline_mode = #tpu.pipeline_mode<synchronous>, transform_indices = @transform_5, window_bounds = array<i64: 3, 78, 176>}, {pipeline_mode = #tpu.pipeline_mode<synchronous>, transform_indices = @transform_6, window_bounds = array<i64: 1, 176>}, {pipeline_mode = #tpu.pipeline_mode<synchronous>, transform_indices = @transform_7, window_bounds = array<i64: 2, 176, 80>}, {pipeline_mode = #tpu.pipeline_mode<synchronous>, transform_indices = @transform_8, window_bounds = array<i64: 2, 5, 11>}, {pipeline_mode = #tpu.pipeline_mode<synchronous>, transform_indices = @transform_9, window_bounds = array<i64: 5, 80, 120>}, {pipeline_mode = #tpu.pipeline_mode<synchronous>, transform_indices = @transform_10, window_bounds = array<i64: 1, 120>}, {pipeline_mode = #tpu.pipeline_mode<synchronous>, transform_indices = @transform_11, window_bounds = array<i64: 120, 84>}, {pipeline_mode = #tpu.pipeline_mode<synchronous>, transform_indices = @transform_12, window_bounds = array<i64: 1, 84>}, {pipeline_mode = #tpu.pipeline_mode<synchronous>, transform_indices = @transform_13, window_bounds = array<i64: 84, 10>}, {pipeline_mode = #tpu.pipeline_mode<synchronous>, transform_indices = @transform_14, window_bounds = array<i64: 1, 10>}, {transform_indices = @transform_15, window_bounds = array<i64: 2, 10>}]} {
    %c0 = arith.constant 0 : index
    %c0_0 = arith.constant 0 : index
    %c0_1 = arith.constant 0 : index
    %0 = vector.load %arg1[%c0, %c0_0, %c0_1] : memref<2x28x28xf32, #tpu.memory_space<vmem>>, vector<2x26x28xf32>
    %c0_2 = arith.constant 0 : index
    %c0_3 = arith.constant 0 : index
    %c0_4 = arith.constant 0 : index
    %1 = vector.load %arg2[%c0_2, %c0_3, %c0_4] : memref<3x28x156xf32, #tpu.memory_space<vmem>>, vector<1x28x156xf32>
    %2 = vector.shape_cast %1 : vector<1x28x156xf32> to vector<28x156xf32>
    %3 = vector.shape_cast %2 : vector<28x156xf32> to vector<1x28x156xf32>
    %4 = vector.shape_cast %3 : vector<1x28x156xf32> to vector<1x28x156xf32>
    %5 = vector.broadcast %4 : vector<1x28x156xf32> to vector<2x28x156xf32>
    %cst = arith.constant dense<0.000000e+00> : vector<2x26x156xf32>
    %6 = tpu.matmul %0, %5, %cst {dimension_numbers = #tpu.dot_dimension_numbers<[2], [1], [1], [2], [0, 0, 0, 1, 1, 2], [0], [0]>} : vector<2x26x28xf32>, vector<2x28x156xf32>, vector<2x26x156xf32> -> vector<2x26x156xf32>
    %c0_5 = arith.constant 0 : index
    %c1 = arith.constant 1 : index
    %c0_6 = arith.constant 0 : index
    %7 = vector.load %arg1[%c0_5, %c1, %c0_6] : memref<2x28x28xf32, #tpu.memory_space<vmem>>, vector<2x26x28xf32>
    %c1_7 = arith.constant 1 : index
    %c0_8 = arith.constant 0 : index
    %c0_9 = arith.constant 0 : index
    %8 = vector.load %arg2[%c1_7, %c0_8, %c0_9] : memref<3x28x156xf32, #tpu.memory_space<vmem>>, vector<1x28x156xf32>
    %9 = vector.shape_cast %8 : vector<1x28x156xf32> to vector<28x156xf32>
    %10 = vector.shape_cast %9 : vector<28x156xf32> to vector<1x28x156xf32>
    %11 = vector.shape_cast %10 : vector<1x28x156xf32> to vector<1x28x156xf32>
    %12 = vector.broadcast %11 : vector<1x28x156xf32> to vector<2x28x156xf32>
    %cst_10 = arith.constant dense<0.000000e+00> : vector<2x26x156xf32>
    %13 = tpu.matmul %7, %12, %cst_10 {dimension_numbers = #tpu.dot_dimension_numbers<[2], [1], [1], [2], [0, 0, 0, 1, 1, 2], [0], [0]>} : vector<2x26x28xf32>, vector<2x28x156xf32>, vector<2x26x156xf32> -> vector<2x26x156xf32>
    %14 = arith.addf %6, %13 : vector<2x26x156xf32>
    %c0_11 = arith.constant 0 : index
    %c2 = arith.constant 2 : index
    %c0_12 = arith.constant 0 : index
    %15 = vector.load %arg1[%c0_11, %c2, %c0_12] : memref<2x28x28xf32, #tpu.memory_space<vmem>>, vector<2x26x28xf32>
    %c2_13 = arith.constant 2 : index
    %c0_14 = arith.constant 0 : index
    %c0_15 = arith.constant 0 : index
    %16 = vector.load %arg2[%c2_13, %c0_14, %c0_15] : memref<3x28x156xf32, #tpu.memory_space<vmem>>, vector<1x28x156xf32>
    %17 = vector.shape_cast %16 : vector<1x28x156xf32> to vector<28x156xf32>
    %18 = vector.shape_cast %17 : vector<28x156xf32> to vector<1x28x156xf32>
    %19 = vector.shape_cast %18 : vector<1x28x156xf32> to vector<1x28x156xf32>
    %20 = vector.broadcast %19 : vector<1x28x156xf32> to vector<2x28x156xf32>
    %cst_16 = arith.constant dense<0.000000e+00> : vector<2x26x156xf32>
    %21 = tpu.matmul %15, %20, %cst_16 {dimension_numbers = #tpu.dot_dimension_numbers<[2], [1], [1], [2], [0, 0, 0, 1, 1, 2], [0], [0]>} : vector<2x26x28xf32>, vector<2x28x156xf32>, vector<2x26x156xf32> -> vector<2x26x156xf32>
    %22 = arith.addf %14, %21 : vector<2x26x156xf32>
    %c0_17 = arith.constant 0 : index
    %c0_18 = arith.constant 0 : index
    %23 = vector.load %arg3[%c0_17, %c0_18] : memref<1x156xf32, #tpu.memory_space<vmem>>, vector<1x156xf32>
    %24 = vector.shape_cast %23 : vector<1x156xf32> to vector<1x1x156xf32>
    %25 = vector.broadcast %24 : vector<1x1x156xf32> to vector<2x26x156xf32>
    %26 = arith.addf %22, %25 : vector<2x26x156xf32>
    %cst_19 = arith.constant 0.000000e+00 : f32
    %27 = vector.broadcast %cst_19 : f32 to vector<2x26x156xf32>
    %28 = arith.maximumf %26, %27 : vector<2x26x156xf32>
    %c0_20 = arith.constant 0 : index
    %c0_21 = arith.constant 0 : index
    %c0_22 = arith.constant 0 : index
    %29 = vector.load %arg4[%c0_20, %c0_21, %c0_22] : memref<2x156x78xf32, #tpu.memory_space<vmem>>, vector<1x156x78xf32>
    %30 = vector.shape_cast %29 : vector<1x156x78xf32> to vector<156x78xf32>
    %31 = vector.shape_cast %30 : vector<156x78xf32> to vector<1x156x78xf32>
    %32 = vector.shape_cast %31 : vector<1x156x78xf32> to vector<1x156x78xf32>
    %33 = vector.broadcast %32 : vector<1x156x78xf32> to vector<2x156x78xf32>
    %cst_23 = arith.constant dense<0.000000e+00> : vector<2x26x78xf32>
    %34 = tpu.matmul %28, %33, %cst_23 {dimension_numbers = #tpu.dot_dimension_numbers<[2], [1], [1], [2], [0, 0, 0, 1, 1, 2], [0], [0]>} : vector<2x26x156xf32>, vector<2x156x78xf32>, vector<2x26x78xf32> -> vector<2x26x78xf32>
    %c1_24 = arith.constant 1 : index
    %c0_25 = arith.constant 0 : index
    %c0_26 = arith.constant 0 : index
    %35 = vector.load %arg4[%c1_24, %c0_25, %c0_26] : memref<2x156x78xf32, #tpu.memory_space<vmem>>, vector<1x156x78xf32>
    %36 = vector.shape_cast %35 : vector<1x156x78xf32> to vector<156x78xf32>
    %37 = vector.shape_cast %36 : vector<156x78xf32> to vector<1x156x78xf32>
    %38 = vector.shape_cast %37 : vector<1x156x78xf32> to vector<1x156x78xf32>
    %39 = vector.broadcast %38 : vector<1x156x78xf32> to vector<2x156x78xf32>
    %cst_27 = arith.constant dense<0.000000e+00> : vector<2x26x78xf32>
    %40 = tpu.matmul %28, %39, %cst_27 {dimension_numbers = #tpu.dot_dimension_numbers<[2], [1], [1], [2], [0, 0, 0, 1, 1, 2], [0], [0]>} : vector<2x26x156xf32>, vector<2x156x78xf32>, vector<2x26x78xf32> -> vector<2x26x78xf32>
    %41 = arith.maximumf %34, %40 : vector<2x26x78xf32>
    %c0_28 = arith.constant 0 : index
    %c0_29 = arith.constant 0 : index
    %c0_30 = arith.constant 0 : index
    %42 = vector.load %arg5[%c0_28, %c0_29, %c0_30] : memref<2x13x26xf32, #tpu.memory_space<vmem>>, vector<1x13x26xf32>
    %43 = vector.shape_cast %42 : vector<1x13x26xf32> to vector<13x26xf32>
    %44 = vector.shape_cast %43 : vector<13x26xf32> to vector<1x13x26xf32>
    %45 = vector.shape_cast %44 : vector<1x13x26xf32> to vector<1x13x26xf32>
    %46 = vector.broadcast %45 : vector<1x13x26xf32> to vector<2x13x26xf32>
    %cst_31 = arith.constant dense<0.000000e+00> : vector<2x13x78xf32>
    %47 = tpu.matmul %46, %41, %cst_31 {dimension_numbers = #tpu.dot_dimension_numbers<[2], [1], [1], [2], [0, 0, 0, 1, 1, 2], [0], [0]>} : vector<2x13x26xf32>, vector<2x26x78xf32>, vector<2x13x78xf32> -> vector<2x13x78xf32>
    %c1_32 = arith.constant 1 : index
    %c0_33 = arith.constant 0 : index
    %c0_34 = arith.constant 0 : index
    %48 = vector.load %arg5[%c1_32, %c0_33, %c0_34] : memref<2x13x26xf32, #tpu.memory_space<vmem>>, vector<1x13x26xf32>
    %49 = vector.shape_cast %48 : vector<1x13x26xf32> to vector<13x26xf32>
    %50 = vector.shape_cast %49 : vector<13x26xf32> to vector<1x13x26xf32>
    %51 = vector.shape_cast %50 : vector<1x13x26xf32> to vector<1x13x26xf32>
    %52 = vector.broadcast %51 : vector<1x13x26xf32> to vector<2x13x26xf32>
    %cst_35 = arith.constant dense<0.000000e+00> : vector<2x13x78xf32>
    %53 = tpu.matmul %52, %41, %cst_35 {dimension_numbers = #tpu.dot_dimension_numbers<[2], [1], [1], [2], [0, 0, 0, 1, 1, 2], [0], [0]>} : vector<2x13x26xf32>, vector<2x26x78xf32>, vector<2x13x78xf32> -> vector<2x13x78xf32>
    %54 = arith.maximumf %47, %53 : vector<2x13x78xf32>
    %c0_36 = arith.constant 0 : index
    %c0_37 = arith.constant 0 : index
    %c0_38 = arith.constant 0 : index
    %55 = vector.load %arg17[%c0_36, %c0_37, %c0_38] : memref<2x13x78xf32, #tpu.memory_space<vmem>>, vector<2x13x78xf32>
    tpu.vector_store %arg17[%c0_36, %c0_37, %c0_38], %54 {strides = array<i32>} : memref<2x13x78xf32, #tpu.memory_space<vmem>>, vector<2x13x78xf32>,
    %c0_39 = arith.constant 0 : index
    %c0_40 = arith.constant 0 : index
    %c0_41 = arith.constant 0 : index
    %56 = vector.load %arg17[%c0_39, %c0_40, %c0_41] : memref<2x13x78xf32, #tpu.memory_space<vmem>>, vector<2x11x78xf32>
    %c0_42 = arith.constant 0 : index
    %c0_43 = arith.constant 0 : index
    %c0_44 = arith.constant 0 : index
    %57 = vector.load %arg6[%c0_42, %c0_43, %c0_44] : memref<3x78x176xf32, #tpu.memory_space<vmem>>, vector<1x78x176xf32>
    %58 = vector.shape_cast %57 : vector<1x78x176xf32> to vector<78x176xf32>
    %59 = vector.shape_cast %58 : vector<78x176xf32> to vector<1x78x176xf32>
    %60 = vector.shape_cast %59 : vector<1x78x176xf32> to vector<1x78x176xf32>
    %61 = vector.broadcast %60 : vector<1x78x176xf32> to vector<2x78x176xf32>
    %cst_45 = arith.constant dense<0.000000e+00> : vector<2x11x176xf32>
    %62 = tpu.matmul %56, %61, %cst_45 {dimension_numbers = #tpu.dot_dimension_numbers<[2], [1], [1], [2], [0, 0, 0, 1, 1, 2], [0], [0]>} : vector<2x11x78xf32>, vector<2x78x176xf32>, vector<2x11x176xf32> -> vector<2x11x176xf32>
    %c0_46 = arith.constant 0 : index
    %c1_47 = arith.constant 1 : index
    %c0_48 = arith.constant 0 : index
    %63 = vector.load %arg17[%c0_46, %c1_47, %c0_48] : memref<2x13x78xf32, #tpu.memory_space<vmem>>, vector<2x11x78xf32>
    %c1_49 = arith.constant 1 : index
    %c0_50 = arith.constant 0 : index
    %c0_51 = arith.constant 0 : index
    %64 = vector.load %arg6[%c1_49, %c0_50, %c0_51] : memref<3x78x176xf32, #tpu.memory_space<vmem>>, vector<1x78x176xf32>
    %65 = vector.shape_cast %64 : vector<1x78x176xf32> to vector<78x176xf32>
    %66 = vector.shape_cast %65 : vector<78x176xf32> to vector<1x78x176xf32>
    %67 = vector.shape_cast %66 : vector<1x78x176xf32> to vector<1x78x176xf32>
    %68 = vector.broadcast %67 : vector<1x78x176xf32> to vector<2x78x176xf32>
    %cst_52 = arith.constant dense<0.000000e+00> : vector<2x11x176xf32>
    %69 = tpu.matmul %63, %68, %cst_52 {dimension_numbers = #tpu.dot_dimension_numbers<[2], [1], [1], [2], [0, 0, 0, 1, 1, 2], [0], [0]>} : vector<2x11x78xf32>, vector<2x78x176xf32>, vector<2x11x176xf32> -> vector<2x11x176xf32>
    %70 = arith.addf %62, %69 : vector<2x11x176xf32>
    %c0_53 = arith.constant 0 : index
    %c2_54 = arith.constant 2 : index
    %c0_55 = arith.constant 0 : index
    %71 = vector.load %arg17[%c0_53, %c2_54, %c0_55] : memref<2x13x78xf32, #tpu.memory_space<vmem>>, vector<2x11x78xf32>
    %c2_56 = arith.constant 2 : index
    %c0_57 = arith.constant 0 : index
    %c0_58 = arith.constant 0 : index
    %72 = vector.load %arg6[%c2_56, %c0_57, %c0_58] : memref<3x78x176xf32, #tpu.memory_space<vmem>>, vector<1x78x176xf32>
    %73 = vector.shape_cast %72 : vector<1x78x176xf32> to vector<78x176xf32>
    %74 = vector.shape_cast %73 : vector<78x176xf32> to vector<1x78x176xf32>
    %75 = vector.shape_cast %74 : vector<1x78x176xf32> to vector<1x78x176xf32>
    %76 = vector.broadcast %75 : vector<1x78x176xf32> to vector<2x78x176xf32>
    %cst_59 = arith.constant dense<0.000000e+00> : vector<2x11x176xf32>
    %77 = tpu.matmul %71, %76, %cst_59 {dimension_numbers = #tpu.dot_dimension_numbers<[2], [1], [1], [2], [0, 0, 0, 1, 1, 2], [0], [0]>} : vector<2x11x78xf32>, vector<2x78x176xf32>, vector<2x11x176xf32> -> vector<2x11x176xf32>
    %78 = arith.addf %70, %77 : vector<2x11x176xf32>
    %c0_60 = arith.constant 0 : index
    %c0_61 = arith.constant 0 : index
    %79 = vector.load %arg7[%c0_60, %c0_61] : memref<1x176xf32, #tpu.memory_space<vmem>>, vector<1x176xf32>
    %80 = vector.shape_cast %79 : vector<1x176xf32> to vector<1x1x176xf32>
    %81 = vector.broadcast %80 : vector<1x1x176xf32> to vector<2x11x176xf32>
    %82 = arith.addf %78, %81 : vector<2x11x176xf32>
    %cst_62 = arith.constant 0.000000e+00 : f32
    %83 = vector.broadcast %cst_62 : f32 to vector<2x11x176xf32>
    %84 = arith.maximumf %82, %83 : vector<2x11x176xf32>
    %c0_63 = arith.constant 0 : index
    %c0_64 = arith.constant 0 : index
    %c0_65 = arith.constant 0 : index
    %85 = vector.load %arg8[%c0_63, %c0_64, %c0_65] : memref<2x176x80xf32, #tpu.memory_space<vmem>>, vector<1x176x80xf32>
    %86 = vector.shape_cast %85 : vector<1x176x80xf32> to vector<176x80xf32>
    %87 = vector.shape_cast %86 : vector<176x80xf32> to vector<1x176x80xf32>
    %88 = vector.shape_cast %87 : vector<1x176x80xf32> to vector<1x176x80xf32>
    %89 = vector.broadcast %88 : vector<1x176x80xf32> to vector<2x176x80xf32>
    %cst_66 = arith.constant dense<0.000000e+00> : vector<2x11x80xf32>
    %90 = tpu.matmul %84, %89, %cst_66 {dimension_numbers = #tpu.dot_dimension_numbers<[2], [1], [1], [2], [0, 0, 0, 1, 1, 2], [0], [0]>} : vector<2x11x176xf32>, vector<2x176x80xf32>, vector<2x11x80xf32> -> vector<2x11x80xf32>
    %c1_67 = arith.constant 1 : index
    %c0_68 = arith.constant 0 : index
    %c0_69 = arith.constant 0 : index
    %91 = vector.load %arg8[%c1_67, %c0_68, %c0_69] : memref<2x176x80xf32, #tpu.memory_space<vmem>>, vector<1x176x80xf32>
    %92 = vector.shape_cast %91 : vector<1x176x80xf32> to vector<176x80xf32>
    %93 = vector.shape_cast %92 : vector<176x80xf32> to vector<1x176x80xf32>
    %94 = vector.shape_cast %93 : vector<1x176x80xf32> to vector<1x176x80xf32>
    %95 = vector.broadcast %94 : vector<1x176x80xf32> to vector<2x176x80xf32>
    %cst_70 = arith.constant dense<0.000000e+00> : vector<2x11x80xf32>
    %96 = tpu.matmul %84, %95, %cst_70 {dimension_numbers = #tpu.dot_dimension_numbers<[2], [1], [1], [2], [0, 0, 0, 1, 1, 2], [0], [0]>} : vector<2x11x176xf32>, vector<2x176x80xf32>, vector<2x11x80xf32> -> vector<2x11x80xf32>
    %97 = arith.maximumf %90, %96 : vector<2x11x80xf32>
    %c0_71 = arith.constant 0 : index
    %c0_72 = arith.constant 0 : index
    %c0_73 = arith.constant 0 : index
    %98 = vector.load %arg9[%c0_71, %c0_72, %c0_73] : memref<2x5x11xf32, #tpu.memory_space<vmem>>, vector<1x5x11xf32>
    %99 = vector.shape_cast %98 : vector<1x5x11xf32> to vector<5x11xf32>
    %100 = vector.shape_cast %99 : vector<5x11xf32> to vector<1x5x11xf32>
    %101 = vector.shape_cast %100 : vector<1x5x11xf32> to vector<1x5x11xf32>
    %102 = vector.broadcast %101 : vector<1x5x11xf32> to vector<2x5x11xf32>
    %cst_74 = arith.constant dense<0.000000e+00> : vector<2x5x80xf32>
    %103 = tpu.matmul %102, %97, %cst_74 {dimension_numbers = #tpu.dot_dimension_numbers<[2], [1], [1], [2], [0, 0, 0, 1, 1, 2], [0], [0]>} : vector<2x5x11xf32>, vector<2x11x80xf32>, vector<2x5x80xf32> -> vector<2x5x80xf32>
    %c1_75 = arith.constant 1 : index
    %c0_76 = arith.constant 0 : index
    %c0_77 = arith.constant 0 : index
    %104 = vector.load %arg9[%c1_75, %c0_76, %c0_77] : memref<2x5x11xf32, #tpu.memory_space<vmem>>, vector<1x5x11xf32>
    %105 = vector.shape_cast %104 : vector<1x5x11xf32> to vector<5x11xf32>
    %106 = vector.shape_cast %105 : vector<5x11xf32> to vector<1x5x11xf32>
    %107 = vector.shape_cast %106 : vector<1x5x11xf32> to vector<1x5x11xf32>
    %108 = vector.broadcast %107 : vector<1x5x11xf32> to vector<2x5x11xf32>
    %cst_78 = arith.constant dense<0.000000e+00> : vector<2x5x80xf32>
    %109 = tpu.matmul %108, %97, %cst_78 {dimension_numbers = #tpu.dot_dimension_numbers<[2], [1], [1], [2], [0, 0, 0, 1, 1, 2], [0], [0]>} : vector<2x5x11xf32>, vector<2x11x80xf32>, vector<2x5x80xf32> -> vector<2x5x80xf32>
    %110 = arith.maximumf %103, %109 : vector<2x5x80xf32>
    %c0_79 = arith.constant 0 : index
    %c0_80 = arith.constant 0 : index
    %c0_81 = arith.constant 0 : index
    %111 = vector.load %arg18[%c0_79, %c0_80, %c0_81] : memref<2x5x80xf32, #tpu.memory_space<vmem>>, vector<2x5x80xf32>
    tpu.vector_store %arg18[%c0_79, %c0_80, %c0_81], %110 {strides = array<i32>} : memref<2x5x80xf32, #tpu.memory_space<vmem>>, vector<2x5x80xf32>,
    %c0_82 = arith.constant 0 : index
    %c0_83 = arith.constant 0 : index
    %c0_84 = arith.constant 0 : index
    %112 = vector.load %arg18[%c0_82, %c0_83, %c0_84] : memref<2x5x80xf32, #tpu.memory_space<vmem>>, vector<2x1x80xf32>
    %113 = vector.shape_cast %112 : vector<2x1x80xf32> to vector<2x80xf32>
    %c0_85 = arith.constant 0 : index
    %c0_86 = arith.constant 0 : index
    %c0_87 = arith.constant 0 : index
    %114 = vector.load %arg10[%c0_85, %c0_86, %c0_87] : memref<5x80x120xf32, #tpu.memory_space<vmem>>, vector<1x80x120xf32>
    %115 = vector.shape_cast %114 : vector<1x80x120xf32> to vector<80x120xf32>
    %cst_88 = arith.constant dense<0.000000e+00> : vector<2x120xf32>
    %116 = tpu.matmul %113, %115, %cst_88 {dimension_numbers = #tpu.dot_dimension_numbers<[1], [0], [0], [1], [0, 0, 1, 1], [], []>} : vector<2x80xf32>, vector<80x120xf32>, vector<2x120xf32> -> vector<2x120xf32>
    %c0_89 = arith.constant 0 : index
    %c1_90 = arith.constant 1 : index
    %c0_91 = arith.constant 0 : index
    %117 = vector.load %arg18[%c0_89, %c1_90, %c0_91] : memref<2x5x80xf32, #tpu.memory_space<vmem>>, vector<2x1x80xf32>
    %118 = vector.shape_cast %117 : vector<2x1x80xf32> to vector<2x80xf32>
    %c1_92 = arith.constant 1 : index
    %c0_93 = arith.constant 0 : index
    %c0_94 = arith.constant 0 : index
    %119 = vector.load %arg10[%c1_92, %c0_93, %c0_94] : memref<5x80x120xf32, #tpu.memory_space<vmem>>, vector<1x80x120xf32>
    %120 = vector.shape_cast %119 : vector<1x80x120xf32> to vector<80x120xf32>
    %cst_95 = arith.constant dense<0.000000e+00> : vector<2x120xf32>
    %121 = tpu.matmul %118, %120, %cst_95 {dimension_numbers = #tpu.dot_dimension_numbers<[1], [0], [0], [1], [0, 0, 1, 1], [], []>} : vector<2x80xf32>, vector<80x120xf32>, vector<2x120xf32> -> vector<2x120xf32>
    %122 = arith.addf %116, %121 : vector<2x120xf32>
    %c0_96 = arith.constant 0 : index
    %c2_97 = arith.constant 2 : index
    %c0_98 = arith.constant 0 : index
    %123 = vector.load %arg18[%c0_96, %c2_97, %c0_98] : memref<2x5x80xf32, #tpu.memory_space<vmem>>, vector<2x1x80xf32>
    %124 = vector.shape_cast %123 : vector<2x1x80xf32> to vector<2x80xf32>
    %c2_99 = arith.constant 2 : index
    %c0_100 = arith.constant 0 : index
    %c0_101 = arith.constant 0 : index
    %125 = vector.load %arg10[%c2_99, %c0_100, %c0_101] : memref<5x80x120xf32, #tpu.memory_space<vmem>>, vector<1x80x120xf32>
    %126 = vector.shape_cast %125 : vector<1x80x120xf32> to vector<80x120xf32>
    %cst_102 = arith.constant dense<0.000000e+00> : vector<2x120xf32>
    %127 = tpu.matmul %124, %126, %cst_102 {dimension_numbers = #tpu.dot_dimension_numbers<[1], [0], [0], [1], [0, 0, 1, 1], [], []>} : vector<2x80xf32>, vector<80x120xf32>, vector<2x120xf32> -> vector<2x120xf32>
    %128 = arith.addf %122, %127 : vector<2x120xf32>
    %c0_103 = arith.constant 0 : index
    %c3 = arith.constant 3 : index
    %c0_104 = arith.constant 0 : index
    %129 = vector.load %arg18[%c0_103, %c3, %c0_104] : memref<2x5x80xf32, #tpu.memory_space<vmem>>, vector<2x1x80xf32>
    %130 = vector.shape_cast %129 : vector<2x1x80xf32> to vector<2x80xf32>
    %c3_105 = arith.constant 3 : index
    %c0_106 = arith.constant 0 : index
    %c0_107 = arith.constant 0 : index
    %131 = vector.load %arg10[%c3_105, %c0_106, %c0_107] : memref<5x80x120xf32, #tpu.memory_space<vmem>>, vector<1x80x120xf32>
    %132 = vector.shape_cast %131 : vector<1x80x120xf32> to vector<80x120xf32>
    %cst_108 = arith.constant dense<0.000000e+00> : vector<2x120xf32>
    %133 = tpu.matmul %130, %132, %cst_108 {dimension_numbers = #tpu.dot_dimension_numbers<[1], [0], [0], [1], [0, 0, 1, 1], [], []>} : vector<2x80xf32>, vector<80x120xf32>, vector<2x120xf32> -> vector<2x120xf32>
    %134 = arith.addf %128, %133 : vector<2x120xf32>
    %c0_109 = arith.constant 0 : index
    %c4 = arith.constant 4 : index
    %c0_110 = arith.constant 0 : index
    %135 = vector.load %arg18[%c0_109, %c4, %c0_110] : memref<2x5x80xf32, #tpu.memory_space<vmem>>, vector<2x1x80xf32>
    %136 = vector.shape_cast %135 : vector<2x1x80xf32> to vector<2x80xf32>
    %c4_111 = arith.constant 4 : index
    %c0_112 = arith.constant 0 : index
    %c0_113 = arith.constant 0 : index
    %137 = vector.load %arg10[%c4_111, %c0_112, %c0_113] : memref<5x80x120xf32, #tpu.memory_space<vmem>>, vector<1x80x120xf32>
    %138 = vector.shape_cast %137 : vector<1x80x120xf32> to vector<80x120xf32>
    %cst_114 = arith.constant dense<0.000000e+00> : vector<2x120xf32>
    %139 = tpu.matmul %136, %138, %cst_114 {dimension_numbers = #tpu.dot_dimension_numbers<[1], [0], [0], [1], [0, 0, 1, 1], [], []>} : vector<2x80xf32>, vector<80x120xf32>, vector<2x120xf32> -> vector<2x120xf32>
    %140 = arith.addf %134, %139 : vector<2x120xf32>
    %c0_115 = arith.constant 0 : index
    %c0_116 = arith.constant 0 : index
    %141 = vector.load %arg11[%c0_115, %c0_116] : memref<1x120xf32, #tpu.memory_space<vmem>>, vector<1x120xf32>
    %142 = vector.broadcast %141 : vector<1x120xf32> to vector<2x120xf32>
    %143 = arith.addf %140, %142 : vector<2x120xf32>
    %cst_117 = arith.constant 0.000000e+00 : f32
    %144 = vector.broadcast %cst_117 : f32 to vector<2x120xf32>
    %145 = arith.maximumf %143, %144 : vector<2x120xf32>
    %c0_118 = arith.constant 0 : index
    %c0_119 = arith.constant 0 : index
    %146 = vector.load %arg12[%c0_118, %c0_119] : memref<120x84xf32, #tpu.memory_space<vmem>>, vector<120x84xf32>
    %cst_120 = arith.constant dense<0.000000e+00> : vector<2x84xf32>
    %147 = tpu.matmul %145, %146, %cst_120 {dimension_numbers = #tpu.dot_dimension_numbers<[1], [0], [0], [1], [0, 0, 1, 1], [], []>} : vector<2x120xf32>, vector<120x84xf32>, vector<2x84xf32> -> vector<2x84xf32>
    %c0_121 = arith.constant 0 : index
    %c0_122 = arith.constant 0 : index
    %148 = vector.load %arg13[%c0_121, %c0_122] : memref<1x84xf32, #tpu.memory_space<vmem>>, vector<1x84xf32>
    %149 = vector.broadcast %148 : vector<1x84xf32> to vector<2x84xf32>
    %150 = arith.addf %147, %149 : vector<2x84xf32>
    %cst_123 = arith.constant 0.000000e+00 : f32
    %151 = vector.broadcast %cst_123 : f32 to vector<2x84xf32>
    %152 = arith.maximumf %150, %151 : vector<2x84xf32>
    %c0_124 = arith.constant 0 : index
    %c0_125 = arith.constant 0 : index
    %153 = vector.load %arg14[%c0_124, %c0_125] : memref<84x10xf32, #tpu.memory_space<vmem>>, vector<84x10xf32>
    %cst_126 = arith.constant dense<0.000000e+00> : vector<2x10xf32>
    %154 = tpu.matmul %152, %153, %cst_126 {dimension_numbers = #tpu.dot_dimension_numbers<[1], [0], [0], [1], [0, 0, 1, 1], [], []>} : vector<2x84xf32>, vector<84x10xf32>, vector<2x10xf32> -> vector<2x10xf32>
    %c0_127 = arith.constant 0 : index
    %c0_128 = arith.constant 0 : index
    %155 = vector.load %arg15[%c0_127, %c0_128] : memref<1x10xf32, #tpu.memory_space<vmem>>, vector<1x10xf32>
    %156 = vector.broadcast %155 : vector<1x10xf32> to vector<2x10xf32>
    %157 = arith.addf %154, %156 : vector<2x10xf32>
    %cst_129 = arith.constant dense<0xFF800000> : vector<2xf32>
    %158 = vector.multi_reduction <maximumf>, %157, %cst_129 [1] : vector<2x10xf32> to vector<2xf32>
    %159 = vector.shape_cast %158 : vector<2xf32> to vector<2x1xf32>
    %160 = vector.broadcast %159 : vector<2x1xf32> to vector<2x10xf32>
    %161 = arith.subf %157, %160 : vector<2x10xf32>
    %162 = math.exp %161 : vector<2x10xf32>
    %cst_130 = arith.constant dense<0.000000e+00> : vector<2xf32>
    %163 = vector.multi_reduction <add>, %162, %cst_130 [1] : vector<2x10xf32> to vector<2xf32>
    %164 = vector.shape_cast %163 : vector<2xf32> to vector<2x1xf32>
    %165 = math.log %164 : vector<2x1xf32>
    %166 = arith.addf %159, %165 : vector<2x1xf32>
    %167 = vector.broadcast %166 : vector<2x1xf32> to vector<2x10xf32>
    %168 = arith.subf %157, %167 : vector<2x10xf32>
    %c0_131 = arith.constant 0 : index
    %c0_132 = arith.constant 0 : index
    %169 = vector.load %arg16[%c0_131, %c0_132] : memref<2x10xf32, #tpu.memory_space<vmem>>, vector<2x10xf32>
    tpu.vector_store %arg16[%c0_131, %c0_132], %168 {strides = array<i32>} : memref<2x10xf32, #tpu.memory_space<vmem>>, vector<2x10xf32>,
    return
  }
  func.func @transform_0(%arg0: i32) -> (i32, i32, i32) {
    %c0_i32 = arith.constant 0 : i32
    %c0_i32_0 = arith.constant 0 : i32
    %c0_i32_1 = arith.constant 0 : i32
    return %arg0, %c0_i32, %c0_i32_0 : i32, i32, i32
  }
  func.func @transform_1(%arg0: i32) -> (i32, i32, i32) {
    %c0_i32 = arith.constant 0 : i32
    %c0_i32_0 = arith.constant 0 : i32
    %c0_i32_1 = arith.constant 0 : i32
    %c0_i32_2 = arith.constant 0 : i32
    return %c0_i32, %c0_i32_0, %c0_i32_1 : i32, i32, i32
  }
  func.func @transform_2(%arg0: i32) -> (i32, i32) {
    %c0_i32 = arith.constant 0 : i32
    %c0_i32_0 = arith.constant 0 : i32
    %c0_i32_1 = arith.constant 0 : i32
    return %c0_i32, %c0_i32_0 : i32, i32
  }
  func.func @transform_3(%arg0: i32) -> (i32, i32, i32) {
    %c0_i32 = arith.constant 0 : i32
    %c0_i32_0 = arith.constant 0 : i32
    %c0_i32_1 = arith.constant 0 : i32
    %c0_i32_2 = arith.constant 0 : i32
    return %c0_i32, %c0_i32_0, %c0_i32_1 : i32, i32, i32
  }
  func.func @transform_4(%arg0: i32) -> (i32, i32, i32) {
    %c0_i32 = arith.constant 0 : i32
    %c0_i32_0 = arith.constant 0 : i32
    %c0_i32_1 = arith.constant 0 : i32
    %c0_i32_2 = arith.constant 0 : i32
    return %c0_i32, %c0_i32_0, %c0_i32_1 : i32, i32, i32
  }
  func.func @transform_5(%arg0: i32) -> (i32, i32, i32) {
    %c0_i32 = arith.constant 0 : i32
    %c0_i32_0 = arith.constant 0 : i32
    %c0_i32_1 = arith.constant 0 : i32
    %c0_i32_2 = arith.constant 0 : i32
    return %c0_i32, %c0_i32_0, %c0_i32_1 : i32, i32, i32
  }
  func.func @transform_6(%arg0: i32) -> (i32, i32) {
    %c0_i32 = arith.constant 0 : i32
    %c0_i32_0 = arith.constant 0 : i32
    %c0_i32_1 = arith.constant 0 : i32
    return %c0_i32, %c0_i32_0 : i32, i32
  }
  func.func @transform_7(%arg0: i32) -> (i32, i32, i32) {
    %c0_i32 = arith.constant 0 : i32
    %c0_i32_0 = arith.constant 0 : i32
    %c0_i32_1 = arith.constant 0 : i32
    %c0_i32_2 = arith.constant 0 : i32
    return %c0_i32, %c0_i32_0, %c0_i32_1 : i32, i32, i32
  }
  func.func @transform_8(%arg0: i32) -> (i32, i32, i32) {
    %c0_i32 = arith.constant 0 : i32
    %c0_i32_0 = arith.constant 0 : i32
    %c0_i32_1 = arith.constant 0 : i32
    %c0_i32_2 = arith.constant 0 : i32
    return %c0_i32, %c0_i32_0, %c0_i32_1 : i32, i32, i32
  }
  func.func @transform_9(%arg0: i32) -> (i32, i32, i32) {
    %c0_i32 = arith.constant 0 : i32
    %c0_i32_0 = arith.constant 0 : i32
    %c0_i32_1 = arith.constant 0 : i32
    %c0_i32_2 = arith.constant 0 : i32
    return %c0_i32, %c0_i32_0, %c0_i32_1 : i32, i32, i32
  }
  func.func @transform_10(%arg0: i32) -> (i32, i32) {
    %c0_i32 = arith.constant 0 : i32
    %c0_i32_0 = arith.constant 0 : i32
    %c0_i32_1 = arith.constant 0 : i32
    return %c0_i32, %c0_i32_0 : i32, i32
  }
  func.func @transform_11(%arg0: i32) -> (i32, i32) {
    %c0_i32 = arith.constant 0 : i32
    %c0_i32_0 = arith.constant 0 : i32
    %c0_i32_1 = arith.constant 0 : i32
    return %c0_i32, %c0_i32_0 : i32, i32
  }
  func.func @transform_12(%arg0: i32) -> (i32, i32) {
    %c0_i32 = arith.constant 0 : i32
    %c0_i32_0 = arith.constant 0 : i32
    %c0_i32_1 = arith.constant 0 : i32
    return %c0_i32, %c0_i32_0 : i32, i32
  }
  func.func @transform_13(%arg0: i32) -> (i32, i32) {
    %c0_i32 = arith.constant 0 : i32
    %c0_i32_0 = arith.constant 0 : i32
    %c0_i32_1 = arith.constant 0 : i32
    return %c0_i32, %c0_i32_0 : i32, i32
  }
  func.func @transform_14(%arg0: i32) -> (i32, i32) {
    %c0_i32 = arith.constant 0 : i32
    %c0_i32_0 = arith.constant 0 : i32
    %c0_i32_1 = arith.constant 0 : i32
    return %c0_i32, %c0_i32_0 : i32, i32
  }
  func.func @transform_15(%arg0: i32) -> (i32, i32) {
    %c0_i32 = arith.constant 0 : i32
    %c0_i32_0 = arith.constant 0 : i32
    return %arg0, %c0_i32 : i32, i32
  }
}

</mosaic_0001>

<bundles_post_ra>
// kernel: tile.13
= control target key start
LH: loop header
LB: loop body
LE: loop exit
PB: predicated region body
PF: predicated region fallthrough
CT: control target
= control target key end

     0   :  { %s40_s0 = inlined_call_operand.vmem [shape: f32[6], index: 0, kind: input, shape index: {}]   ;;  %s41_s1 = inlined_call_operand.vmem [shape: f32[26,6], index: 1, kind: output, shape index: {}]  }
   0x1   :  { %v4_v0 = vld [vmem:[%s40_s0] ss:$0 sm:$0xff] }
   0x2   :  { %5 = vst [vmem:[%s41_s1] sm:$0xff] %v4_v0  ;;  %12 = vst [vmem:[%s41_s1 + $0x8] sm:$0xff] %v4_v0 }
   0x3   :  { %13 = vst [vmem:[%s41_s1 + $0x10] sm:$0xff] %v4_v0  ;;  %14 = vst [vmem:[%s41_s1 + $0x18] sm:$0xff] %v4_v0 }

// kernel: tile.14
= control target key start
LH: loop header
LB: loop body
LE: loop exit
PB: predicated region body
PF: predicated region fallthrough
CT: control target
= control target key end

     0   :  { %vm9_vm0 = vcmask 15360   ;;  %s232_s12 = smov 126   ;;  %s233_s13 = smov 114   ;;  %vm3_vm1 = vcmask 48128   ;;  %vm13_vm2 = vcmask 31744   ;;  %vm16_vm3 = vcmask 1048560   ;;  %s354_s0 = inlined_call_operand.vmem [shape: f32[26,6], index: 0, kind: input, shape index: {}]   ;;  %s355_s1 = inlined_call_operand.vmem [shape: f32[1,156], index: 1, kind: output, shape index: {}]  }
   0x1   :  { %v180_v0 = vld [vmem:[%s354_s0 + $0x15] sm:$0x1]   ;;  %v183_v3 = vld [vmem:[%s354_s0 + $0x13] sm:$0x1]   ;;  %v182_v4 = vld [vmem:[%s354_s0 + $0x14] sm:$0x1]  }
   0x2   :  { %v181_v1 = vld [vmem:[%s354_s0 + $0x15] sm:$0x1]   ;;  %26 = vrot.lane.b32.xlu1 %v183_v3, %s233_s13  ;;  %v184_v5 = vld [vmem:[%s354_s0 + $0x12] sm:$0x1]   ;;  %s234_s18 = smov 120   ;;  %s235_s19 = smov 108  }
   0x3   :  { %v10_v2 = vsel %vm9_vm0, %v181_v1, %v180_v0  ;;  %v185_v6 = vld [vmem:[%s354_s0 + $0x11] sm:$0x1]   ;;  %v186_v7 = vld [vmem:[%s354_s0 + $0x10] sm:$0x1]   ;;  %s236_s24 = smov 102   ;;  %s237_s25 = smov 96  }
   0x4   :  { %11 = vrot.lane.b32.xlu0 %v10_v2, %s232_s12  ;;  %v187_v8 = vld [vmem:[%s354_s0 + $0xf] sm:$0x1]   ;;  %v188_v9 = vld [vmem:[%s354_s0 + $0xe] sm:$0x1]   ;;  %v2_v10 = vld [vmem:[%s354_s0] sm:$0x1]  }
   0x5   :  { %s238_s3 = smov 90   ;;  %s239_s4 = smov 84   ;;  %4 = vst.msk [vmem:[#allocation0] sm:$0x1] %vm3_vm1, %v2_v10   ;;  %v189_v11 = vld [vmem:[%s354_s0 + $0xd] sm:$0x1]  }
   0x6   :  { %32 = vrot.lane.b32.xlu1 %v184_v5, %s235_s19  ;;  %v190_v12 = vld [vmem:[%s354_s0 + $0xc] sm:$0x1]   ;;  %s240_s9 = smov 78   ;;  %s241_s10 = smov 72   ;;  %v191_v13 = vld [vmem:[%s354_s0 + $0xb] sm:$0x1]  }
   0x7   :  { %v192_v14 = vld [vmem:[%s354_s0 + $0xa] sm:$0x1]   ;;  %s242_s15 = smov 66   ;;  %s243_s16 = smov 60   ;;  %v193_v15 = vld [vmem:[%s354_s0 + $0x9] sm:$0x1]  }
   0x8   :  { %20 = vrot.lane.b32.xlu0 %v182_v4, %s234_s18  ;;  %v194_v16 = vld [vmem:[%s354_s0 + $0x8] sm:$0x1]   ;;  %s244_s21 = smov 54   ;;  %s245_s22 = smov 48   ;;  %v195_v17 = vld [vmem:[%s354_s0 + $0x7] sm:$0x1]  }
   0x9   :  { %v196_v18 = vld [vmem:[%s354_s0 + $0x6] sm:$0x1]   ;;  %s246_s27 = smov 42   ;;  %s247_s28 = smov 36   ;;  %v197_v19 = vld [vmem:[%s354_s0 + $0x5] sm:$0x1]  }
   0xa   :  { %44 = vrot.lane.b32.xlu1 %v186_v7, %s237_s25  ;;  %v198_v20 = vld [vmem:[%s354_s0 + $0x4] sm:$0x1]   ;;  %s249_s5 = smov 24   ;;  %v199_v21 = vld [vmem:[%s354_s0 + $0x19] sm:$0x1]   ;;  %s251_s11 = smov 18  }
   0xb   :  { %v200_v22 = vld [vmem:[%s354_s0 + $0x3] sm:$0x1]   ;;  %v201_v23 = vld [vmem:[%s354_s0 + $0x18] sm:$0x1]   ;;  %v202_v24 = vld [vmem:[%s354_s0 + $0x2] sm:$0x1]  }
   0xc   :  { %38 = vrot.lane.b32.xlu0 %v185_v6, %s236_s24  ;;  %s253_s17 = smov 12   ;;  %v203_v25 = vld [vmem:[%s354_s0 + $0x17] sm:$0x1]   ;;  %v204_v26 = vld [vmem:[%s354_s0 + $0x1] sm:$0x1]   ;;  %s255_s23 = smov 6  }
   0xd   :  { %v205_v27 = vld [vmem:[%s354_s0 + $0x16] sm:$0x1]   ;;  %s256_s0 = smov 4   ;;  %vm22_vm4 = vcmask 1032128   ;;  %vm28_vm5 = vcmask 982928   ;;  %vm34_vm6 = vcmask 933728  }
   0xe   :  { %56 = vrot.lane.b32.xlu1 %v188_v9, %s239_s4  ;;  %s248_s4 = smov 30   ;;  %vm40_vm7 = vcmask 884528   ;;  %vm46_vm8 = vcmask 835328   ;;  %vm52_vm9 = vcmask 786128   ;;  %vm58_vm10 = vcmask 736928  }
   0xf   :  { %vm64_vm11 = vcmask 687728   ;;  %vm70_vm12 = vcmask 638528   ;;  %vm76_vm13 = vcmask 589328   ;;  %vm82_vm14 = vcmask 540128  }
  0x10   :  { %50 = vrot.lane.b32.xlu0 %v187_v8, %s238_s3  ;;  %vm88_vm15 = vcmask 490928   ;;  %vm94_vm0 = vcmask 441728   ;;  %vm100_vm1 = vcmask 392528  }
  0x12   :  { %68 = vrot.lane.b32.xlu1 %v190_v12, %s241_s10  ;;  %s250_s10 = smov 22  }
  0x14   :  { %62 = vrot.lane.b32.xlu0 %v189_v11, %s240_s9 }
  0x16   :  { %80 = vrot.lane.b32.xlu1 %v192_v14, %s243_s16  ;;  %s252_s16 = smov 16  }
  0x18   :  { %74 = vrot.lane.b32.xlu0 %v191_v13, %s242_s15 }
  0x1a   :  { %92 = vrot.lane.b32.xlu1 %v194_v16, %s245_s22  ;;  %s254_s22 = smov 10  }
  0x1c   :  { %86 = vrot.lane.b32.xlu0 %v193_v15, %s244_s21 }
  0x1e   :  { %104 = vrot.lane.b32.xlu1 %v196_v18, %s247_s28 }
  0x20   :  { %98 = vrot.lane.b32.xlu0 %v195_v17, %s246_s27 }
  0x22   :  { %116 = vrot.lane.b32.xlu1 %v198_v20, %s249_s5 }
  0x24   :  { %110 = vrot.lane.b32.xlu0 %v197_v19, %s248_s4 }
  0x26   :  { %129 = vrot.lane.b32.xlu1 %v200_v22, %s251_s11 }
  0x28   :  { %122 = vrot.lane.b32.xlu0 %v199_v21, %s250_s10 }
  0x2a   :  { %142 = vrot.lane.b32.xlu1 %v202_v24, %s253_s17 }
  0x2c   :  { %135 = vrot.lane.b32.xlu0 %v201_v23, %s252_s16 }
  0x2e   :  { %155 = vrot.lane.b32.xlu1 %v204_v26, %s255_s23 }
  0x30   :  { %148 = vrot.lane.b32.xlu0 %v203_v25, %s254_s22 }
  0x34   :  { %161 = vrot.lane.b32.xlu0 %v205_v27, %s256_s0 }
  0x74   :  { %v27_v29 = vpop.permute.xlu1 %26  }
  0x76   :  { %v12_v28 = vpop.permute.xlu0 %11  }
  0x77   :  { %15 = vst.msk [vmem:[#allocation0 + $0x8] sm:$0x1] %vm13_vm2, %v12_v28   ;;  %vm106_vm2 = vcmask 343328  }
  0x78   :  { %17 = vst.msk [vmem:[#allocation0] sm:$0x1] %vm16_vm3, %v12_v28   ;;  %v33_v31 = vpop.permute.xlu1 %32   ;;  %vm112_vm3 = vcmask 294128  }
  0x7a   :  { %v21_v30 = vpop.permute.xlu0 %20  }
  0x7b   :  { %23 = vst.msk [vmem:[#allocation0] sm:$0x1] %vm22_vm4, %v21_v30   ;;  %vm118_vm4 = vcmask 244928  }
  0x7c   :  { %29 = vst.msk [vmem:[#allocation0] sm:$0x1] %vm28_vm5, %v27_v29   ;;  %v45_v33 = vpop.permute.xlu1 %44   ;;  %vm124_vm5 = vcmask 228528  }
  0x7d   :  { %35 = vst.msk [vmem:[#allocation0] sm:$0x1] %vm34_vm6, %v33_v31   ;;  %vm131_vm6 = vcmask 195728  }
  0x7e   :  { %v39_v32 = vpop.permute.xlu0 %38  }
  0x7f   :  { %41 = vst.msk [vmem:[#allocation0] sm:$0x1] %vm40_vm7, %v39_v32   ;;  %vm137_vm7 = vcmask 179328  }
  0x80   :  { %47 = vst.msk [vmem:[#allocation0] sm:$0x1] %vm46_vm8, %v45_v33   ;;  %v57_v35 = vpop.permute.xlu1 %56   ;;  %vm144_vm8 = vcmask 146528  }
  0x82   :  { %v51_v34 = vpop.permute.xlu0 %50  }
  0x83   :  { %53 = vst.msk [vmem:[#allocation0] sm:$0x1] %vm52_vm9, %v51_v34   ;;  %vm150_vm9 = vcmask 130128  }
  0x84   :  { %59 = vst.msk [vmem:[#allocation0] sm:$0x1] %vm58_vm10, %v57_v35   ;;  %v69_v37 = vpop.permute.xlu1 %68   ;;  %vm157_vm10 = vcmask 97328  }
  0x86   :  { %v63_v36 = vpop.permute.xlu0 %62  }
  0x87   :  { %65 = vst.msk [vmem:[#allocation0] sm:$0x1] %vm64_vm11, %v63_v36   ;;  %vm163_vm11 = vcmask 80928  }
  0x88   :  { %71 = vst.msk [vmem:[#allocation0] sm:$0x1] %vm70_vm12, %v69_v37   ;;  %v81_v39 = vpop.permute.xlu1 %80  }
  0x8a   :  { %v75_v38 = vpop.permute.xlu0 %74  }
  0x8b   :  { %77 = vst.msk [vmem:[#allocation0] sm:$0x1] %vm76_vm13, %v75_v38  }
  0x8c   :  { %83 = vst.msk [vmem:[#allocation0] sm:$0x1] %vm82_vm14, %v81_v39   ;;  %v93_v41 = vpop.permute.xlu1 %92  }
  0x8e   :  { %v87_v40 = vpop.permute.xlu0 %86  }
  0x8f   :  { %89 = vst.msk [vmem:[#allocation0] sm:$0x1] %vm88_vm15, %v87_v40  }
  0x90   :  { %95 = vst.msk [vmem:[#allocation0] sm:$0x1] %vm94_vm0, %v93_v41   ;;  %v105_v43 = vpop.permute.xlu1 %104  }
  0x92   :  { %v99_v42 = vpop.permute.xlu0 %98  }
  0x93   :  { %101 = vst.msk [vmem:[#allocation0] sm:$0x1] %vm100_vm1, %v99_v42  }
  0x94   :  { %107 = vst.msk [vmem:[#allocation0] sm:$0x1] %vm106_vm2, %v105_v43   ;;  %v117_v45 = vpop.permute.xlu1 %116  }
  0x96   :  { %v111_v44 = vpop.permute.xlu0 %110  }
  0x97   :  { %113 = vst.msk [vmem:[#allocation0] sm:$0x1] %vm112_vm3, %v111_v44  }
  0x98   :  { %119 = vst.msk [vmem:[#allocation0] sm:$0x1] %vm118_vm4, %v117_v45   ;;  %v130_v47 = vpop.permute.xlu1 %129  }
  0x99   :  { %132 = vst.msk [vmem:[#allocation0] sm:$0x1] %vm131_vm6, %v130_v47  }
  0x9a   :  { %v123_v46 = vpop.permute.xlu0 %122  }
  0x9b   :  { %126 = vst.msk [vmem:[#allocation0 + $0x8] sm:$0x1] %vm124_vm5, %v123_v46  }
  0x9c   :  { %v143_v49 = vpop.permute.xlu1 %142  }
  0x9d   :  { %145 = vst.msk [vmem:[#allocation0] sm:$0x1] %vm144_vm8, %v143_v49  }
  0x9e   :  { %v136_v48 = vpop.permute.xlu0 %135  }
  0x9f   :  { %139 = vst.msk [vmem:[#allocation0 + $0x8] sm:$0x1] %vm137_vm7, %v136_v48  }
  0xa0   :  { %v156_v51 = vpop.permute.xlu1 %155  }
  0xa1   :  { %158 = vst.msk [vmem:[#allocation0] sm:$0x1] %vm157_vm10, %v156_v51  }
  0xa2   :  { %v149_v50 = vpop.permute.xlu0 %148  }
  0xa3   :  { %152 = vst.msk [vmem:[#allocation0 + $0x8] sm:$0x1] %vm150_vm9, %v149_v50  }
  0xa6   :  { %v162_v52 = vpop.permute.xlu0 %161  }
  0xa7   :  { %165 = vst.msk [vmem:[#allocation0 + $0x8] sm:$0x1] %vm163_vm11, %v162_v52  }
  0xa8   :  { %v170_v53 = vld [vmem:[#allocation0] sm:$0x1] }
  0xa9   :  { %173 = vst [vmem:[%s355_s1] sm:$0x1] %v170_v53 }
  0xae   :  { %v175_v54 = vld [vmem:[#allocation0 + $0x8] sm:$0x1] }
  0xaf   :  { %206 = vst [vmem:[%s355_s1 + $0x1] sm:$0x1] %v175_v54 }

// kernel: tile.18
= control target key start
LH: loop header
LB: loop body
LE: loop exit
PB: predicated region body
PF: predicated region fallthrough
CT: control target
= control target key end

     0   :  { %s28_s0 = inlined_call_operand.vmem [shape: f32[16], index: 0, kind: input, shape index: {}]   ;;  %s29_s1 = inlined_call_operand.vmem [shape: f32[11,16], index: 1, kind: output, shape index: {}]  }
   0x1   :  { %v4_v0 = vld [vmem:[%s28_s0] ss:$0 sm:$0xff] }
   0x2   :  { %5 = vst [vmem:[%s29_s1] sm:$0xff] %v4_v0  ;;  %8 = vst [vmem:[%s29_s1 + $0x8] sm:$0xff] %v4_v0 }

// kernel: tile.19
= control target key start
LH: loop header
LB: loop body
LE: loop exit
PB: predicated region body
PF: predicated region fallthrough
CT: control target
= control target key end

     0   :  { %s79_s10 = smov 112   ;;  %s80_s11 = smov 80   ;;  %vm4_vm0 = vcmask 130048   ;;  %vm10_vm1 = vcmask 1048448   ;;  %vm16_vm2 = vcmask 917248   ;;  %vm22_vm3 = vcmask 786048   ;;  %s126_s0 = inlined_call_operand.vmem [shape: f32[11,16], index: 0, kind: input, shape index: {}]   ;;  %s127_s1 = inlined_call_operand.vmem [shape: f32[1,176], index: 1, kind: output, shape index: {}]  }
   0x1   :  { %v64_v0 = vld [vmem:[%s126_s0 + $0x7] sm:$0x1]   ;;  %v66_v1 = vld [vmem:[%s126_s0 + $0x5] sm:$0x1]   ;;  %v65_v2 = vld [vmem:[%s126_s0 + $0x6] sm:$0x1]  }
   0x2   :  { %8 = vrot.lane.b32.xlu0 %v64_v0, %s79_s10  ;;  %20 = vrot.lane.b32.xlu1 %v66_v1, %s80_s11  ;;  %v67_v3 = vld [vmem:[%s126_s0 + $0x4] sm:$0x1]   ;;  %s37_s16 = smov 3  ;;  %s2_s17 = smov 3  ;;  %v68_v5 = vld [vmem:[%s126_s0 + $0x3] sm:$0x1]  }
   0x3   :  { %s81_s18 = smov 96   ;;  %s82_s19 = smov 64   ;;  %v3_v4 = vld [vmem:[%s126_s0] ss:$8 sm:%s2_s17]   ;;  %v69_v6 = vld [vmem:[%s126_s0 + $0x2] ss:$8 sm:%s37_s16]  }
   0x4   :  { %5 = vst.msk [vmem:[#allocation0] ss:$8 sm:$0x3] %vm4_vm0, %v3_v4   ;;  %s44_s26 = smov 3  ;;  %s83_s27 = smov 48   ;;  %vm28_vm4 = vcmask 654848  }
   0x5   :  { %s84_s28 = smov 32   ;;  %v70_v7 = vld [vmem:[%s126_s0 + $0x1] ss:$8 sm:%s44_s26]   ;;  %s85_s0 = smov 16   ;;  %vm34_vm5 = vcmask 523648   ;;  %vm41_vm6 = vcmask 392448  }
   0x6   :  { %14 = vrot.lane.b32.xlu0 %v65_v2, %s81_s18  ;;  %26 = vrot.lane.b32.xlu1 %v67_v3, %s82_s19  ;;  %vm48_vm7 = vcmask 261248  }
   0xa   :  { %32 = vrot.lane.b32.xlu0 %v68_v5, %s83_s27  ;;  %39 = vrot.lane.b32.xlu1 %v69_v6, %s84_s28 }
   0xe   :  { %46 = vrot.lane.b32.xlu0 %v70_v7, %s85_s0 }
  0x74   :  { %v9_v8 = vpop.permute.xlu0 %8   ;;  %v21_v9 = vpop.permute.xlu1 %20  }
  0x75   :  { %11 = vst.msk [vmem:[#allocation0] sm:$0x1] %vm10_vm1, %v9_v8  }
  0x78   :  { %v15_v10 = vpop.permute.xlu0 %14   ;;  %v27_v11 = vpop.permute.xlu1 %26  }
  0x79   :  { %17 = vst.msk [vmem:[#allocation0] sm:$0x1] %vm16_vm2, %v15_v10  }
  0x7a   :  { %23 = vst.msk [vmem:[#allocation0] sm:$0x1] %vm22_vm3, %v21_v9  }
  0x7b   :  { %29 = vst.msk [vmem:[#allocation0] sm:$0x1] %vm28_vm4, %v27_v11  }
  0x7c   :  { %v33_v12 = vpop.permute.xlu0 %32   ;;  %v40_v13 = vpop.permute.xlu1 %39  }
  0x7d   :  { %35 = vst.msk [vmem:[#allocation0] sm:$0x1] %vm34_vm5, %v33_v12  }
  0x7e   :  { %42 = vst.msk [vmem:[#allocation0] ss:$8 sm:$0x3] %vm41_vm6, %v40_v13  }
  0x80   :  { %v47_v14 = vpop.permute.xlu0 %46  }
  0x81   :  { %49 = vst.msk [vmem:[#allocation0] ss:$8 sm:$0x3] %vm48_vm7, %v47_v14  }
  0x88   :  { %v54_v15 = vld [vmem:[#allocation0] sm:$0x1]  ;;  %v59_v16 = vld [vmem:[#allocation0 + $0x8] sm:$0x1] }
  0x89   :  { %57 = vst [vmem:[%s127_s1] sm:$0x1] %v54_v15  ;;  %71 = vst [vmem:[%s127_s1 + $0x1] sm:$0x1] %v59_v16 }

// kernel: convolutional_network_forward.1
= control target key start
LH: loop header
LB: loop body
LE: loop exit
PB: predicated region body
PF: predicated region fallthrough
CT: control target
= control target key end

     0   :  { %vm97_vm0 = vcmask 1043456   ;;  %vm84_vm1 = vcmask 228352   ;;  %v4172_v11 = vmov 0.0   ;;  %s5828_s0 = inlined_call_operand.vmem [shape: f32[2,28,28], index: 0, kind: input, shape index: {}]   ;;  %s5829_s1 = inlined_call_operand.vmem [shape: f32[3,28,156], index: 1, kind: input, shape index: {}]   ;;  %s5830_s2 = inlined_call_operand.vmem [shape: f32[1,156], index: 2, kind: input, shape index: {}]   ;;  %s5831_s3 = inlined_call_operand.vmem [shape: f32[2,156,78], index: 3, kind: input, shape index: {}]   ;;  %s5832_s4 = inlined_call_operand.vmem [shape: f32[2,13,26], index: 4, kind: input, shape index: {}]   ;;  %s5833_s5 = inlined_call_operand.vmem [shape: f32[3,78,176], index: 5, kind: input, shape index: {}]   ;;  %s5834_s6 = inlined_call_operand.vmem [shape: f32[1,176], index: 6, kind: input, shape index: {}]   ;;  %s5835_s7 = inlined_call_operand.vmem [shape: f32[2,176,80], index: 7, kind: input, shape index: {}]   ;;  %s5836_s8 = inlined_call_operand.vmem [shape: f32[2,5,11], index: 8, kind: input, shape index: {}]   ;;  %s5837_s9 = inlined_call_operand.vmem [shape: f32[5,80,120], index: 9, kind: input, shape index: {}]   ;;  %s5838_s10 = inlined_call_operand.vmem [shape: f32[1,120], index: 10, kind: input, shape index: {}]   ;;  %s5839_s11 = inlined_call_operand.vmem [shape: f32[120,84], index: 11, kind: input, shape index: {}]   ;;  %s5840_s12 = inlined_call_operand.vmem [shape: f32[1,84], index: 12, kind: input, shape index: {}]   ;;  %s5841_s13 = inlined_call_operand.vmem [shape: f32[84,10], index: 13, kind: input, shape index: {}]   ;;  %s5842_s14 = inlined_call_operand.vmem [shape: f32[1,10], index: 14, kind: input, shape index: {}]   ;;  %s5843_s15 = inlined_call_operand.hbm [shape: f32[2,10], index: 15, kind: output, shape index: {}]  }
   0x1   :  { %v3518_v0 = vld [vmem:[%s5829_s1 + $0x78] sm:$0xf]  ;;  %v3517_v1 = vld [vmem:[%s5829_s1 + $0x70] sm:$0xf]  ;;  %v3516_v2 = vld [vmem:[%s5829_s1 + $0x68] sm:$0xff]  ;;  %168 = vmatprep.mubr.f32.mxu0 %v4172_v11  ;;  %180 = vmatprep.mubr.f32.mxu1 %v4172_v11 }
   0x2   :  { %3519 = vmatprep.subr.msk.mxu0 %vm97_vm0, %v3518_v0  ;;  %4135 = vmatprep.subr.msk.mxu1 %vm97_vm0, %v3518_v0  ;;  %v3515_v3 = vld [vmem:[%s5829_s1 + $0x60] sm:$0xff]  ;;  %v3514_v4 = vld [vmem:[%s5829_s1 + $0x58] sm:$0xff]  ;;  %v3513_v5 = vld [vmem:[%s5829_s1 + $0x50] sm:$0xff] }
   0x3   :  { %3520 = vmatpush1.msk.msra.mxu0 %vm97_vm0, %v3517_v1  ;;  %4139 = vmatpush1.msk.msra.mxu1 %vm97_vm0, %v3517_v1  ;;  %v3512_v6 = vld [vmem:[%s5829_s1 + $0x48] sm:$0xff]  ;;  %v3511_v7 = vld [vmem:[%s5829_s1 + $0x40] sm:$0xff]  ;;  %v69_v9 = vld [vmem:[%s5828_s0 + $0x11] sm:$0xff] }
   0x4   :  { %130 = vmatprep.subr.mxu0 %v3516_v2  ;;  %4136 = vmatprep.subr.mxu1 %v3516_v2  ;;  %v67_v8 = vld [vmem:[%s5828_s0 + $0x1] sm:$0xff]  ;;  %v66_v10 = vld [vmem:[%s5829_s1 + $0x38] sm:$0xf]  ;;  %v65_v12 = vld [vmem:[%s5829_s1 + $0x30] sm:$0xf] }
   0x5   :  { %131 = vmatpush1.msra.mxu0 %v3515_v3  ;;  %4140 = vmatpush1.msra.mxu1 %v3515_v3  ;;  %v64_v13 = vld [vmem:[%s5829_s1 + $0x28] sm:$0xff]  ;;  %v63_v14 = vld [vmem:[%s5829_s1 + $0x20] sm:$0xff]  ;;  %v70_v16 = vld [vmem:[%s5828_s0 + $0x19] sm:$0x3] }
   0x6   :  { %132 = vmatprep.subr.mxu0 %v3514_v4  ;;  %4137 = vmatprep.subr.mxu1 %v3514_v4  ;;  %v68_v15 = vld [vmem:[%s5828_s0 + $0x9] sm:$0xff]  ;;  %v62_v17 = vld [vmem:[%s5829_s1 + $0x18] sm:$0xff] }
   0x7   :  { %133 = vmatpush1.msra.mxu0 %v3513_v5  ;;  %4141 = vmatpush1.msra.mxu1 %v3513_v5  ;;  %v61_v18 = vld [vmem:[%s5829_s1 + $0x10] sm:$0xff]  ;;  %v60_v19 = vld [vmem:[%s5829_s1 + $0x8] sm:$0xff] }
   0x8   :  { %134 = vmatprep.subr.mxu0 %v3512_v6  ;;  %4138 = vmatprep.subr.mxu1 %v3512_v6 }
   0x9   :  { %135 = vmatpush1.msra.mxu0 %v3511_v7  ;;  %4142 = vmatpush1.msra.mxu1 %v3511_v7 }
   0xa   :  { %3521 = vmatmul.mubr.msk.f32.vlgmr.msra.gmra.mxu0 %vm84_vm1, %v67_v8  ;;  %3523 = vmatmul.mubr.msk.f32.vlgmr.msra.gmra.mxu1 %vm84_vm1, %v69_v9 }
   0xb   :  { %3525 = vmatprep.subr.msk.mxu1 %vm97_vm0, %v3518_v0  ;;  %3531 = vmatprep.subr.msk.mxu0 %vm97_vm0, %v66_v10 }
   0xc   :  { %3526 = vmatpush1.msk.msra.mxu1 %vm97_vm0, %v3517_v1  ;;  %3532 = vmatpush1.msk.msra.mxu0 %vm97_vm0, %v65_v12 }
   0xd   :  { %231 = vmatprep.subr.mxu1 %v3516_v2  ;;  %338 = vmatprep.subr.mxu0 %v64_v13 }
   0xe   :  { %174 = vmatprep.mubr.f32.mxu0 %v4172_v11  ;;  %186 = vmatprep.mubr.f32.mxu1 %v4172_v11 }
   0xf   :  { %232 = vmatpush1.msra.mxu1 %v3515_v3  ;;  %339 = vmatpush1.msra.mxu0 %v63_v14 }
  0x10   :  { %3522 = vmatmul.mubr.msk.f32.gmra.mxu0 %vm84_vm1, %v68_v15  ;;  %3524 = vmatmul.mubr.msk.f32.gmra.mxu1 %vm84_vm1, %v70_v16 }
  0x11   :  { %233 = vmatprep.subr.mxu1 %v3514_v4  ;;  %340 = vmatprep.subr.mxu0 %v62_v17 }
  0x12   :  { %20 = vsyncpa [#allocation5], 0  ;;  %234 = vmatpush1.msra.mxu1 %v3513_v5  ;;  %341 = vmatpush1.msra.mxu0 %v61_v18  ;;  %v59_v20 = vld [vmem:[%s5829_s1] sm:$0xff]  ;;  %v3550_v23 = vld [vmem:[%s5829_s1 + $0xb8] sm:$0xf]  ;;  %vm1208_vm2 = vcmask 211968  }
  0x13   :  { %235 = vmatprep.subr.mxu1 %v3512_v6  ;;  %342 = vmatprep.subr.mxu0 %v60_v19  ;;  %v71_v21 = vld [vmem:[%s5828_s0 + $0x21] sm:$0xff]  ;;  %v3549_v24 = vld [vmem:[%s5829_s1 + $0xb0] sm:$0xf]  ;;  %v3546_v31 = vld [vmem:[%s5829_s1 + $0x98] sm:$0xff]  ;;  %vm1215_vm3 = vcmask 1041408   ;;  %vm1596_vm4 = vcmask 1045504  }
  0x14   :  { %v51_v22 = vld [vmem:[%s5828_s0] sm:$0xff]  ;;  %236 = vmatpush1.msra.mxu1 %v3511_v7  ;;  %269 = vmatprep.mubr.f32.mxu1 %v4172_v11  ;;  %v72_v25 = vld [vmem:[%s5828_s0 + $0x29] sm:$0xff]  ;;  %v73_v29 = vld [vmem:[%s5828_s0 + $0x31] sm:$0xff]  ;;  %vm1537_vm5 = vcmask 634880   ;;  %vm1535_vm6 = vcmask 637952   ;;  %vm2190_vm7 = vcmask 392192  }
  0x15   :  { %343 = vmatpush1.msra.mxu0 %v59_v20  ;;  %376 = vmatprep.mubr.f32.mxu0 %v4172_v11  ;;  %v52_v26 = vld [vmem:[%s5828_s0 + $0x8] sm:$0xff]  ;;  %v3547_v28 = vld [vmem:[%s5829_s1 + $0xa0] sm:$0xff]  ;;  %v53_v30 = vld [vmem:[%s5828_s0 + $0x10] sm:$0xff]  ;;  %vm4173_vm8 = vmmov 0   ;;  %vm2535_vm9 = vcmask 1042432   ;;  %vm2531_vm10 = vcmask 89088  }
  0x16   :  { %3527 = vmatmul.mubr.msk.f32.vlgmr.msra.gmra.mxu1 %vm84_vm1, %v71_v21  ;;  %3533 = vmatmul.mubr.msk.f32.vlgmr.msra.gmra.mxu0 %vm84_vm1, %v51_v22  ;;  %v3548_v27 = vld [vmem:[%s5829_s1 + $0xa8] sm:$0xff]  ;;  %v3545_v32 = vld [vmem:[%s5829_s1 + $0x90] sm:$0xff]  ;;  %v74_v33 = vld [vmem:[%s5828_s0 + $0x39] sm:$0x3]  ;;  %vm2829_vm11 = vcmask 651264   ;;  %vm2860_vm12 = vcmask 1041409  }
  0x17   :  { %275 = vmatprep.mubr.f32.mxu1 %v4172_v11  ;;  %382 = vmatprep.mubr.f32.mxu0 %v4172_v11  ;;  %v54_v34 = vld [vmem:[%s5828_s0 + $0x18] sm:$0x3]  ;;  %v3544_v35 = vld [vmem:[%s5829_s1 + $0x88] sm:$0xff]  ;;  %v3543_v36 = vld [vmem:[%s5829_s1 + $0x80] sm:$0xff]  ;;  %vm2862_vm13 = vcmask 654336   ;;  %vm3312_vm14 = vcmask 982016  }
  0x18   :  { %3537 = vmatprep.subr.msk.mxu1 %vm97_vm0, %v66_v10  ;;  %3551 = vmatprep.subr.msk.mxu0 %vm97_vm0, %v3550_v23  ;;  %v55_v37 = vld [vmem:[%s5828_s0 + $0x20] sm:$0xff]  ;;  %v802_v39 = vld [vmem:[%s5831_s3 + $0x78] sm:$0xff]  ;;  %v56_v40 = vld [vmem:[%s5828_s0 + $0x28] sm:$0xff]  ;;  %vm3405_vm15 = vcmask 687104  }
  0x19   :  { %3538 = vmatpush1.msk.msra.mxu1 %vm97_vm0, %v65_v12  ;;  %3552 = vmatpush1.msk.msra.mxu0 %vm97_vm0, %v3549_v24  ;;  %v502_v38 = vld [vmem:[%s5828_s0 + $0x2] sm:$0xff]  ;;  %v503_v41 = vld [vmem:[%s5828_s0 + $0xa] sm:$0xff]  ;;  %v504_v44 = vld [vmem:[%s5828_s0 + $0x12] sm:$0xff] }
  0x1a   :  { %3528 = vmatmul.mubr.msk.f32.gmra.mxu1 %vm84_vm1, %v72_v25  ;;  %3534 = vmatmul.mubr.msk.f32.gmra.mxu0 %vm84_vm1, %v52_v26  ;;  %v801_v42 = vld [vmem:[%s5831_s3 + $0x70] sm:$0xff]  ;;  %v800_v45 = vld [vmem:[%s5831_s3 + $0x68] sm:$0xff]  ;;  %v58_v46 = vld [vmem:[%s5828_s0 + $0x38] sm:$0x3] }
  0x1b   :  { %281 = vmatprep.mubr.f32.mxu1 %v4172_v11  ;;  %388 = vmatprep.mubr.f32.mxu0 %v4172_v11  ;;  %v57_v43 = vld [vmem:[%s5828_s0 + $0x30] sm:$0xff]  ;;  %v505_v47 = vld [vmem:[%s5828_s0 + $0x1a] sm:$0x3]  ;;  %v506_v48 = vld [vmem:[%s5828_s0 + $0x22] sm:$0xff] }
  0x1c   :  { %439 = vmatprep.subr.mxu1 %v64_v13  ;;  %563 = vmatprep.subr.mxu0 %v3548_v27  ;;  %v507_v49 = vld [vmem:[%s5828_s0 + $0x2a] sm:$0xff]  ;;  %v508_v50 = vld [vmem:[%s5828_s0 + $0x32] sm:$0xff]  ;;  %v509_v51 = vld [vmem:[%s5828_s0 + $0x3a] sm:$0x3] }
  0x1d   :  { %440 = vmatpush1.msra.mxu1 %v63_v14  ;;  %564 = vmatpush1.msra.mxu0 %v3547_v28  ;;  %v799_v52 = vld [vmem:[%s5831_s3 + $0x60] sm:$0xff]  ;;  %v798_v53 = vld [vmem:[%s5831_s3 + $0x58] sm:$0xff]  ;;  %v797_v54 = vld [vmem:[%s5831_s3 + $0x50] sm:$0xff] }
  0x1e   :  { %3529 = vmatmul.mubr.msk.f32.gmra.mxu1 %vm84_vm1, %v73_v29  ;;  %3535 = vmatmul.mubr.msk.f32.gmra.mxu0 %vm84_vm1, %v53_v30  ;;  %v796_v55 = vld [vmem:[%s5831_s3 + $0x48] sm:$0xff]  ;;  %v795_v56 = vld [vmem:[%s5831_s3 + $0x40] sm:$0xff]  ;;  %v794_v57 = vld [vmem:[%s5831_s3 + $0x38] sm:$0xff] }
  0x1f   :  { %287 = vmatprep.mubr.f32.mxu1 %v4172_v11  ;;  %394 = vmatprep.mubr.f32.mxu0 %v4172_v11  ;;  %v793_v58 = vld [vmem:[%s5831_s3 + $0x30] sm:$0xff]  ;;  %v792_v59 = vld [vmem:[%s5831_s3 + $0x28] sm:$0xff]  ;;  %v791_v60 = vld [vmem:[%s5831_s3 + $0x20] sm:$0xff] }
  0x20   :  { %441 = vmatprep.subr.mxu1 %v62_v17  ;;  %565 = vmatprep.subr.mxu0 %v3546_v31  ;;  %v790_v61 = vld [vmem:[%s5831_s3 + $0x18] sm:$0xff]  ;;  %v789_v62 = vld [vmem:[%s5831_s3 + $0x10] sm:$0xff]  ;;  %v788_v63 = vld [vmem:[%s5831_s3 + $0x8] sm:$0xff] }
  0x21   :  { %442 = vmatpush1.msra.mxu1 %v61_v18  ;;  %566 = vmatpush1.msra.mxu0 %v3545_v32  ;;  %v787_v0 = vld [vmem:[%s5831_s3] sm:$0xff]  ;;  %v806_v1 = vld [vmem:[%s5831_s3 + $0x98] sm:$0xf]  ;;  %v805_v2 = vld [vmem:[%s5831_s3 + $0x90] sm:$0xff] }
  0x22   :  { %3530 = vmatmul.mubr.msk.f32.gmra.mxu1 %vm84_vm1, %v74_v33  ;;  %3536 = vmatmul.mubr.msk.f32.gmra.mxu0 %vm84_vm1, %v54_v34  ;;  %v804_v3 = vld [vmem:[%s5831_s3 + $0x88] sm:$0xff]  ;;  %v803_v4 = vld [vmem:[%s5831_s3 + $0x80] sm:$0xff] }
  0x23   :  { %443 = vmatprep.subr.mxu1 %v60_v19  ;;  %567 = vmatprep.subr.mxu0 %v3544_v35 }
  0x24   :  { %444 = vmatpush1.msra.mxu1 %v59_v20  ;;  %477 = vmatprep.mubr.f32.mxu1 %v4172_v11  ;;  %v745_v20 = vlaneseq }
  0x25   :  { %568 = vmatpush1.msra.mxu0 %v3543_v36  ;;  %601 = vmatprep.mubr.f32.mxu0 %v4172_v11 }
  0x26   :  { %3539 = vmatmul.mubr.msk.f32.vlgmr.msra.gmra.mxu1 %vm84_vm1, %v55_v37  ;;  %3553 = vmatmul.mubr.msk.f32.vlgmr.msra.gmra.mxu0 %vm84_vm1, %v502_v38  ;;  %v4577_v25 = vshrl.u32 %v745_v20, 7 }
  0x27   :  { %483 = vmatprep.mubr.f32.mxu1 %v4172_v11  ;;  %607 = vmatprep.mubr.f32.mxu0 %v4172_v11 }
  0x28   :  { %3557 = vmatprep.subr.msk.mxu1 %vm97_vm0, %v3550_v23  ;;  %822 = vmatprep.subr.mxu0 %v4172_v11  ;;  %v747_v30 = vsub.s32 0, %v4577_v25 }
  0x29   :  { %3558 = vmatpush1.msk.msra.mxu1 %vm97_vm0, %v3549_v24  ;;  %823 = vmatpush1.msra.mxu0 %v802_v39 }
  0x2a   :  { %3540 = vmatmul.mubr.msk.f32.gmra.mxu1 %vm84_vm1, %v56_v40  ;;  %3554 = vmatmul.mubr.msk.f32.gmra.mxu0 %vm84_vm1, %v503_v41 }
  0x2b   :  { %489 = vmatprep.mubr.f32.mxu1 %v4172_v11  ;;  %613 = vmatprep.mubr.f32.mxu0 %v4172_v11 }
  0x2c   :  { %664 = vmatprep.subr.mxu1 %v3548_v27  ;;  %824 = vmatprep.subr.mxu0 %v4172_v11 }
  0x2d   :  { %665 = vmatpush1.msra.mxu1 %v3547_v28  ;;  %825 = vmatpush1.msra.mxu0 %v801_v42 }
  0x2e   :  { %3541 = vmatmul.mubr.msk.f32.gmra.mxu1 %vm84_vm1, %v57_v43  ;;  %3555 = vmatmul.mubr.msk.f32.gmra.mxu0 %vm84_vm1, %v504_v44 }
  0x2f   :  { %495 = vmatprep.mubr.f32.mxu1 %v4172_v11  ;;  %619 = vmatprep.mubr.f32.mxu0 %v4172_v11 }
  0x30   :  { %666 = vmatprep.subr.mxu1 %v3546_v31  ;;  %826 = vmatprep.subr.mxu0 %v4172_v11  ;;  %v743_v31 = vld [vmem:[%s5830_s2] sm:$0x3] }
  0x31   :  { %667 = vmatpush1.msra.mxu1 %v3545_v32  ;;  %827 = vmatpush1.msra.mxu0 %v800_v45  ;;  %v751_v32 = vsub.s32 1, %v4577_v25  ;;  %v4592_v38 = vrot.slane %v743_v31, %v747_v30 }
  0x32   :  { %3542 = vmatmul.mubr.msk.f32.gmra.mxu1 %vm84_vm1, %v58_v46  ;;  %3556 = vmatmul.mubr.msk.f32.gmra.mxu0 %vm84_vm1, %v505_v47 }
  0x33   :  { %668 = vmatprep.subr.mxu1 %v3544_v35  ;;  %702 = vmatprep.mubr.f32.mxu1 %v4172_v11  ;;  %v4596_v41 = vrot.slane %v743_v31, %v751_v32 }
  0x34   :  { %669 = vmatpush1.msra.mxu1 %v3543_v36  ;;  %828 = vmatprep.subr.mxu0 %v4172_v11 }
  0x35   :  { %919 = vmatprep.subr.mxu1 %v4172_v11  ;;  %829 = vmatpush1.msra.mxu0 %v799_v52 }
  0x36   :  { %3559 = vmatmul.mubr.msk.f32.vlgmr.msra.gmra.mxu1 %vm84_vm1, %v506_v48  ;;  %830 = vmatprep.subr.mxu0 %v4172_v11 }
  0x37   :  { %708 = vmatprep.mubr.f32.mxu1 %v4172_v11  ;;  %920 = vmatpush1.msra.mxu1 %v802_v39 }
  0x38   :  { %921 = vmatprep.subr.mxu1 %v4172_v11  ;;  %831 = vmatpush1.msra.mxu0 %v798_v53 }
  0x39   :  { %922 = vmatpush1.msra.mxu1 %v801_v42  ;;  %832 = vmatprep.subr.mxu0 %v4172_v11 }
  0x3a   :  { %3560 = vmatmul.mubr.msk.f32.gmra.mxu1 %vm84_vm1, %v507_v49  ;;  %923 = vmatprep.subr.mxu1 %v4172_v11 }
  0x3b   :  { %714 = vmatprep.mubr.f32.mxu1 %v4172_v11  ;;  %924 = vmatpush1.msra.mxu1 %v800_v45 }
  0x3c   :  { %925 = vmatprep.subr.mxu1 %v4172_v11  ;;  %833 = vmatpush1.msra.mxu0 %v797_v54 }
  0x3d   :  { %926 = vmatpush1.msra.mxu1 %v799_v52  ;;  %834 = vmatprep.subr.mxu0 %v4172_v11 }
  0x3e   :  { %3561 = vmatmul.mubr.msk.f32.gmra.mxu1 %vm84_vm1, %v508_v50  ;;  %927 = vmatprep.subr.mxu1 %v4172_v11 }
  0x3f   :  { %720 = vmatprep.mubr.f32.mxu1 %v4172_v11  ;;  %928 = vmatpush1.msra.mxu1 %v798_v53 }
  0x40   :  { %929 = vmatprep.subr.mxu1 %v4172_v11  ;;  %835 = vmatpush1.msra.mxu0 %v796_v55 }
  0x41   :  { %930 = vmatpush1.msra.mxu1 %v797_v54  ;;  %836 = vmatprep.subr.mxu0 %v4172_v11 }
  0x42   :  { %3562 = vmatmul.mubr.msk.f32.gmra.mxu1 %vm84_vm1, %v509_v51  ;;  %931 = vmatprep.subr.mxu1 %v4172_v11 }
  0x43   :  { %932 = vmatpush1.msra.mxu1 %v796_v55  ;;  %837 = vmatpush1.msra.mxu0 %v795_v56 }
  0x44   :  { %933 = vmatprep.subr.mxu1 %v4172_v11  ;;  %838 = vmatprep.subr.mxu0 %v4172_v11 }
  0x45   :  { %934 = vmatpush1.msra.mxu1 %v795_v56  ;;  %839 = vmatpush1.msra.mxu0 %v794_v57 }
  0x46   :  { %935 = vmatprep.subr.mxu1 %v4172_v11  ;;  %840 = vmatprep.subr.mxu0 %v4172_v11 }
  0x47   :  { %936 = vmatpush1.msra.mxu1 %v794_v57  ;;  %841 = vmatpush1.msra.mxu0 %v793_v58 }
  0x48   :  { %937 = vmatprep.subr.mxu1 %v4172_v11  ;;  %842 = vmatprep.subr.mxu0 %v4172_v11 }
  0x49   :  { %938 = vmatpush1.msra.mxu1 %v793_v58  ;;  %843 = vmatpush1.msra.mxu0 %v792_v59 }
  0x4a   :  { %939 = vmatprep.subr.mxu1 %v4172_v11  ;;  %844 = vmatprep.subr.mxu0 %v4172_v11 }
  0x4b   :  { %940 = vmatpush1.msra.mxu1 %v792_v59  ;;  %845 = vmatpush1.msra.mxu0 %v791_v60 }
  0x4c   :  { %941 = vmatprep.subr.mxu1 %v4172_v11  ;;  %846 = vmatprep.subr.mxu0 %v4172_v11 }
  0x4d   :  { %942 = vmatpush1.msra.mxu1 %v791_v60  ;;  %847 = vmatpush1.msra.mxu0 %v790_v61 }
  0x4e   :  { %943 = vmatprep.subr.mxu1 %v4172_v11  ;;  %848 = vmatprep.subr.mxu0 %v4172_v11 }
  0x4f   :  { %944 = vmatpush1.msra.mxu1 %v790_v61  ;;  %849 = vmatpush1.msra.mxu0 %v789_v62  ;;  %v4616_v61 = vld [vmem:[%s5831_s3 + $0x118] sm:$0xff] }
  0x50   :  { %945 = vmatprep.subr.mxu1 %v4172_v11  ;;  %850 = vmatprep.subr.mxu0 %v4172_v11 }
  0x51   :  { %946 = vmatpush1.msra.mxu1 %v789_v62  ;;  %851 = vmatpush1.msra.mxu0 %v788_v63 }
  0x52   :  { %947 = vmatprep.subr.mxu1 %v4172_v11  ;;  %852 = vmatprep.subr.mxu0 %v4172_v11 }
  0x53   :  { %948 = vmatpush1.msra.mxu1 %v788_v63  ;;  %853 = vmatpush1.msra.mxu0 %v787_v0 }
  0x54   :  { %949 = vmatprep.subr.mxu1 %v4172_v11  ;;  %878 = vmatprep.subr.mxu0 %v4172_v11 }
  0x55   :  { %950 = vmatpush1.msra.mxu1 %v787_v0  ;;  %3563 = vmatpush2.msk.msra.mxu0 %vm97_vm0, %v806_v1 }
  0x56   :  { %975 = vmatprep.subr.mxu1 %v4172_v11  ;;  %880 = vmatprep.subr.mxu0 %v4172_v11 }
  0x57   :  { %3568 = vmatpush2.msk.msra.mxu1 %vm97_vm0, %v806_v1  ;;  %881 = vmatpush2.msra.mxu0 %v805_v2 }
  0x58   :  { %977 = vmatprep.subr.mxu1 %v4172_v11  ;;  %882 = vmatprep.subr.mxu0 %v4172_v11 }
  0x59   :  { %978 = vmatpush2.msra.mxu1 %v805_v2  ;;  %883 = vmatpush2.msra.mxu0 %v804_v3 }
  0x5a   :  { %979 = vmatprep.subr.mxu1 %v4172_v11  ;;  %884 = vmatprep.subr.mxu0 %v4172_v11 }
  0x5b   :  { %980 = vmatpush2.msra.mxu1 %v804_v3  ;;  %885 = vmatpush2.msra.mxu0 %v803_v4  ;;  %v4631_v3 = vld [vmem:[%s5831_s3 + $0x110] sm:$0xff] }
  0x5c   :  { %981 = vmatprep.subr.mxu1 %v4172_v11  ;;  %1028 = vmatprep.subr.mxu0 %v4172_v11 }
  0x5d   :  { %982 = vmatpush2.msra.mxu1 %v803_v4 }
  0x5e   :  { %1113 = vmatprep.subr.mxu1 %v4172_v11 }
  0xca   :  { %v170_v5 = vpop.f32.mrf.mxu0  ;;  %v182_v6 = vpop.f32.mrf.mxu1 }
  0xcc   :  { %v172_v7 = vpop.f32.mrf.mxu0  ;;  %v184_v8 = vpop.f32.mrf.mxu1 }
  0xd0   :  { %v176_v9 = vpop.f32.mrf.mxu0  ;;  %v188_v10 = vpop.f32.mrf.mxu1 }
  0xd2   :  { %v178_v12 = vpop.f32.mrf.mxu0  ;;  %v4565_v13 = vpop.f32.mrf.mxu1 }
  0xd6   :  { %v4567_v14 = vpop.f32.mrf.mxu1  ;;  %v378_v15 = vpop.f32.mrf.mxu0 }
  0xd7   :  { %v379_v35 = vadd.f32 %v378_v15, %v170_v5  ;;  %v4645_v15 = vld [vmem:[%s5831_s3 + $0x108] sm:$0xff] }
  0xd8   :  { %v4569_v16 = vpop.f32.mrf.mxu1  ;;  %v380_v17 = vpop.f32.mrf.mxu0 }
  0xd9   :  { %v381_v39 = vadd.f32 %v380_v17, %v172_v7 }
  0xda   :  { %v4571_v18 = vpop.f32.mrf.mxu1  ;;  %v384_v19 = vpop.f32.mrf.mxu0 }
  0xdb   :  { %v385_v44 = vadd.f32 %v384_v19, %v176_v9 }
  0xdc   :  { %v4573_v21 = vpop.f32.mrf.mxu1  ;;  %v386_v22 = vpop.f32.mrf.mxu0 }
  0xdd   :  { %v387_v49 = vadd.f32 %v386_v22, %v178_v12 }
  0xde   :  { %v4575_v23 = vpop.f32.mrf.mxu1  ;;  %v390_v24 = vpop.f32.mrf.mxu0 }
  0xdf   :  { %v391_v54 = vadd.f32 %v390_v24, %v182_v6 }
  0xe0   :  { %v4579_v26 = vpop.f32.mrf.mxu1  ;;  %v392_v27 = vpop.f32.mrf.mxu0 }
  0xe1   :  { %v393_v62 = vadd.f32 %v392_v27, %v184_v8 }
  0xe2   :  { %v4581_v28 = vpop.f32.mrf.mxu1  ;;  %v396_v29 = vpop.f32.mrf.mxu0 }
  0xe3   :  { %v397_v4 = vadd.f32 %v396_v29, %v188_v10 }
  0xe4   :  { %v4588_v33 = vpop.f32.mrf.mxu1  ;;  %v398_v34 = vpop.f32.mrf.mxu0 }
  0xe5   :  { %v399_v10 = vadd.f32 %v398_v34, %v4565_v13  ;;  %v4663_v13 = vld [vmem:[%s5831_s3 + $0x100] sm:$0xff] }
  0xe6   :  { %v479_v36 = vpop.f32.mrf.mxu1  ;;  %v603_v37 = vpop.f32.mrf.mxu0 }
  0xe7   :  { %v727_v40 = vadd.f32 %v603_v37, %v379_v35  ;;  %v480_v24 = vadd.f32 %v479_v36, %v4567_v14  ;;  %v4676_v37 = vld [vmem:[%s5831_s3 + $0xf8] sm:$0xff] }
  0xe8   :  { %v481_v42 = vpop.f32.mrf.mxu1  ;;  %v605_v43 = vpop.f32.mrf.mxu0 }
  0xe9   :  { %v728_v45 = vadd.f32 %v605_v43, %v381_v39  ;;  %v4599_v46 = vadd.f32 %v4592_v38, %v727_v40  ;;  %v482_v14 = vadd.f32 %v481_v42, %v4569_v16  ;;  %v4692_v16 = vld [vmem:[%s5831_s3 + $0xf0] sm:$0xff] }
  0xea   :  { %v485_v47 = vpop.f32.mrf.mxu1  ;;  %v609_v48 = vpop.f32.mrf.mxu0 }
  0xeb   :  { %v4602_v50 = vadd.f32 %v4596_v41, %v728_v45  ;;  %v729_v51 = vadd.f32 %v609_v48, %v385_v44  ;;  %v771_v57 = vmax.f32 %v4599_v46, 0.0  ;;  %v486_v42 = vadd.f32 %v485_v47, %v4571_v18  ;;  %v1206_v46 = vld [vmem:[%s5832_s4] sm:$0xff] }
  0xec   :  { %v4604_v52 = vpop.f32.mrf.mxu1  ;;  %v611_v53 = vpop.f32.mrf.mxu0 }
  0xed   :  { %v772_v55 = vmax.f32 %v4602_v50, 0.0  ;;  %v730_v56 = vadd.f32 %v611_v53, %v387_v49  ;;  %v4609_v58 = vadd.f32 %v4592_v38, %v729_v51  ;;  %v4705_v51 = vld [vmem:[%s5831_s3 + $0xe8] sm:$0xff]  ;;  %v488_v18 = vadd.f32 %v4604_v52, %v4573_v21  ;;  %v4722_v21 = vld [vmem:[%s5831_s3 + $0xe0] sm:$0xff] }
  0xee   :  { %v4611_v59 = vpop.f32.mrf.mxu1  ;;  %v615_v60 = vpop.f32.mrf.mxu0 }
  0xef   :  { %v4619_v63 = vadd.f32 %v4596_v41, %v730_v56  ;;  %v731_v0 = vadd.f32 %v615_v60, %v391_v54  ;;  %3564 = vmatprep.mubr.msk.f32.mxu0 %vm84_vm1, %v772_v55  ;;  %v773_v7 = vmax.f32 %v4609_v58, 0.0  ;;  %v492_v60 = vadd.f32 %v4611_v59, %v4575_v23 }
  0xf0   :  { %v4624_v1 = vpop.f32.mrf.mxu1  ;;  %v617_v2 = vpop.f32.mrf.mxu0  ;;  %887 = vmatmul.mubr.f32.vlgmr.msra.gmra.mxu0 %v771_v57 }
  0xf1   :  { %v774_v5 = vmax.f32 %v4619_v63, 0.0  ;;  %v732_v6 = vadd.f32 %v617_v2, %v393_v62  ;;  %1029 = vmatpush1.msra.mxu0 %v4616_v61  ;;  %v4637_v8 = vadd.f32 %v4592_v38, %v731_v0  ;;  %v4736_v2 = vld [vmem:[%s5831_s3 + $0xd8] sm:$0xff] }
  0xf2   :  { %1030 = vmatprep.subr.mxu0 %v4172_v11  ;;  %v4640_v9 = vpop.f32.mrf.mxu1  ;;  %v621_v12 = vpop.f32.mrf.mxu0 }
  0xf3   :  { %v4649_v17 = vadd.f32 %v4596_v41, %v732_v6  ;;  %v733_v19 = vadd.f32 %v621_v12, %v397_v4  ;;  %1031 = vmatpush1.msra.mxu0 %v4631_v3  ;;  %3565 = vmatprep.mubr.msk.f32.mxu0 %vm84_vm1, %v774_v5  ;;  %v775_v31 = vmax.f32 %v4637_v8, 0.0  ;;  %v494_v4 = vadd.f32 %v4624_v1, %v4579_v26  ;;  %v4756_v26 = vld [vmem:[%s5831_s3 + $0xd0] sm:$0xff] }
  0xf4   :  { %1032 = vmatprep.subr.mxu0 %v4172_v11  ;;  %v4656_v20 = vpop.f32.mrf.mxu1  ;;  %v623_v22 = vpop.f32.mrf.mxu0  ;;  %892 = vmatmul.mubr.f32.gmra.mxu0 %v773_v7 }
  0xf5   :  { %v776_v27 = vmax.f32 %v4649_v17, 0.0  ;;  %v734_v29 = vadd.f32 %v623_v22, %v399_v10  ;;  %1033 = vmatpush1.msra.mxu0 %v4645_v15  ;;  %v4670_v34 = vadd.f32 %v4592_v38, %v733_v19  ;;  %v498_v10 = vadd.f32 %v4640_v9, %v4581_v28 }
  0xf6   :  { %1034 = vmatprep.subr.mxu0 %v4172_v11  ;;  %v704_v35 = vpop.f32.mrf.mxu1  ;;  %v500_v19 = vadd.f32 %v4656_v20, %v4588_v33  ;;  %v3577_v20 = vld [vmem:[%s5831_s3 + $0xc0] sm:$0xff] }
  0xf7   :  { %v4680_v36 = vadd.f32 %v4596_v41, %v734_v29  ;;  %v735_v39 = vadd.f32 %v704_v35, %v480_v24  ;;  %1035 = vmatpush1.msra.mxu0 %v4663_v13  ;;  %3566 = vmatprep.mubr.msk.f32.mxu0 %vm84_vm1, %v776_v27  ;;  %v777_v45 = vmax.f32 %v4670_v34, 0.0 }
  0xf8   :  { %1036 = vmatprep.subr.mxu0 %v4172_v11  ;;  %v706_v40 = vpop.f32.mrf.mxu1  ;;  %897 = vmatmul.mubr.f32.gmra.mxu0 %v775_v31 }
  0xf9   :  { %v778_v43 = vmax.f32 %v4680_v36, 0.0  ;;  %v736_v44 = vadd.f32 %v706_v40, %v482_v14  ;;  %1037 = vmatpush1.msra.mxu0 %v4676_v37  ;;  %v4699_v48 = vadd.f32 %v4592_v38, %v735_v39  ;;  %v3576_v39 = vld [vmem:[%s5831_s3 + $0xb8] sm:$0xff] }
  0xfa   :  { %1038 = vmatprep.subr.mxu0 %v4172_v11  ;;  %v710_v49 = vpop.f32.mrf.mxu1 }
  0xfb   :  { %v4710_v47 = vadd.f32 %v4596_v41, %v736_v44  ;;  %v737_v53 = vadd.f32 %v710_v49, %v486_v42  ;;  %1039 = vmatpush1.msra.mxu0 %v4692_v16  ;;  %3567 = vmatprep.mubr.msk.f32.mxu0 %vm84_vm1, %v778_v43  ;;  %v779_v62 = vmax.f32 %v4699_v48, 0.0  ;;  %v3591_v42 = vld [vmem:[%s5831_s3 + $0x130] sm:$0xff]  ;;  %v3590_v44 = vld [vmem:[%s5831_s3 + $0x128] sm:$0xff]  ;;  %v3589_v49 = vld [vmem:[%s5831_s3 + $0x120] sm:$0xff] }
  0xfc   :  { %1040 = vmatprep.subr.mxu0 %v4172_v11  ;;  %v712_v54 = vpop.f32.mrf.mxu1  ;;  %902 = vmatmul.mubr.f32.gmra.mxu0 %v777_v45 }
  0xfd   :  { %v780_v52 = vmax.f32 %v4710_v47, 0.0  ;;  %v738_v56 = vadd.f32 %v712_v54, %v488_v18  ;;  %1041 = vmatpush1.msra.mxu0 %v4705_v51  ;;  %3594 = vmatprep.mubr.msk.f32.mxu0 %vm84_vm1, %v772_v55  ;;  %v4741_v50 = vadd.f32 %v4592_v38, %v737_v53 }
  0xfe   :  { %1042 = vmatprep.subr.mxu0 %v4172_v11  ;;  %v716_v0 = vpop.f32.mrf.mxu1 }
  0xff   :  { %v4744_v55 = vadd.f32 %v4596_v41, %v738_v56  ;;  %1043 = vmatpush1.msra.mxu0 %v4722_v21  ;;  %3569 = vmatprep.mubr.msk.f32.mxu1 %vm84_vm1, %v780_v52  ;;  %v739_v23 = vadd.f32 %v716_v0, %v492_v60  ;;  %v781_v22 = vmax.f32 %v4741_v50, 0.0 }
 0x100   :  { %1044 = vmatprep.subr.mxu0 %v4172_v11  ;;  %v718_v59 = vpop.f32.mrf.mxu1  ;;  %984 = vmatmul.mubr.f32.vlgmr.msra.gmra.mxu1 %v779_v62 }
 0x101   :  { %v782_v1 = vmax.f32 %v4744_v55, 0.0  ;;  %v740_v6 = vadd.f32 %v718_v59, %v494_v4  ;;  %1045 = vmatpush1.msra.mxu0 %v4736_v2  ;;  %1114 = vmatpush1.msra.mxu1 %v4616_v61  ;;  %v3578_v61 = vld [vmem:[%s5831_s3 + $0xc8] sm:$0xff]  ;;  %v4777_v29 = vadd.f32 %v4592_v38, %v739_v23 }
 0x102   :  { %1046 = vmatprep.subr.mxu0 %v4172_v11  ;;  %1115 = vmatprep.subr.mxu1 %v4172_v11  ;;  %v722_v12 = vpop.f32.mrf.mxu1  ;;  %v1207_v59 = vld [vmem:[%s5832_s4 + $0x8] sm:$0x1f] }
 0x103   :  { %v4769_v24 = vadd.f32 %v4596_v41, %v740_v6  ;;  %1047 = vmatpush1.msra.mxu0 %v4756_v26  ;;  %1116 = vmatpush1.msra.mxu1 %v4631_v3  ;;  %v741_v9 = vadd.f32 %v722_v12, %v498_v10  ;;  %v783_v14 = vmax.f32 %v4777_v29, 0.0 }
 0x104   :  { %3570 = vmatprep.mubr.msk.f32.mxu1 %vm84_vm1, %v782_v1  ;;  %1048 = vmatprep.subr.mxu0 %v4172_v11  ;;  %v724_v28 = vpop.f32.mrf.mxu1 }
 0x105   :  { %v784_v33 = vmax.f32 %v4769_v24, 0.0  ;;  %1117 = vmatprep.subr.mxu1 %v4172_v11  ;;  %v742_v3 = vadd.f32 %v724_v28, %v500_v19  ;;  %989 = vmatmul.mubr.f32.gmra.mxu1 %v781_v22  ;;  %v4802_v40 = vadd.f32 %v4592_v38, %v741_v9  ;;  %v3610_v19 = vld [vmem:[%s5832_s4 + $0x18] sm:$0x1f]  ;;  %v3634_v28 = vld [vmem:[%s5833_s5 + $0x128] sm:$0xff]  ;;  %v3633_v9 = vld [vmem:[%s5833_s5 + $0x120] sm:$0xff] }
 0x106   :  { %1049 = vmatpush1.msra.mxu0 %v3578_v61  ;;  %1118 = vmatpush1.msra.mxu1 %v4645_v15  ;;  %v3575_v15 = vld [vmem:[%s5831_s3 + $0xb0] sm:$0xff] }
 0x107   :  { %v4792_v35 = vadd.f32 %v4596_v41, %v742_v3  ;;  %1050 = vmatprep.subr.mxu0 %v4172_v11  ;;  %1119 = vmatprep.subr.mxu1 %v4172_v11  ;;  %v785_v38 = vmax.f32 %v4802_v40, 0.0  ;;  %v3630_v40 = vld [vmem:[%s5833_s5 + $0x108] sm:$0xff] }
 0x108   :  { %1051 = vmatpush1.msra.mxu0 %v3577_v20  ;;  %1120 = vmatpush1.msra.mxu1 %v4663_v13  ;;  %v3574_v13 = vld [vmem:[%s5831_s3 + $0xa8] sm:$0xff] }
 0x109   :  { %3571 = vmatprep.mubr.msk.f32.mxu1 %vm84_vm1, %v784_v33  ;;  %1052 = vmatprep.subr.mxu0 %v4172_v11  ;;  %v786_v41 = vmax.f32 %v4792_v35, 0.0 }
 0x10a   :  { %1121 = vmatprep.subr.mxu1 %v4172_v11  ;;  %994 = vmatmul.mubr.f32.gmra.mxu1 %v783_v14 }
 0x10b   :  { %1053 = vmatpush1.msra.mxu0 %v3576_v39  ;;  %1122 = vmatpush1.msra.mxu1 %v4676_v37  ;;  %v3573_v37 = vld [vmem:[%s5831_s3 + $0xa0] sm:$0xff] }
 0x10c   :  { %1054 = vmatprep.subr.mxu0 %v4172_v11  ;;  %1123 = vmatprep.subr.mxu1 %v4172_v11 }
 0x10d   :  { %1055 = vmatpush1.msra.mxu0 %v3575_v15  ;;  %1124 = vmatpush1.msra.mxu1 %v4692_v16  ;;  %v3592_v16 = vld [vmem:[%s5831_s3 + $0x138] sm:$0xf] }
 0x10e   :  { %3572 = vmatprep.mubr.msk.f32.mxu1 %vm84_vm1, %v786_v41  ;;  %1056 = vmatprep.subr.mxu0 %v4172_v11 }
 0x10f   :  { %1125 = vmatprep.subr.mxu1 %v4172_v11  ;;  %999 = vmatmul.mubr.f32.gmra.mxu1 %v785_v38 }
 0x110   :  { %1057 = vmatpush1.msra.mxu0 %v3574_v13  ;;  %1126 = vmatpush1.msra.mxu1 %v4705_v51 }
 0x111   :  { %1058 = vmatprep.subr.mxu0 %v4172_v11  ;;  %1127 = vmatprep.subr.mxu1 %v4172_v11 }
 0x112   :  { %3599 = vmatprep.mubr.msk.f32.mxu1 %vm84_vm1, %v780_v52  ;;  %1059 = vmatpush1.msra.mxu0 %v3573_v37 }
 0x113   :  { %1128 = vmatpush1.msra.mxu1 %v4722_v21  ;;  %1084 = vmatprep.subr.mxu0 %v4172_v11 }
 0x114   :  { %1129 = vmatprep.subr.mxu1 %v4172_v11  ;;  %3593 = vmatpush2.msk.msra.mxu0 %vm97_vm0, %v3592_v16 }
 0x115   :  { %1130 = vmatpush1.msra.mxu1 %v4736_v2  ;;  %1086 = vmatprep.subr.mxu0 %v4172_v11 }
 0x116   :  { %1131 = vmatprep.subr.mxu1 %v4172_v11  ;;  %1087 = vmatpush2.msra.mxu0 %v3591_v42 }
 0x117   :  { %1132 = vmatpush1.msra.mxu1 %v4756_v26  ;;  %1088 = vmatprep.subr.mxu0 %v4172_v11 }
 0x118   :  { %1133 = vmatprep.subr.mxu1 %v4172_v11  ;;  %1089 = vmatpush2.msra.mxu0 %v3590_v44 }
 0x119   :  { %1134 = vmatpush1.msra.mxu1 %v3578_v61  ;;  %1090 = vmatprep.subr.mxu0 %v4172_v11  ;;  %v3635_v61 = vld [vmem:[%s5833_s5 + $0x130] sm:$0x3f] }
 0x11a   :  { %1135 = vmatprep.subr.mxu1 %v4172_v11  ;;  %1091 = vmatpush2.msra.mxu0 %v3589_v49 }
 0x11b   :  { %1136 = vmatpush1.msra.mxu1 %v3577_v20  ;;  %1093 = vmatmul.mubr.f32.vlgmr.msra.gmra.mxu0 %v771_v57 }
 0x11c   :  { %1137 = vmatprep.subr.mxu1 %v4172_v11  ;;  %3595 = vmatprep.mubr.msk.f32.mxu0 %vm84_vm1, %v774_v5 }
 0x11d   :  { %1138 = vmatpush1.msra.mxu1 %v3576_v39  ;;  %v3631_v39 = vld [vmem:[%s5833_s5 + $0x110] sm:$0xff] }
 0x11e   :  { %1139 = vmatprep.subr.mxu1 %v4172_v11 }
 0x11f   :  { %1140 = vmatpush1.msra.mxu1 %v3575_v15  ;;  %1098 = vmatmul.mubr.f32.gmra.mxu0 %v773_v7  ;;  %v3628_v15 = vld [vmem:[%s5833_s5 + $0xf8] sm:$0xff] }
 0x120   :  { %1141 = vmatprep.subr.mxu1 %v4172_v11  ;;  %3596 = vmatprep.mubr.msk.f32.mxu0 %vm84_vm1, %v776_v27 }
 0x121   :  { %1142 = vmatpush1.msra.mxu1 %v3574_v13  ;;  %v3626_v13 = vld [vmem:[%s5833_s5 + $0xe8] sm:$0xff] }
 0x122   :  { %1143 = vmatprep.subr.mxu1 %v4172_v11 }
 0x123   :  { %1144 = vmatpush1.msra.mxu1 %v3573_v37  ;;  %1103 = vmatmul.mubr.f32.gmra.mxu0 %v775_v31  ;;  %v3625_v37 = vld [vmem:[%s5833_s5 + $0xe0] sm:$0xff] }
 0x124   :  { %1169 = vmatprep.subr.mxu1 %v4172_v11  ;;  %3597 = vmatprep.mubr.msk.f32.mxu0 %vm84_vm1, %v778_v43 }
 0x125   :  { %3598 = vmatpush2.msk.msra.mxu1 %vm97_vm0, %v3592_v16  ;;  %v3624_v16 = vld [vmem:[%s5833_s5 + $0xd8] sm:$0xff] }
 0x126   :  { %1171 = vmatprep.subr.mxu1 %v4172_v11 }
 0x127   :  { %1172 = vmatpush2.msra.mxu1 %v3591_v42  ;;  %1108 = vmatmul.mubr.f32.gmra.mxu0 %v777_v45  ;;  %v3623_v42 = vld [vmem:[%s5833_s5 + $0xd0] sm:$0xff] }
 0x128   :  { %1173 = vmatprep.subr.mxu1 %v4172_v11  ;;  %3898 = vmatprep.mubr.msk.f32.mxu0 %vm1208_vm2, %v1206_v46 }
 0x129   :  { %1174 = vmatpush2.msra.mxu1 %v3590_v44  ;;  %v3622_v44 = vld [vmem:[%s5833_s5 + $0xc8] sm:$0xff] }
 0x12a   :  { %1175 = vmatprep.subr.mxu1 %v4172_v11 }
 0x12b   :  { %1176 = vmatpush2.msra.mxu1 %v3589_v49  ;;  %v3621_v49 = vld [vmem:[%s5833_s5 + $0xc0] sm:$0xff] }
 0x12c   :  { %1178 = vmatmul.mubr.f32.vlgmr.msra.gmra.mxu1 %v779_v62 }
 0x12d   :  { %3600 = vmatprep.mubr.msk.f32.mxu1 %vm84_vm1, %v782_v1  ;;  %v3609_v1 = vld [vmem:[%s5832_s4 + $0x10] sm:$0xff] }
 0x130   :  { %1183 = vmatmul.mubr.f32.gmra.mxu1 %v781_v22  ;;  %v3636_v22 = vld [vmem:[%s5833_s5 + $0x138] sm:$0x3f] }
 0x131   :  { %3601 = vmatprep.mubr.msk.f32.mxu1 %vm84_vm1, %v784_v33 }
 0x134   :  { %1188 = vmatmul.mubr.f32.gmra.mxu1 %v783_v14  ;;  %v3632_v14 = vld [vmem:[%s5833_s5 + $0x118] sm:$0xff] }
 0x135   :  { %3602 = vmatprep.mubr.msk.f32.mxu1 %vm84_vm1, %v786_v41  ;;  %v3629_v41 = vld [vmem:[%s5833_s5 + $0x100] sm:$0xff] }
 0x138   :  { %1193 = vmatmul.mubr.f32.gmra.mxu1 %v785_v38  ;;  %v3627_v38 = vld [vmem:[%s5833_s5 + $0xf0] sm:$0xff] }
 0x139   :  { %3909 = vmatprep.mubr.msk.f32.mxu1 %vm1208_vm2, %v1206_v46  ;;  %v3620_v46 = vld [vmem:[%s5833_s5 + $0xb8] sm:$0xff] }
 0x1b0   :  { %v888_v57 = vpop.f32.mrf.mxu0 }
 0x1b2   :  { %v890_v58 = vpop.f32.mrf.mxu0 }
 0x1b3   :  { %v3618_v58 = vld [vmem:[%s5833_s5 + $0xa8] sm:$0xff] }
 0x1b4   :  { %v893_v63 = vpop.f32.mrf.mxu0 }
 0x1b6   :  { %v895_v5 = vpop.f32.mrf.mxu0 }
 0x1b7   :  { %v1564_v5 = vld [vmem:[%s5833_s5 + $0x98] sm:$0x3f] }
 0x1b8   :  { %v898_v7 = vpop.f32.mrf.mxu0 }
 0x1ba   :  { %v900_v8 = vpop.f32.mrf.mxu0 }
 0x1bc   :  { %v903_v17 = vpop.f32.mrf.mxu0 }
 0x1be   :  { %v905_v27 = vpop.f32.mrf.mxu0 }
 0x1c0   :  { %v4911_v31 = vpop.f32.mrf.mxu1 }
 0x1c2   :  { %v987_v34 = vpop.f32.mrf.mxu1 }
 0x1c5   :  { %v990_v36 = vpop.f32.mrf.mxu1 }
 0x1c7   :  { %v992_v43 = vpop.f32.mrf.mxu1 }
 0x1c8   :  { %v1563_v43 = vld [vmem:[%s5833_s5 + $0x90] sm:$0x3f] }
 0x1ca   :  { %v995_v45 = vpop.f32.mrf.mxu1 }
 0x1cc   :  { %v997_v48 = vpop.f32.mrf.mxu1 }
 0x1cd   :  { %v1562_v48 = vld [vmem:[%s5833_s5 + $0x88] sm:$0xff] }
 0x1cf   :  { %v1000_v51 = vpop.f32.mrf.mxu1 }
 0x1d1   :  { %v1002_v18 = vpop.f32.mrf.mxu1 }
 0x1d2   :  { %v1560_v18 = vld [vmem:[%s5833_s5 + $0x78] sm:$0xff] }
 0x1db   :  { %v1094_v47 = vpop.f32.mrf.mxu0 }
 0x1dc   :  { %v1198_v55 = vmax.f32 %v888_v57, %v1094_v47  ;;  %v3619_v57 = vld [vmem:[%s5833_s5 + $0xb0] sm:$0xff] }
 0x1dd   :  { %v1096_v53 = vpop.f32.mrf.mxu0 }
 0x1df   :  { %v1099_v54 = vpop.f32.mrf.mxu0 }
 0x1e0   :  { %v1199_v4 = vmax.f32 %v893_v63, %v1099_v54  ;;  %v3617_v63 = vld [vmem:[%s5833_s5 + $0xa0] sm:$0xff]  ;;  %v1559_v54 = vld [vmem:[%s5833_s5 + $0x70] sm:$0xff] }
 0x1e1   :  { %v1101_v21 = vpop.f32.mrf.mxu0 }
 0x1e2   :  { %v1558_v21 = vld [vmem:[%s5833_s5 + $0x68] sm:$0xff] }
 0x1e3   :  { %v1104_v52 = vpop.f32.mrf.mxu0 }
 0x1e4   :  { %v1200_v2 = vmax.f32 %v898_v7, %v1104_v52 }
 0x1e5   :  { %v1106_v56 = vpop.f32.mrf.mxu0 }
 0x1e6   :  { %v1557_v56 = vld [vmem:[%s5833_s5 + $0x60] sm:$0xff] }
 0x1e7   :  { %v1109_v60 = vpop.f32.mrf.mxu0 }
 0x1e8   :  { %v1201_v62 = vmax.f32 %v903_v17, %v1109_v60 }
 0x1e9   :  { %v1111_v0 = vpop.f32.mrf.mxu0 }
 0x1ea   :  { %3890 = vmatprep.subr.msk.mxu0 %vm1215_vm3, %v1201_v62 }
 0x1eb   :  { %3891 = vmatpush3.msk.msra.mxu0 %vm1215_vm3, %v1201_v62 }
 0x1ec   :  { %v1179_v50 = vpop.f32.mrf.mxu1  ;;  %3892 = vmatprep.subr.mxu0 %v1200_v2 }
 0x1ed   :  { %3893 = vmatpush3.msra.mxu0 %v1200_v2  ;;  %v1202_v35 = vmax.f32 %v4911_v31, %v1179_v50  ;;  %v1554_v50 = vld [vmem:[%s5833_s5 + $0x48] sm:$0xff] }
 0x1ee   :  { %v1181_v23 = vpop.f32.mrf.mxu1  ;;  %3894 = vmatprep.subr.mxu0 %v1199_v4 }
 0x1ef   :  { %3895 = vmatpush3.msra.mxu0 %v1199_v4  ;;  %v1552_v23 = vld [vmem:[%s5833_s5 + $0x38] sm:$0xff] }
 0x1f0   :  { %v1184_v26 = vpop.f32.mrf.mxu1  ;;  %3896 = vmatprep.subr.mxu0 %v1198_v55 }
 0x1f1   :  { %3897 = vmatpush3.msra.mxu0 %v1198_v55  ;;  %v1203_v20 = vmax.f32 %v990_v36, %v1184_v26  ;;  %v1550_v26 = vld [vmem:[%s5833_s5 + $0x28] sm:$0xff] }
 0x1f2   :  { %v1186_v6 = vpop.f32.mrf.mxu1  ;;  %3912 = vmatprep.subr.msk.mxu0 %vm1215_vm3, %v1201_v62  ;;  %3899 = vmatmul.mubr.msk.f32.vlgmr.msra.gmra.mxu0 %vm1208_vm2, %v1207_v59 }
 0x1f3   :  { %3913 = vmatpush3.msk.msra.mxu0 %vm1215_vm3, %v1201_v62  ;;  %3920 = vmatprep.mubr.msk.f32.mxu0 %vm1208_vm2, %v3609_v1  ;;  %v1556_v62 = vld [vmem:[%s5833_s5 + $0x58] sm:$0xff] }
 0x1f4   :  { %v1189_v12 = vpop.f32.mrf.mxu1  ;;  %3914 = vmatprep.subr.mxu0 %v1200_v2  ;;  %v1548_v6 = vld [vmem:[%s5833_s5 + $0x18] sm:$0xff] }
 0x1f5   :  { %3915 = vmatpush3.msra.mxu0 %v1200_v2  ;;  %v1204_v3 = vmax.f32 %v995_v45, %v1189_v12  ;;  %v1555_v2 = vld [vmem:[%s5833_s5 + $0x50] sm:$0xff] }
 0x1f6   :  { %v1191_v10 = vpop.f32.mrf.mxu1  ;;  %3916 = vmatprep.subr.mxu0 %v1199_v4  ;;  %v1547_v12 = vld [vmem:[%s5833_s5 + $0x10] sm:$0xff] }
 0x1f7   :  { %3917 = vmatpush3.msra.mxu0 %v1199_v4  ;;  %v1546_v10 = vld [vmem:[%s5833_s5 + $0x8] sm:$0xff] }
 0x1f8   :  { %v1194_v24 = vpop.f32.mrf.mxu1  ;;  %3918 = vmatprep.subr.mxu0 %v1198_v55 }
 0x1f9   :  { %v1205_v29 = vmax.f32 %v1000_v51, %v1194_v24  ;;  %3919 = vmatpush3.msra.mxu0 %v1198_v55  ;;  %v1561_v51 = vld [vmem:[%s5833_s5 + $0x80] sm:$0xff]  ;;  %v5079_v24 = vld [vmem:[%s5833_s5 + $0x1d8] sm:$0x3f] }
 0x1fa   :  { %v1196_v33 = vpop.f32.mrf.mxu1  ;;  %3921 = vmatmul.mubr.msk.f32.vlgmr.msra.gmra.mxu0 %vm1208_vm2, %v3610_v19  ;;  %3637 = vmatprep.subr.msk.mxu0 %vm1596_vm4, %v3636_v22  ;;  %v1553_v55 = vld [vmem:[%s5833_s5 + $0x40] sm:$0xff] }
 0x1fb   :  { %3901 = vmatprep.subr.msk.mxu1 %vm1215_vm3, %v1205_v29  ;;  %3638 = vmatpush1.msk.msra.mxu0 %vm1596_vm4, %v3635_v61  ;;  %v3670_v33 = vld [vmem:[%s5833_s5 + $0x1c8] sm:$0xff] }
 0x1fc   :  { %3902 = vmatpush3.msk.msra.mxu1 %vm1215_vm3, %v1205_v29  ;;  %1617 = vmatprep.subr.mxu0 %v3634_v28 }
 0x1fd   :  { %3903 = vmatprep.subr.mxu1 %v1204_v3  ;;  %1618 = vmatpush1.msra.mxu0 %v3633_v9 }
 0x1fe   :  { %3904 = vmatpush3.msra.mxu1 %v1204_v3  ;;  %1667 = vmatprep.mubr.f32.mxu0 %v4172_v11 }
 0x1ff   :  { %3905 = vmatprep.subr.mxu1 %v1203_v20  ;;  %1619 = vmatprep.subr.mxu0 %v3632_v14 }
 0x200   :  { %3906 = vmatpush3.msra.mxu1 %v1203_v20  ;;  %1620 = vmatpush1.msra.mxu0 %v3631_v39 }
 0x201   :  { %3907 = vmatprep.subr.mxu1 %v1202_v35  ;;  %1621 = vmatprep.subr.mxu0 %v3630_v40 }
 0x202   :  { %3908 = vmatpush3.msra.mxu1 %v1202_v35  ;;  %1622 = vmatpush1.msra.mxu0 %v3629_v41 }
 0x203   :  { %3923 = vmatprep.subr.msk.mxu1 %vm1215_vm3, %v1205_v29  ;;  %3910 = vmatmul.mubr.msk.f32.vlgmr.msra.gmra.mxu1 %vm1208_vm2, %v1207_v59  ;;  %v1551_v59 = vld [vmem:[%s5833_s5 + $0x30] sm:$0xff] }
 0x204   :  { %3924 = vmatpush3.msk.msra.mxu1 %vm1215_vm3, %v1205_v29  ;;  %3931 = vmatprep.mubr.msk.f32.mxu1 %vm1208_vm2, %v3609_v1  ;;  %v1549_v1 = vld [vmem:[%s5833_s5 + $0x20] sm:$0xff]  ;;  %v5085_v29 = vld [vmem:[%s5833_s5 + $0x1d0] sm:$0x3f] }
 0x205   :  { %3925 = vmatprep.subr.mxu1 %v1204_v3  ;;  %1623 = vmatprep.subr.mxu0 %v3628_v15 }
 0x206   :  { %3926 = vmatpush3.msra.mxu1 %v1204_v3  ;;  %1624 = vmatpush1.msra.mxu0 %v3627_v38  ;;  %v3668_v3 = vld [vmem:[%s5833_s5 + $0x1b8] sm:$0xff] }
 0x207   :  { %3927 = vmatprep.subr.mxu1 %v1203_v20  ;;  %1625 = vmatprep.subr.mxu0 %v3626_v13 }
 0x208   :  { %3928 = vmatpush3.msra.mxu1 %v1203_v20  ;;  %1626 = vmatpush1.msra.mxu0 %v3625_v37  ;;  %v3667_v20 = vld [vmem:[%s5833_s5 + $0x1b0] sm:$0xff] }
 0x209   :  { %3929 = vmatprep.subr.mxu1 %v1202_v35  ;;  %1627 = vmatprep.subr.mxu0 %v3624_v16 }
 0x20a   :  { %3930 = vmatpush3.msra.mxu1 %v1202_v35  ;;  %1628 = vmatpush1.msra.mxu0 %v3623_v42 }
 0x20b   :  { %3932 = vmatmul.mubr.msk.f32.vlgmr.msra.gmra.mxu1 %vm1208_vm2, %v3610_v19  ;;  %3641 = vmatprep.subr.msk.mxu1 %vm1596_vm4, %v3636_v22  ;;  %v1545_v22 = vld [vmem:[%s5833_s5] sm:$0xff] }
 0x20c   :  { %3642 = vmatpush1.msk.msra.mxu1 %vm1596_vm4, %v3635_v61  ;;  %1750 = vmatprep.mubr.f32.mxu1 %v4172_v11 }
 0x20d   :  { %1700 = vmatprep.subr.mxu1 %v3634_v28  ;;  %1629 = vmatprep.subr.mxu0 %v3622_v44 }
 0x20e   :  { %1701 = vmatpush1.msra.mxu1 %v3633_v9  ;;  %1630 = vmatpush1.msra.mxu0 %v3621_v49  ;;  %v3669_v9 = vld [vmem:[%s5833_s5 + $0x1c0] sm:$0xff] }
 0x20f   :  { %1702 = vmatprep.subr.mxu1 %v3632_v14  ;;  %1631 = vmatprep.subr.mxu0 %v3620_v46  ;;  %v3666_v14 = vld [vmem:[%s5833_s5 + $0x1a8] sm:$0xff] }
 0x210   :  { %1703 = vmatpush1.msra.mxu1 %v3631_v39  ;;  %1632 = vmatpush1.msra.mxu0 %v3619_v57  ;;  %v3665_v39 = vld [vmem:[%s5833_s5 + $0x1a0] sm:$0xff] }
 0x211   :  { %1704 = vmatprep.subr.mxu1 %v3630_v40  ;;  %1633 = vmatprep.subr.mxu0 %v3618_v58  ;;  %v3664_v40 = vld [vmem:[%s5833_s5 + $0x198] sm:$0xff] }
 0x212   :  { %1705 = vmatpush1.msra.mxu1 %v3629_v41  ;;  %1634 = vmatpush1.msra.mxu0 %v3617_v63  ;;  %v3663_v41 = vld [vmem:[%s5833_s5 + $0x190] sm:$0xff] }
 0x213   :  { %1706 = vmatprep.subr.mxu1 %v3628_v15  ;;  %3645 = vmatprep.subr.msk.mxu0 %vm1596_vm4, %v1564_v5  ;;  %v3662_v15 = vld [vmem:[%s5833_s5 + $0x188] sm:$0xff] }
 0x214   :  { %1707 = vmatpush1.msra.mxu1 %v3627_v38  ;;  %v3661_v38 = vld [vmem:[%s5833_s5 + $0x180] sm:$0xff] }
 0x215   :  { %1708 = vmatprep.subr.mxu1 %v3626_v13  ;;  %v3660_v13 = vld [vmem:[%s5833_s5 + $0x178] sm:$0xff] }
 0x216   :  { %1709 = vmatpush1.msra.mxu1 %v3625_v37  ;;  %v3659_v37 = vld [vmem:[%s5833_s5 + $0x170] sm:$0xff] }
 0x217   :  { %1710 = vmatprep.subr.mxu1 %v3624_v16  ;;  %v3658_v16 = vld [vmem:[%s5833_s5 + $0x168] sm:$0xff] }
 0x218   :  { %1711 = vmatpush1.msra.mxu1 %v3623_v42  ;;  %v3657_v42 = vld [vmem:[%s5833_s5 + $0x160] sm:$0xff] }
 0x219   :  { %1712 = vmatprep.subr.mxu1 %v3622_v44  ;;  %v3656_v44 = vld [vmem:[%s5833_s5 + $0x158] sm:$0xff] }
 0x21a   :  { %1713 = vmatpush1.msra.mxu1 %v3621_v49 }
 0x21b   :  { %1714 = vmatprep.subr.mxu1 %v3620_v46  ;;  %v3655_v46 = vld [vmem:[%s5833_s5 + $0x150] sm:$0xff] }
 0x21c   :  { %1715 = vmatpush1.msra.mxu1 %v3619_v57  ;;  %v3654_v57 = vld [vmem:[%s5833_s5 + $0x148] sm:$0xff] }
 0x21d   :  { %1716 = vmatprep.subr.mxu1 %v3618_v58  ;;  %v3653_v58 = vld [vmem:[%s5833_s5 + $0x140] sm:$0xff] }
 0x21e   :  { %1717 = vmatpush1.msra.mxu1 %v3617_v63 }
 0x21f   :  { %3649 = vmatprep.subr.msk.mxu1 %vm1596_vm4, %v1564_v5 }
 0x2b2   :  { %v3900_v7 = vpop.f32.mrf.mxu0 }
 0x2b4   :  { %v1285_v8 = vpop.f32.mrf.mxu0 }
 0x2ba   :  { %v3922_v17 = vpop.f32.mrf.mxu0 }
 0x2bb   :  { %v1532_v27 = vmax.f32 %v3900_v7, %v3922_v17  ;;  %v2183_v7 = vld [vmem:[%s5835_s7 + $0x78] sm:$0xff] }
 0x2bc   :  { %v1447_v31 = vpop.f32.mrf.mxu0 }
 0x2bd   :  { %1538 = vst.msk [vmem:[#allocation2 + $0x8] sm:$0x1f] %vm1537_vm5, %v1532_v27  ;;  %v1531_v34 = vmax.f32 %v1285_v8, %v1447_v31  ;;  %v2182_v27 = vld [vmem:[%s5835_s7 + $0x70] sm:$0xff] }
 0x2bf   :  { %1536 = vst.msk [vmem:[#allocation2] sm:$0xff] %vm1535_vm6, %v1531_v34  ;;  %v2181_v34 = vld [vmem:[%s5835_s7 + $0x68] sm:$0xff] }
 0x2c3   :  { %v3911_v36 = vpop.f32.mrf.mxu1 }
 0x2c4   :  { %v1566_v47 = vld [vmem:[#allocation2 + $0x9] sm:$0x7] }
 0x2c5   :  { %v1363_v53 = vpop.f32.mrf.mxu1  ;;  %v1542_v35 = vld [vmem:[#allocation2 + $0x8] sm:$0x7] }
 0x2c6   :  { %v1565_v45 = vld [vmem:[#allocation2 + $0x1] sm:$0xff]  ;;  %v1936_v8 = vld [vmem:[#allocation2 + $0xa] sm:$0x7] }
 0x2c7   :  { %3639 = vmatmul.mubr.msk.f32.vlgmr.msra.gmra.mxu0 %vm1535_vm6, %v1565_v45  ;;  %v1541_v61 = vld [vmem:[#allocation2] sm:$0xff]  ;;  %v2178_v45 = vld [vmem:[%s5835_s7 + $0x50] sm:$0xff] }
 0x2c8   :  { %3646 = vmatpush1.msk.msra.mxu0 %vm1596_vm4, %v1563_v43  ;;  %1673 = vmatprep.mubr.f32.mxu0 %v4172_v11  ;;  %v1935_v5 = vld [vmem:[#allocation2 + $0x2] sm:$0xff] }
 0x2c9   :  { %1789 = vmatprep.subr.mxu0 %v1562_v48 }
 0x2ca   :  { %1790 = vmatpush1.msra.mxu0 %v1561_v51 }
 0x2cb   :  { %v3933_v52 = vpop.f32.mrf.mxu1  ;;  %1791 = vmatprep.subr.mxu0 %v1560_v18  ;;  %3640 = vmatmul.mubr.msk.f32.gmra.mxu0 %vm1535_vm6, %v1566_v47  ;;  %v2174_v47 = vld [vmem:[%s5835_s7 + $0x30] sm:$0xff] }
 0x2cc   :  { %v1534_v60 = vmax.f32 %v3911_v36, %v3933_v52  ;;  %1792 = vmatpush1.msra.mxu0 %v1559_v54  ;;  %1839 = vmatprep.mubr.f32.mxu0 %v4172_v11  ;;  %v2180_v36 = vld [vmem:[%s5835_s7 + $0x60] sm:$0xff]  ;;  %v2170_v52 = vld [vmem:[%s5835_s7 + $0x10] sm:$0xff] }
 0x2cd   :  { %v1522_v0 = vpop.f32.mrf.mxu1  ;;  %1793 = vmatprep.subr.mxu0 %v1558_v21 }
 0x2ce   :  { %1540 = vst.msk [vmem:[#allocation2 + $0x18] sm:$0x1f] %vm1537_vm5, %v1534_v60  ;;  %v1533_v4 = vmax.f32 %v1363_v53, %v1522_v0  ;;  %1794 = vmatpush1.msra.mxu0 %v1557_v56  ;;  %v2173_v53 = vld [vmem:[%s5835_s7 + $0x28] sm:$0xff]  ;;  %v2168_v60 = vld [vmem:[%s5835_s7] sm:$0xff] }
 0x2cf   :  { %1795 = vmatprep.subr.mxu0 %v1556_v62  ;;  %v2188_v0 = vld [vmem:[%s5835_s7 + $0xa0] sm:$0xff] }
 0x2d0   :  { %1539 = vst.msk [vmem:[#allocation2 + $0x10] sm:$0xff] %vm1535_vm6, %v1533_v4  ;;  %1796 = vmatpush1.msra.mxu0 %v1555_v2  ;;  %v2186_v4 = vld [vmem:[%s5835_s7 + $0x90] sm:$0xff] }
 0x2d1   :  { %1797 = vmatprep.subr.mxu0 %v1554_v50 }
 0x2d2   :  { %1798 = vmatpush1.msra.mxu0 %v1553_v55 }
 0x2d3   :  { %1799 = vmatprep.subr.mxu0 %v1552_v23 }
 0x2d4   :  { %1800 = vmatpush1.msra.mxu0 %v1551_v59 }
 0x2d5   :  { %1801 = vmatprep.subr.mxu0 %v1550_v26  ;;  %v1568_v28 = vld [vmem:[#allocation2 + $0x19] sm:$0x7] }
 0x2d6   :  { %1802 = vmatpush1.msra.mxu0 %v1549_v1  ;;  %v1544_v63 = vld [vmem:[#allocation2 + $0x18] sm:$0x7] }
 0x2d7   :  { %1803 = vmatprep.subr.mxu0 %v1548_v6  ;;  %v1567_v19 = vld [vmem:[#allocation2 + $0x11] sm:$0xff]  ;;  %v1938_v31 = vld [vmem:[#allocation2 + $0x1a] sm:$0x7] }
 0x2d8   :  { %3643 = vmatmul.mubr.msk.f32.vlgmr.msra.gmra.mxu1 %vm1535_vm6, %v1567_v19  ;;  %1804 = vmatpush1.msra.mxu0 %v1547_v12  ;;  %v1543_v49 = vld [vmem:[#allocation2 + $0x10] sm:$0xff] }
 0x2d9   :  { %3650 = vmatpush1.msk.msra.mxu1 %vm1596_vm4, %v1563_v43  ;;  %1805 = vmatprep.subr.mxu0 %v1546_v10  ;;  %v1937_v17 = vld [vmem:[#allocation2 + $0x12] sm:$0xff] }
 0x2da   :  { %1872 = vmatprep.subr.mxu1 %v1562_v48  ;;  %1806 = vmatpush1.msra.mxu0 %v1545_v22  ;;  %v2179_v43 = vld [vmem:[%s5835_s7 + $0x58] sm:$0xff]  ;;  %v2177_v48 = vld [vmem:[%s5835_s7 + $0x48] sm:$0xff] }
 0x2db   :  { %1873 = vmatpush1.msra.mxu1 %v1561_v51  ;;  %1756 = vmatprep.mubr.f32.mxu1 %v4172_v11  ;;  %v2176_v51 = vld [vmem:[%s5835_s7 + $0x40] sm:$0xff] }
 0x2dc   :  { %3647 = vmatmul.mubr.msk.f32.vlgmr.msra.gmra.mxu0 %vm1535_vm6, %v1541_v61  ;;  %1874 = vmatprep.subr.mxu1 %v1560_v18  ;;  %v2175_v18 = vld [vmem:[%s5835_s7 + $0x38] sm:$0xff]  ;;  %v2140_v61 = vld [vmem:[%s5834_s6] sm:$0x3] }
 0x2dd   :  { %3673 = vmatprep.subr.msk.mxu0 %vm1596_vm4, %v5079_v24  ;;  %3644 = vmatmul.mubr.msk.f32.gmra.mxu1 %vm1535_vm6, %v1568_v28 }
 0x2de   :  { %1875 = vmatpush1.msra.mxu1 %v1559_v54  ;;  %3674 = vmatpush1.msk.msra.mxu0 %vm1596_vm4, %v5085_v29  ;;  %v2172_v54 = vld [vmem:[%s5835_s7 + $0x20] sm:$0xff] }
 0x2df   :  { %1876 = vmatprep.subr.mxu1 %v1558_v21  ;;  %1986 = vmatprep.subr.mxu0 %v3670_v33  ;;  %v2171_v21 = vld [vmem:[%s5835_s7 + $0x18] sm:$0xff] }
 0x2e0   :  { %1845 = vmatprep.mubr.f32.mxu0 %v4172_v11  ;;  %1877 = vmatpush1.msra.mxu1 %v1557_v56  ;;  %v2169_v56 = vld [vmem:[%s5835_s7 + $0x8] sm:$0xff] }
 0x2e1   :  { %1987 = vmatpush1.msra.mxu0 %v3669_v9  ;;  %1878 = vmatprep.subr.mxu1 %v1556_v62  ;;  %v2189_v62 = vld [vmem:[%s5835_s7 + $0xa8] sm:$0xff] }
 0x2e2   :  { %3648 = vmatmul.mubr.msk.f32.gmra.mxu0 %vm1535_vm6, %v1542_v35  ;;  %1988 = vmatprep.subr.mxu0 %v3668_v3 }
 0x2e3   :  { %1879 = vmatpush1.msra.mxu1 %v1555_v2  ;;  %1989 = vmatpush1.msra.mxu0 %v3667_v20  ;;  %v2187_v2 = vld [vmem:[%s5835_s7 + $0x98] sm:$0xff] }
 0x2e4   :  { %1880 = vmatprep.subr.mxu1 %v1554_v50  ;;  %1990 = vmatprep.subr.mxu0 %v3666_v14  ;;  %v2185_v50 = vld [vmem:[%s5835_s7 + $0x88] sm:$0xff] }
 0x2e5   :  { %1881 = vmatpush1.msra.mxu1 %v1553_v55  ;;  %1991 = vmatpush1.msra.mxu0 %v3665_v39  ;;  %v2184_v55 = vld [vmem:[%s5835_s7 + $0x80] sm:$0xff] }
 0x2e6   :  { %1882 = vmatprep.subr.mxu1 %v1552_v23  ;;  %1992 = vmatprep.subr.mxu0 %v3664_v40 }
 0x2e7   :  { %1883 = vmatpush1.msra.mxu1 %v1551_v59  ;;  %1993 = vmatpush1.msra.mxu0 %v3663_v41 }
 0x2e8   :  { %1884 = vmatprep.subr.mxu1 %v1550_v26  ;;  %1994 = vmatprep.subr.mxu0 %v3662_v15 }
 0x2e9   :  { %1885 = vmatpush1.msra.mxu1 %v1549_v1  ;;  %1995 = vmatpush1.msra.mxu0 %v3661_v38 }
 0x2ea   :  { %1886 = vmatprep.subr.mxu1 %v1548_v6  ;;  %1996 = vmatprep.subr.mxu0 %v3660_v13 }
 0x2eb   :  { %1887 = vmatpush1.msra.mxu1 %v1547_v12  ;;  %1997 = vmatpush1.msra.mxu0 %v3659_v37 }
 0x2ec   :  { %1888 = vmatprep.subr.mxu1 %v1546_v10  ;;  %1998 = vmatprep.subr.mxu0 %v3658_v16 }
 0x2ed   :  { %1889 = vmatpush1.msra.mxu1 %v1545_v22  ;;  %1922 = vmatprep.mubr.f32.mxu1 %v4172_v11 }
 0x2ee   :  { %1999 = vmatpush1.msra.mxu0 %v3657_v42  ;;  %3651 = vmatmul.mubr.msk.f32.vlgmr.msra.gmra.mxu1 %vm1535_vm6, %v1543_v49 }
 0x2ef   :  { %2000 = vmatprep.subr.mxu0 %v3656_v44  ;;  %3677 = vmatprep.subr.msk.mxu1 %vm1596_vm4, %v5079_v24 }
 0x2f0   :  { %2001 = vmatpush1.msra.mxu0 %v3655_v46  ;;  %3678 = vmatpush1.msk.msra.mxu1 %vm1596_vm4, %v5085_v29 }
 0x2f1   :  { %2002 = vmatprep.subr.mxu0 %v3654_v57  ;;  %2069 = vmatprep.subr.mxu1 %v3670_v33 }
 0x2f2   :  { %1928 = vmatprep.mubr.f32.mxu1 %v4172_v11  ;;  %2003 = vmatpush1.msra.mxu0 %v3653_v58 }
 0x2f3   :  { %2036 = vmatprep.mubr.f32.mxu0 %v4172_v11  ;;  %2070 = vmatpush1.msra.mxu1 %v3669_v9  ;;  %v5282_v9 = vrot.slane %v2140_v61, %v747_v30 }
 0x2f4   :  { %3652 = vmatmul.mubr.msk.f32.gmra.mxu1 %vm1535_vm6, %v1544_v63  ;;  %3675 = vmatmul.mubr.msk.f32.vlgmr.msra.gmra.mxu0 %vm1535_vm6, %v1935_v5  ;;  %v3699_v63 = vld [vmem:[%s5835_s7 + $0x120] sm:$0xff] }
 0x2f5   :  { %2071 = vmatprep.subr.mxu1 %v3668_v3  ;;  %2042 = vmatprep.mubr.f32.mxu0 %v4172_v11 }
 0x2f6   :  { %2072 = vmatpush1.msra.mxu1 %v3667_v20  ;;  %2119 = vmatprep.mubr.f32.mxu1 %v4172_v11 }
 0x2f7   :  { %2073 = vmatprep.subr.mxu1 %v3666_v14  ;;  %2197 = vmatprep.subr.mxu0 %v4172_v11  ;;  %v5286_v14 = vrot.slane %v2140_v61, %v751_v32  ;;  %v3686_v61 = vld [vmem:[%s5835_s7 + $0xb8] sm:$0xff] }
 0x2f8   :  { %2074 = vmatpush1.msra.mxu1 %v3665_v39  ;;  %3676 = vmatmul.mubr.msk.f32.gmra.mxu0 %vm1535_vm6, %v1936_v8 }
 0x2f9   :  { %2075 = vmatprep.subr.mxu1 %v3664_v40  ;;  %2198 = vmatpush1.msra.mxu0 %v2183_v7 }
 0x2fa   :  { %2076 = vmatpush1.msra.mxu1 %v3663_v41  ;;  %2199 = vmatprep.subr.mxu0 %v4172_v11 }
 0x2fb   :  { %2077 = vmatprep.subr.mxu1 %v3662_v15  ;;  %2200 = vmatpush1.msra.mxu0 %v2182_v27 }
 0x2fc   :  { %2078 = vmatpush1.msra.mxu1 %v3661_v38  ;;  %2201 = vmatprep.subr.mxu0 %v4172_v11 }
 0x2fd   :  { %2079 = vmatprep.subr.mxu1 %v3660_v13  ;;  %2202 = vmatpush1.msra.mxu0 %v2181_v34 }
 0x2fe   :  { %2080 = vmatpush1.msra.mxu1 %v3659_v37  ;;  %2203 = vmatprep.subr.mxu0 %v4172_v11 }
 0x2ff   :  { %2081 = vmatprep.subr.mxu1 %v3658_v16  ;;  %2204 = vmatpush1.msra.mxu0 %v2180_v36 }
 0x300   :  { %2082 = vmatpush1.msra.mxu1 %v3657_v42  ;;  %2205 = vmatprep.subr.mxu0 %v4172_v11 }
 0x301   :  { %2083 = vmatprep.subr.mxu1 %v3656_v44  ;;  %2206 = vmatpush1.msra.mxu0 %v2179_v43 }
 0x302   :  { %2084 = vmatpush1.msra.mxu1 %v3655_v46  ;;  %2207 = vmatprep.subr.mxu0 %v4172_v11 }
 0x303   :  { %2085 = vmatprep.subr.mxu1 %v3654_v57  ;;  %2208 = vmatpush1.msra.mxu0 %v2178_v45  ;;  %v3700_v57 = vld [vmem:[%s5835_s7 + $0x128] sm:$0xff] }
 0x304   :  { %2086 = vmatpush1.msra.mxu1 %v3653_v58  ;;  %2209 = vmatprep.subr.mxu0 %v4172_v11 }
 0x305   :  { %3679 = vmatmul.mubr.msk.f32.vlgmr.msra.gmra.mxu1 %vm1535_vm6, %v1937_v17  ;;  %2278 = vmatprep.subr.mxu1 %v4172_v11  ;;  %v3698_v17 = vld [vmem:[%s5835_s7 + $0x118] sm:$0xff] }
 0x306   :  { %2125 = vmatprep.mubr.f32.mxu1 %v4172_v11  ;;  %2279 = vmatpush1.msra.mxu1 %v2183_v7 }
 0x307   :  { %2280 = vmatprep.subr.mxu1 %v4172_v11  ;;  %2210 = vmatpush1.msra.mxu0 %v2177_v48 }
 0x308   :  { %2281 = vmatpush1.msra.mxu1 %v2182_v27  ;;  %2211 = vmatprep.subr.mxu0 %v4172_v11  ;;  %v3697_v27 = vld [vmem:[%s5835_s7 + $0x110] sm:$0xff] }
 0x309   :  { %3680 = vmatmul.mubr.msk.f32.gmra.mxu1 %vm1535_vm6, %v1938_v31  ;;  %2282 = vmatprep.subr.mxu1 %v4172_v11 }
 0x30a   :  { %2283 = vmatpush1.msra.mxu1 %v2181_v34  ;;  %2212 = vmatpush1.msra.mxu0 %v2176_v51 }
 0x30b   :  { %2284 = vmatprep.subr.mxu1 %v4172_v11  ;;  %2213 = vmatprep.subr.mxu0 %v4172_v11 }
 0x30c   :  { %2285 = vmatpush1.msra.mxu1 %v2180_v36  ;;  %2214 = vmatpush1.msra.mxu0 %v2175_v18  ;;  %v3696_v36 = vld [vmem:[%s5835_s7 + $0x108] sm:$0xff] }
 0x30d   :  { %2286 = vmatprep.subr.mxu1 %v4172_v11  ;;  %2215 = vmatprep.subr.mxu0 %v4172_v11 }
 0x30e   :  { %2287 = vmatpush1.msra.mxu1 %v2179_v43  ;;  %2216 = vmatpush1.msra.mxu0 %v2174_v47 }
 0x30f   :  { %2288 = vmatprep.subr.mxu1 %v4172_v11  ;;  %2217 = vmatprep.subr.mxu0 %v4172_v11 }
 0x310   :  { %2289 = vmatpush1.msra.mxu1 %v2178_v45  ;;  %2218 = vmatpush1.msra.mxu0 %v2173_v53 }
 0x311   :  { %2290 = vmatprep.subr.mxu1 %v4172_v11  ;;  %2219 = vmatprep.subr.mxu0 %v4172_v11 }
 0x312   :  { %2291 = vmatpush1.msra.mxu1 %v2177_v48  ;;  %2220 = vmatpush1.msra.mxu0 %v2172_v54 }
 0x313   :  { %2292 = vmatprep.subr.mxu1 %v4172_v11  ;;  %2221 = vmatprep.subr.mxu0 %v4172_v11 }
 0x314   :  { %2293 = vmatpush1.msra.mxu1 %v2176_v51  ;;  %2222 = vmatpush1.msra.mxu0 %v2171_v21  ;;  %v3695_v51 = vld [vmem:[%s5835_s7 + $0x100] sm:$0xff] }
 0x315   :  { %2294 = vmatprep.subr.mxu1 %v4172_v11  ;;  %2223 = vmatprep.subr.mxu0 %v4172_v11 }
 0x316   :  { %2295 = vmatpush1.msra.mxu1 %v2175_v18  ;;  %2224 = vmatpush1.msra.mxu0 %v2170_v52 }
 0x317   :  { %2296 = vmatprep.subr.mxu1 %v4172_v11  ;;  %2225 = vmatprep.subr.mxu0 %v4172_v11 }
 0x318   :  { %2297 = vmatpush1.msra.mxu1 %v2174_v47  ;;  %2226 = vmatpush1.msra.mxu0 %v2169_v56 }
 0x319   :  { %2298 = vmatprep.subr.mxu1 %v4172_v11  ;;  %2227 = vmatprep.subr.mxu0 %v4172_v11 }
 0x31a   :  { %2299 = vmatpush1.msra.mxu1 %v2173_v53  ;;  %2228 = vmatpush1.msra.mxu0 %v2168_v60 }
 0x31b   :  { %2300 = vmatprep.subr.mxu1 %v4172_v11  ;;  %2249 = vmatprep.subr.mxu0 %v4172_v11 }
 0x31c   :  { %2301 = vmatpush1.msra.mxu1 %v2172_v54  ;;  %2250 = vmatpush2.msra.mxu0 %v2189_v62  ;;  %v3694_v54 = vld [vmem:[%s5835_s7 + $0xf8] sm:$0xff] }
 0x31d   :  { %2302 = vmatprep.subr.mxu1 %v4172_v11  ;;  %2251 = vmatprep.subr.mxu0 %v4172_v11 }
 0x31e   :  { %2303 = vmatpush1.msra.mxu1 %v2171_v21  ;;  %2252 = vmatpush2.msra.mxu0 %v2188_v0 }
 0x31f   :  { %2304 = vmatprep.subr.mxu1 %v4172_v11  ;;  %2253 = vmatprep.subr.mxu0 %v4172_v11 }
 0x320   :  { %2305 = vmatpush1.msra.mxu1 %v2170_v52  ;;  %2254 = vmatpush2.msra.mxu0 %v2187_v2 }
 0x321   :  { %2306 = vmatprep.subr.mxu1 %v4172_v11  ;;  %2255 = vmatprep.subr.mxu0 %v4172_v11 }
 0x322   :  { %2307 = vmatpush1.msra.mxu1 %v2169_v56  ;;  %2256 = vmatpush2.msra.mxu0 %v2186_v4 }
 0x323   :  { %2308 = vmatprep.subr.mxu1 %v4172_v11  ;;  %2257 = vmatprep.subr.mxu0 %v4172_v11 }
 0x324   :  { %2309 = vmatpush1.msra.mxu1 %v2168_v60  ;;  %2258 = vmatpush2.msra.mxu0 %v2185_v50 }
 0x325   :  { %2330 = vmatprep.subr.mxu1 %v4172_v11  ;;  %2259 = vmatprep.subr.mxu0 %v4172_v11 }
 0x326   :  { %2331 = vmatpush2.msra.mxu1 %v2189_v62  ;;  %2260 = vmatpush2.msra.mxu0 %v2184_v55 }
 0x327   :  { %2332 = vmatprep.subr.mxu1 %v4172_v11  ;;  %2376 = vmatprep.subr.mxu0 %v4172_v11 }
 0x328   :  { %2333 = vmatpush2.msra.mxu1 %v2188_v0  ;;  %v3693_v0 = vld [vmem:[%s5835_s7 + $0xf0] sm:$0xff] }
 0x329   :  { %2334 = vmatprep.subr.mxu1 %v4172_v11 }
 0x32a   :  { %2335 = vmatpush2.msra.mxu1 %v2187_v2 }
 0x32b   :  { %2336 = vmatprep.subr.mxu1 %v4172_v11 }
 0x32c   :  { %2337 = vmatpush2.msra.mxu1 %v2186_v4 }
 0x32d   :  { %2338 = vmatprep.subr.mxu1 %v4172_v11 }
 0x32e   :  { %2339 = vmatpush2.msra.mxu1 %v2185_v50 }
 0x32f   :  { %2340 = vmatprep.subr.mxu1 %v4172_v11 }
 0x330   :  { %2341 = vmatpush2.msra.mxu1 %v2184_v55  ;;  %v3692_v55 = vld [vmem:[%s5835_s7 + $0xe8] sm:$0xff] }
 0x331   :  { %2451 = vmatprep.subr.mxu1 %v4172_v11 }
 0x387   :  { %v1669_v23 = vpop.f32.mrf.mxu0 }
 0x389   :  { %v1671_v59 = vpop.f32.mrf.mxu0 }
 0x38b   :  { %v1675_v26 = vpop.f32.mrf.mxu0 }
 0x38d   :  { %v1677_v1 = vpop.f32.mrf.mxu0 }
 0x398   :  { %v1752_v12 = vpop.f32.mrf.mxu1 }
 0x39a   :  { %v1754_v19 = vpop.f32.mrf.mxu1 }
 0x39c   :  { %v1841_v6 = vpop.f32.mrf.mxu0 }
 0x39d   :  { %v1758_v24 = vpop.f32.mrf.mxu1  ;;  %v1842_v28 = vadd.f32 %v1841_v6, %v1669_v23 }
 0x39e   :  { %v1843_v10 = vpop.f32.mrf.mxu0 }
 0x39f   :  { %v1844_v3 = vadd.f32 %v1843_v10, %v1671_v59  ;;  %v1760_v20 = vpop.f32.mrf.mxu1 }
 0x3a2   :  { %v1847_v22 = vpop.f32.mrf.mxu0 }
 0x3a3   :  { %v1848_v40 = vadd.f32 %v1847_v22, %v1675_v26  ;;  %v3688_v22 = vld [vmem:[%s5835_s7 + $0xc8] sm:$0xff] }
 0x3a4   :  { %v1849_v29 = vpop.f32.mrf.mxu0 }
 0x3a5   :  { %v1850_v37 = vadd.f32 %v1849_v29, %v1677_v1  ;;  %v3691_v1 = vld [vmem:[%s5835_s7 + $0xe0] sm:$0xff]  ;;  %v3685_v29 = vld [vmem:[%s5835_s7 + $0xb0] sm:$0xff] }
 0x3ae   :  { %v1924_v41 = vpop.f32.mrf.mxu1 }
 0x3af   :  { %v1925_v34 = vadd.f32 %v1924_v41, %v1752_v12  ;;  %v3690_v12 = vld [vmem:[%s5835_s7 + $0xd8] sm:$0xff] }
 0x3b0   :  { %v1926_v44 = vpop.f32.mrf.mxu1 }
 0x3b1   :  { %v1927_v45 = vadd.f32 %v1926_v44, %v1754_v19  ;;  %v3689_v19 = vld [vmem:[%s5835_s7 + $0xd0] sm:$0xff] }
 0x3b4   :  { %v2038_v33 = vpop.f32.mrf.mxu0  ;;  %v1930_v5 = vpop.f32.mrf.mxu1 }
 0x3b5   :  { %v2132_v35 = vadd.f32 %v2038_v33, %v1842_v28  ;;  %v1931_v47 = vadd.f32 %v1930_v5, %v1758_v24  ;;  %v3687_v24 = vld [vmem:[%s5835_s7 + $0xc0] sm:$0xff]  ;;  %v3706_v28 = vld [vmem:[%s5835_s7 + $0x158] sm:$0xff]  ;;  %v3705_v33 = vld [vmem:[%s5835_s7 + $0x150] sm:$0xff] }
 0x3b6   :  { %v2040_v39 = vpop.f32.mrf.mxu0  ;;  %v1932_v31 = vpop.f32.mrf.mxu1 }
 0x3b7   :  { %v2133_v15 = vadd.f32 %v2040_v39, %v1844_v3  ;;  %v5289_v38 = vadd.f32 %v5282_v9, %v2132_v35  ;;  %v1933_v56 = vadd.f32 %v1932_v31, %v1760_v20  ;;  %v3703_v3 = vld [vmem:[%s5835_s7 + $0x140] sm:$0xff]  ;;  %v3702_v20 = vld [vmem:[%s5835_s7 + $0x138] sm:$0xff]  ;;  %v3701_v35 = vld [vmem:[%s5835_s7 + $0x130] sm:$0xff] }
 0x3b8   :  { %v2044_v13 = vpop.f32.mrf.mxu0  ;;  %v3728_v31 = vld [vmem:[%s5837_s9 + $0x90] sm:$0xff] }
 0x3b9   :  { %v2153_v16 = vadd.f32 %v5286_v14, %v2133_v15  ;;  %v2134_v30 = vadd.f32 %v2044_v13, %v1848_v40  ;;  %v2160_v25 = vmax.f32 %v5289_v38, 0.0 }
 0x3ba   :  { %v2046_v42 = vpop.f32.mrf.mxu0 }
 0x3bb   :  { %v2161_v49 = vmax.f32 %v2153_v16, 0.0  ;;  %v2135_v46 = vadd.f32 %v2046_v42, %v1850_v37  ;;  %v5294_v32 = vadd.f32 %v5282_v9, %v2134_v30 }
 0x3bd   :  { %v5300_v58 = vadd.f32 %v5286_v14, %v2135_v46  ;;  %3681 = vmatprep.mubr.msk.f32.mxu0 %vm2190_vm7, %v2161_v49  ;;  %v2162_v8 = vmax.f32 %v5294_v32, 0.0  ;;  %v3715_v32 = vld [vmem:[%s5836_s8 + $0x8] sm:$0x1f] }
 0x3be   :  { %2262 = vmatmul.mubr.f32.vlgmr.msra.gmra.mxu0 %v2160_v25 }
 0x3bf   :  { %v2163_v7 = vmax.f32 %v5300_v58, 0.0  ;;  %2377 = vmatpush1.msra.mxu0 %v3700_v57 }
 0x3c0   :  { %2378 = vmatprep.subr.mxu0 %v4172_v11 }
 0x3c1   :  { %2379 = vmatpush1.msra.mxu0 %v3699_v63  ;;  %3682 = vmatprep.mubr.msk.f32.mxu0 %vm2190_vm7, %v2163_v7 }
 0x3c2   :  { %2380 = vmatprep.subr.mxu0 %v4172_v11  ;;  %2267 = vmatmul.mubr.f32.gmra.mxu0 %v2162_v8 }
 0x3c3   :  { %2381 = vmatpush1.msra.mxu0 %v3698_v17  ;;  %3707 = vmatprep.mubr.msk.f32.mxu0 %vm2190_vm7, %v2161_v49 }
 0x3c4   :  { %2382 = vmatprep.subr.mxu0 %v4172_v11 }
 0x3c5   :  { %v2121_v43 = vpop.f32.mrf.mxu1  ;;  %2383 = vmatpush1.msra.mxu0 %v3697_v27 }
 0x3c6   :  { %v2136_v48 = vadd.f32 %v2121_v43, %v1925_v34  ;;  %2384 = vmatprep.subr.mxu0 %v4172_v11  ;;  %v2842_v34 = vld [vmem:[%s5837_s9 + $0x40] sm:$0xff]  ;;  %v2841_v43 = vld [vmem:[%s5837_s9 + $0x38] sm:$0xff] }
 0x3c7   :  { %v2123_v18 = vpop.f32.mrf.mxu1  ;;  %2385 = vmatpush1.msra.mxu0 %v3696_v36 }
 0x3c8   :  { %v2137_v53 = vadd.f32 %v2123_v18, %v1927_v45  ;;  %2386 = vmatprep.subr.mxu0 %v4172_v11  ;;  %v5337_v21 = vadd.f32 %v5282_v9, %v2136_v48  ;;  %v3726_v45 = vld [vmem:[%s5837_s9 + $0x80] sm:$0xff]  ;;  %v2840_v48 = vld [vmem:[%s5837_s9 + $0x30] sm:$0xff]  ;;  %v2839_v18 = vld [vmem:[%s5837_s9 + $0x28] sm:$0xff] }
 0x3c9   :  { %v2127_v52 = vpop.f32.mrf.mxu1  ;;  %2387 = vmatpush1.msra.mxu0 %v3695_v51 }
 0x3ca   :  { %v2157_v60 = vadd.f32 %v5286_v14, %v2137_v53  ;;  %v2138_v62 = vadd.f32 %v2127_v52, %v1931_v47  ;;  %2388 = vmatprep.subr.mxu0 %v4172_v11  ;;  %v2164_v23 = vmax.f32 %v5337_v21, 0.0  ;;  %v3724_v47 = vld [vmem:[%s5837_s9 + $0x70] sm:$0xff]  ;;  %v2838_v53 = vld [vmem:[%s5837_s9 + $0x20] sm:$0xff]  ;;  %v2837_v21 = vld [vmem:[%s5837_s9 + $0x18] sm:$0xff] }
 0x3cb   :  { %v2129_v2 = vpop.f32.mrf.mxu1  ;;  %2389 = vmatpush1.msra.mxu0 %v3694_v54  ;;  %v3722_v52 = vld [vmem:[%s5837_s9 + $0x60] sm:$0xff] }
 0x3cc   :  { %v2165_v4 = vmax.f32 %v2157_v60, 0.0  ;;  %v2139_v50 = vadd.f32 %v2129_v2, %v1933_v56  ;;  %2390 = vmatprep.subr.mxu0 %v4172_v11  ;;  %v5350_v59 = vadd.f32 %v5282_v9, %v2138_v62  ;;  %v3704_v9 = vld [vmem:[%s5835_s7 + $0x148] sm:$0xff]  ;;  %v2836_v56 = vld [vmem:[%s5837_s9 + $0x10] sm:$0xff]  ;;  %v3721_v60 = vld [vmem:[%s5837_s9 + $0x58] sm:$0xff] }
 0x3cd   :  { %2391 = vmatpush1.msra.mxu0 %v3693_v0  ;;  %v2835_v62 = vld [vmem:[%s5837_s9 + $0x8] sm:$0xff]  ;;  %v2834_v2 = vld [vmem:[%s5837_s9] sm:$0xff] }
 0x3ce   :  { %v5353_v26 = vadd.f32 %v5286_v14, %v2139_v50  ;;  %3683 = vmatprep.mubr.msk.f32.mxu1 %vm2190_vm7, %v2165_v4  ;;  %2392 = vmatprep.subr.mxu0 %v4172_v11  ;;  %v2166_v10 = vmax.f32 %v5350_v59, 0.0 }
 0x3cf   :  { %2343 = vmatmul.mubr.f32.vlgmr.msra.gmra.mxu1 %v2164_v23  ;;  %2393 = vmatpush1.msra.mxu0 %v3692_v55 }
 0x3d0   :  { %v2167_v6 = vmax.f32 %v5353_v26, 0.0  ;;  %2452 = vmatpush1.msra.mxu1 %v3700_v57  ;;  %2394 = vmatprep.subr.mxu0 %v4172_v11  ;;  %v3729_v57 = vld [vmem:[%s5837_s9 + $0x98] sm:$0xff] }
 0x3d1   :  { %2453 = vmatprep.subr.mxu1 %v4172_v11  ;;  %2395 = vmatpush1.msra.mxu0 %v3691_v1 }
 0x3d2   :  { %2454 = vmatpush1.msra.mxu1 %v3699_v63  ;;  %3684 = vmatprep.mubr.msk.f32.mxu1 %vm2190_vm7, %v2167_v6 }
 0x3d3   :  { %2396 = vmatprep.subr.mxu0 %v4172_v11  ;;  %2455 = vmatprep.subr.mxu1 %v4172_v11 }
 0x3d4   :  { %2348 = vmatmul.mubr.f32.gmra.mxu1 %v2166_v10  ;;  %2397 = vmatpush1.msra.mxu0 %v3690_v12 }
 0x3d5   :  { %2456 = vmatpush1.msra.mxu1 %v3698_v17  ;;  %2398 = vmatprep.subr.mxu0 %v4172_v11 }
 0x3d6   :  { %2457 = vmatprep.subr.mxu1 %v4172_v11  ;;  %3709 = vmatprep.mubr.msk.f32.mxu1 %vm2190_vm7, %v2165_v4 }
 0x3d7   :  { %2399 = vmatpush1.msra.mxu0 %v3689_v19  ;;  %2458 = vmatpush1.msra.mxu1 %v3697_v27  ;;  %v2843_v27 = vld [vmem:[%s5837_s9 + $0x48] sm:$0xff] }
 0x3d8   :  { %2400 = vmatprep.subr.mxu0 %v4172_v11  ;;  %2459 = vmatprep.subr.mxu1 %v4172_v11 }
 0x3d9   :  { %2401 = vmatpush1.msra.mxu0 %v3688_v22  ;;  %2460 = vmatpush1.msra.mxu1 %v3696_v36  ;;  %v3727_v36 = vld [vmem:[%s5837_s9 + $0x88] sm:$0xff] }
 0x3da   :  { %2402 = vmatprep.subr.mxu0 %v4172_v11  ;;  %2461 = vmatprep.subr.mxu1 %v4172_v11 }
 0x3db   :  { %2403 = vmatpush1.msra.mxu0 %v3687_v24  ;;  %2462 = vmatpush1.msra.mxu1 %v3695_v51  ;;  %v3725_v51 = vld [vmem:[%s5837_s9 + $0x78] sm:$0xff] }
 0x3dc   :  { %2404 = vmatprep.subr.mxu0 %v4172_v11  ;;  %2463 = vmatprep.subr.mxu1 %v4172_v11 }
 0x3dd   :  { %2405 = vmatpush1.msra.mxu0 %v3686_v61  ;;  %2464 = vmatpush1.msra.mxu1 %v3694_v54  ;;  %v3723_v54 = vld [vmem:[%s5837_s9 + $0x68] sm:$0xff] }
 0x3de   :  { %2406 = vmatprep.subr.mxu0 %v4172_v11  ;;  %2465 = vmatprep.subr.mxu1 %v4172_v11 }
 0x3df   :  { %2407 = vmatpush1.msra.mxu0 %v3685_v29  ;;  %2466 = vmatpush1.msra.mxu1 %v3693_v0  ;;  %v3720_v0 = vld [vmem:[%s5837_s9 + $0x50] sm:$0xff] }
 0x3e0   :  { %2428 = vmatprep.subr.mxu0 %v4172_v11  ;;  %2467 = vmatprep.subr.mxu1 %v4172_v11 }
 0x3e1   :  { %2429 = vmatpush2.msra.mxu0 %v3706_v28  ;;  %2468 = vmatpush1.msra.mxu1 %v3692_v55 }
 0x3e2   :  { %2430 = vmatprep.subr.mxu0 %v4172_v11  ;;  %2469 = vmatprep.subr.mxu1 %v4172_v11 }
 0x3e3   :  { %2431 = vmatpush2.msra.mxu0 %v3705_v33  ;;  %2470 = vmatpush1.msra.mxu1 %v3691_v1 }
 0x3e4   :  { %2432 = vmatprep.subr.mxu0 %v4172_v11  ;;  %2471 = vmatprep.subr.mxu1 %v4172_v11 }
 0x3e5   :  { %2433 = vmatpush2.msra.mxu0 %v3704_v9  ;;  %2472 = vmatpush1.msra.mxu1 %v3690_v12 }
 0x3e6   :  { %2434 = vmatprep.subr.mxu0 %v4172_v11  ;;  %2473 = vmatprep.subr.mxu1 %v4172_v11 }
 0x3e7   :  { %2435 = vmatpush2.msra.mxu0 %v3703_v3  ;;  %2474 = vmatpush1.msra.mxu1 %v3689_v19 }
 0x3e8   :  { %2436 = vmatprep.subr.mxu0 %v4172_v11  ;;  %2475 = vmatprep.subr.mxu1 %v4172_v11 }
 0x3e9   :  { %2437 = vmatpush2.msra.mxu0 %v3702_v20  ;;  %2476 = vmatpush1.msra.mxu1 %v3688_v22 }
 0x3ea   :  { %2438 = vmatprep.subr.mxu0 %v4172_v11  ;;  %2477 = vmatprep.subr.mxu1 %v4172_v11 }
 0x3eb   :  { %2439 = vmatpush2.msra.mxu0 %v3701_v35  ;;  %2478 = vmatpush1.msra.mxu1 %v3687_v24 }
 0x3ec   :  { %2441 = vmatmul.mubr.f32.vlgmr.msra.gmra.mxu0 %v2160_v25  ;;  %2479 = vmatprep.subr.mxu1 %v4172_v11  ;;  %v2530_v25 = vld [vmem:[%s5836_s8] sm:$0x1f] }
 0x3ed   :  { %3708 = vmatprep.mubr.msk.f32.mxu0 %vm2190_vm7, %v2163_v7  ;;  %2480 = vmatpush1.msra.mxu1 %v3686_v61 }
 0x3ee   :  { %2481 = vmatprep.subr.mxu1 %v4172_v11  ;;  %3934 = vmatprep.subr.mxu0 %v4172_v11 }
 0x3ef   :  { %2482 = vmatpush1.msra.mxu1 %v3685_v29  ;;  %v3741_v29 = vld [vmem:[%s5837_s9 + $0xe8] sm:$0xff] }
 0x3f0   :  { %2446 = vmatmul.mubr.f32.gmra.mxu0 %v2162_v8  ;;  %2503 = vmatprep.subr.mxu1 %v4172_v11 }
 0x3f1   :  { %2504 = vmatpush2.msra.mxu1 %v3706_v28  ;;  %3938 = vmatprep.mubr.msk.f32.mxu0 %vm4173_vm8, %v4172_v11 }
 0x3f2   :  { %2505 = vmatprep.subr.mxu1 %v4172_v11 }
 0x3f3   :  { %2506 = vmatpush2.msra.mxu1 %v3705_v33 }
 0x3f4   :  { %2507 = vmatprep.subr.mxu1 %v4172_v11 }
 0x3f5   :  { %2508 = vmatpush2.msra.mxu1 %v3704_v9  ;;  %v3752_v9 = vld [vmem:[%s5837_s9 + $0x138] sm:$0xff] }
 0x3f6   :  { %2509 = vmatprep.subr.mxu1 %v4172_v11 }
 0x3f7   :  { %2510 = vmatpush2.msra.mxu1 %v3703_v3 }
 0x3f8   :  { %2511 = vmatprep.subr.mxu1 %v4172_v11 }
 0x3f9   :  { %2512 = vmatpush2.msra.mxu1 %v3702_v20 }
 0x3fa   :  { %2513 = vmatprep.subr.mxu1 %v4172_v11 }
 0x3fb   :  { %2514 = vmatpush2.msra.mxu1 %v3701_v35  ;;  %v3740_v35 = vld [vmem:[%s5837_s9 + $0xe0] sm:$0xff] }
 0x3fc   :  { %2516 = vmatmul.mubr.f32.vlgmr.msra.gmra.mxu1 %v2164_v23  ;;  %3941 = vmatprep.subr.mxu1 %v4172_v11 }
 0x3fd   :  { %3710 = vmatprep.mubr.msk.f32.mxu1 %vm2190_vm7, %v2167_v6 }
 0x400   :  { %2521 = vmatmul.mubr.f32.gmra.mxu1 %v2166_v10 }
 0x401   :  { %3945 = vmatprep.mubr.msk.f32.mxu1 %vm4173_vm8, %v4172_v11 }
 0x47e   :  { %v2263_v14 = vpop.f32.mrf.mxu0 }
 0x480   :  { %v2265_v39 = vpop.f32.mrf.mxu0 }
 0x481   :  { %v3739_v39 = vld [vmem:[%s5837_s9 + $0xd8] sm:$0xff] }
 0x482   :  { %v2268_v40 = vpop.f32.mrf.mxu0 }
 0x484   :  { %v2270_v41 = vpop.f32.mrf.mxu0 }
 0x485   :  { %v3738_v41 = vld [vmem:[%s5837_s9 + $0xd0] sm:$0xff] }
 0x48f   :  { %v2344_v15 = vpop.f32.mrf.mxu1 }
 0x491   :  { %v2346_v38 = vpop.f32.mrf.mxu1 }
 0x492   :  { %v3737_v38 = vld [vmem:[%s5837_s9 + $0xc8] sm:$0xff] }
 0x494   :  { %v2349_v13 = vpop.f32.mrf.mxu1 }
 0x496   :  { %v2351_v37 = vpop.f32.mrf.mxu1 }
 0x497   :  { %v3736_v37 = vld [vmem:[%s5837_s9 + $0xc0] sm:$0xff] }
 0x4ac   :  { %v2442_v16 = vpop.f32.mrf.mxu0 }
 0x4ad   :  { %v2526_v46 = vmax.f32 %v2263_v14, %v2442_v16  ;;  %v3751_v14 = vld [vmem:[%s5837_s9 + $0x130] sm:$0xff] }
 0x4ae   :  { %v2444_v30 = vpop.f32.mrf.mxu0  ;;  %v3747_v16 = vld [vmem:[%s5837_s9 + $0x110] sm:$0xff] }
 0x4af   :  { %v3735_v30 = vld [vmem:[%s5837_s9 + $0xb8] sm:$0xff] }
 0x4b0   :  { %v2447_v42 = vpop.f32.mrf.mxu0 }
 0x4b1   :  { %v2527_v44 = vmax.f32 %v2268_v40, %v2447_v42  ;;  %v3750_v40 = vld [vmem:[%s5837_s9 + $0x128] sm:$0xff] }
 0x4b2   :  { %v2449_v49 = vpop.f32.mrf.mxu0  ;;  %v3746_v42 = vld [vmem:[%s5837_s9 + $0x108] sm:$0xff] }
 0x4b3   :  { %3935 = vmatpush3.msk.msra.mxu0 %vm2535_vm9, %v2527_v44  ;;  %v3745_v49 = vld [vmem:[%s5837_s9 + $0x100] sm:$0xff] }
 0x4b4   :  { %3936 = vmatprep.subr.mxu0 %v4172_v11 }
 0x4b5   :  { %3937 = vmatpush3.msra.mxu0 %v2526_v46 }
 0x4b6   :  { %3948 = vmatprep.subr.mxu0 %v4172_v11  ;;  %3939 = vmatmul.mubr.msk.f32.vlgmr.msra.gmra.mxu0 %vm2531_vm10, %v2530_v25 }
 0x4b7   :  { %3949 = vmatpush3.msk.msra.mxu0 %vm2535_vm9, %v2527_v44  ;;  %3952 = vmatprep.mubr.msk.f32.mxu0 %vm4173_vm8, %v4172_v11  ;;  %v3734_v44 = vld [vmem:[%s5837_s9 + $0xb0] sm:$0xff] }
 0x4b8   :  { %3950 = vmatprep.subr.mxu0 %v4172_v11 }
 0x4b9   :  { %3951 = vmatpush3.msra.mxu0 %v2526_v46 }
 0x4ba   :  { %3953 = vmatmul.mubr.msk.f32.vlgmr.msra.gmra.mxu0 %vm2531_vm10, %v3715_v32  ;;  %3962 = vmatprep.subr.mxu0 %v4172_v11 }
 0x4bb   :  { %3963 = vmatpush3.msra.mxu0 %v3729_v57  ;;  %3982 = vmatprep.mubr.msk.f32.mxu0 %vm4173_vm8, %v4172_v11  ;;  %v3744_v57 = vld [vmem:[%s5837_s9 + $0xf8] sm:$0xff] }
 0x4bc   :  { %v2517_v58 = vpop.f32.mrf.mxu1  ;;  %3964 = vmatprep.subr.mxu0 %v4172_v11 }
 0x4bd   :  { %v2528_v17 = vmax.f32 %v2344_v15, %v2517_v58  ;;  %3965 = vmatpush3.msra.mxu0 %v3728_v31  ;;  %v3749_v15 = vld [vmem:[%s5837_s9 + $0x120] sm:$0xff] }
 0x4be   :  { %v2519_v63 = vpop.f32.mrf.mxu1  ;;  %3966 = vmatprep.subr.mxu0 %v4172_v11  ;;  %v3732_v58 = vld [vmem:[%s5837_s9 + $0xa0] sm:$0xff] }
 0x4bf   :  { %3967 = vmatpush3.msra.mxu0 %v3727_v36  ;;  %v3762_v36 = vld [vmem:[%s5837_s9 + $0x180] sm:$0xff] }
 0x4c0   :  { %v2522_v5 = vpop.f32.mrf.mxu1  ;;  %3968 = vmatprep.subr.mxu0 %v4172_v11 }
 0x4c1   :  { %v2529_v7 = vmax.f32 %v2349_v13, %v2522_v5  ;;  %3969 = vmatpush3.msra.mxu0 %v3726_v45  ;;  %v3748_v13 = vld [vmem:[%s5837_s9 + $0x118] sm:$0xff]  ;;  %v3760_v45 = vld [vmem:[%s5837_s9 + $0x170] sm:$0xff] }
 0x4c2   :  { %v2524_v8 = vpop.f32.mrf.mxu1  ;;  %3970 = vmatprep.subr.mxu0 %v4172_v11 }
 0x4c3   :  { %3942 = vmatpush3.msk.msra.mxu1 %vm2535_vm9, %v2529_v7  ;;  %3971 = vmatpush3.msra.mxu0 %v3725_v51  ;;  %v3758_v51 = vld [vmem:[%s5837_s9 + $0x160] sm:$0xff] }
 0x4c4   :  { %3943 = vmatprep.subr.mxu1 %v4172_v11  ;;  %3972 = vmatprep.subr.mxu0 %v4172_v11 }
 0x4c5   :  { %3944 = vmatpush3.msra.mxu1 %v2528_v17  ;;  %3973 = vmatpush3.msra.mxu0 %v3724_v47  ;;  %v3756_v47 = vld [vmem:[%s5837_s9 + $0x150] sm:$0xff] }
 0x4c6   :  { %3946 = vmatmul.mubr.msk.f32.vlgmr.msra.gmra.mxu1 %vm2531_vm10, %v2530_v25  ;;  %3955 = vmatprep.subr.mxu1 %v4172_v11 }
 0x4c7   :  { %3956 = vmatpush3.msk.msra.mxu1 %vm2535_vm9, %v2529_v7  ;;  %3959 = vmatprep.mubr.msk.f32.mxu1 %vm4173_vm8, %v4172_v11  ;;  %v3743_v7 = vld [vmem:[%s5837_s9 + $0xf0] sm:$0xff] }
 0x4c8   :  { %3957 = vmatprep.subr.mxu1 %v4172_v11  ;;  %3974 = vmatprep.subr.mxu0 %v4172_v11 }
 0x4c9   :  { %3958 = vmatpush3.msra.mxu1 %v2528_v17  ;;  %3975 = vmatpush3.msra.mxu0 %v3723_v54  ;;  %v3755_v54 = vld [vmem:[%s5837_s9 + $0x148] sm:$0xff] }
 0x4ca   :  { %3960 = vmatmul.mubr.msk.f32.vlgmr.msra.gmra.mxu1 %vm2531_vm10, %v3715_v32  ;;  %3985 = vmatprep.subr.mxu1 %v4172_v11  ;;  %v3733_v32 = vld [vmem:[%s5837_s9 + $0xa8] sm:$0xff] }
 0x4cb   :  { %3986 = vmatpush3.msra.mxu1 %v2843_v27  ;;  %4005 = vmatprep.mubr.msk.f32.mxu1 %vm4173_vm8, %v4172_v11 }
 0x4cc   :  { %3987 = vmatprep.subr.mxu1 %v4172_v11  ;;  %3976 = vmatprep.subr.mxu0 %v4172_v11 }
 0x4cd   :  { %3988 = vmatpush3.msra.mxu1 %v2842_v34  ;;  %3977 = vmatpush3.msra.mxu0 %v3722_v52  ;;  %v3763_v34 = vld [vmem:[%s5837_s9 + $0x188] sm:$0xff]  ;;  %v3754_v52 = vld [vmem:[%s5837_s9 + $0x140] sm:$0xff] }
 0x4ce   :  { %3989 = vmatprep.subr.mxu1 %v4172_v11  ;;  %3978 = vmatprep.subr.mxu0 %v4172_v11 }
 0x4cf   :  { %3990 = vmatpush3.msra.mxu1 %v2841_v43  ;;  %3979 = vmatpush3.msra.mxu0 %v3721_v60  ;;  %v3761_v43 = vld [vmem:[%s5837_s9 + $0x178] sm:$0xff] }
 0x4d0   :  { %3991 = vmatprep.subr.mxu1 %v4172_v11  ;;  %3980 = vmatprep.subr.mxu0 %v4172_v11 }
 0x4d1   :  { %3992 = vmatpush3.msra.mxu1 %v2840_v48  ;;  %3981 = vmatpush3.msra.mxu0 %v3720_v0  ;;  %v3759_v48 = vld [vmem:[%s5837_s9 + $0x168] sm:$0xff] }
 0x4d2   :  { %3993 = vmatprep.subr.mxu1 %v4172_v11  ;;  %4008 = vmatprep.subr.mxu0 %v4172_v11  ;;  %v3303_v0 = vld [vmem:[%s5839_s11 + $0x68] sm:$0xff] }
 0x4d3   :  { %3994 = vmatpush3.msra.mxu1 %v2839_v18  ;;  %v3757_v18 = vld [vmem:[%s5837_s9 + $0x158] sm:$0xff] }
 0x4d4   :  { %3995 = vmatprep.subr.mxu1 %v4172_v11 }
 0x4d5   :  { %3996 = vmatpush3.msra.mxu1 %v2838_v53 }
 0x4d6   :  { %3997 = vmatprep.subr.mxu1 %v4172_v11 }
 0x4d7   :  { %3998 = vmatpush3.msra.mxu1 %v2837_v21 }
 0x4d8   :  { %3999 = vmatprep.subr.mxu1 %v4172_v11 }
 0x4d9   :  { %4000 = vmatpush3.msra.mxu1 %v2836_v56 }
 0x4da   :  { %4001 = vmatprep.subr.mxu1 %v4172_v11 }
 0x4db   :  { %4002 = vmatpush3.msra.mxu1 %v2835_v62  ;;  %v3304_v62 = vld [vmem:[%s5839_s11 + $0x70] sm:$0xff] }
 0x4dc   :  { %4003 = vmatprep.subr.mxu1 %v4172_v11 }
 0x4dd   :  { %4004 = vmatpush3.msra.mxu1 %v2834_v2  ;;  %v3302_v2 = vld [vmem:[%s5839_s11 + $0x60] sm:$0xff] }
 0x4de   :  { %4031 = vmatprep.subr.mxu1 %v4172_v11 }
 0x576   :  { %v2605_v4 = vpop.f32.mrf.mxu0 }
 0x578   :  { %v3940_v50 = vpop.f32.mrf.mxu0 }
 0x579   :  { %v3300_v50 = vld [vmem:[%s5839_s11 + $0x50] sm:$0xff] }
 0x57a   :  { %v2753_v55 = vpop.f32.mrf.mxu0 }
 0x57b   :  { %v2827_v23 = vmax.f32 %v2605_v4, %v2753_v55  ;;  %v3301_v4 = vld [vmem:[%s5839_s11 + $0x58] sm:$0xff]  ;;  %v3299_v55 = vld [vmem:[%s5839_s11 + $0x48] sm:$0xff] }
 0x57c   :  { %v3954_v59 = vpop.f32.mrf.mxu0 }
 0x57d   :  { %2830 = vst.msk [vmem:[#allocation3] sm:$0x1f] %vm2829_vm11, %v2827_v23  ;;  %v3298_v23 = vld [vmem:[%s5839_s11 + $0x40] sm:$0xff]  ;;  %v3297_v59 = vld [vmem:[%s5839_s11 + $0x38] sm:$0xff] }
 0x584   :  { %v2844_v28 = vld [vmem:[#allocation3 + $0x1] sm:$0x1]  ;;  %v2832_v33 = vld [vmem:[#allocation3] sm:$0x1]  ;;  %v3011_v8 = vld [vmem:[#allocation3 + $0x2] sm:$0x1] }
 0x585   :  { %v3101_v17 = vld [vmem:[#allocation3 + $0x3] sm:$0x1]  ;;  %v3191_v56 = vld [vmem:[#allocation3 + $0x4] sm:$0x1] }
 0x586   :  { %v2678_v26 = vpop.f32.mrf.mxu1 }
 0x588   :  { %v3947_v1 = vpop.f32.mrf.mxu1 }
 0x589   :  { %v3295_v1 = vld [vmem:[%s5839_s11 + $0x28] sm:$0xff] }
 0x58a   :  { %v2823_v6 = vpop.f32.mrf.mxu1 }
 0x58b   :  { %v2828_v12 = vmax.f32 %v2678_v26, %v2823_v6  ;;  %v3296_v26 = vld [vmem:[%s5839_s11 + $0x30] sm:$0xff]  ;;  %v3294_v6 = vld [vmem:[%s5839_s11 + $0x20] sm:$0xff] }
 0x58c   :  { %v3961_v10 = vpop.f32.mrf.mxu1 }
 0x58d   :  { %2831 = vst.msk [vmem:[#allocation3 + $0x8] sm:$0x1f] %vm2829_vm11, %v2828_v12  ;;  %v3293_v12 = vld [vmem:[%s5839_s11 + $0x18] sm:$0xff]  ;;  %v3292_v10 = vld [vmem:[%s5839_s11 + $0x10] sm:$0xff] }
 0x594   :  { %v2845_v19 = vld [vmem:[#allocation3 + $0x9] sm:$0x1]  ;;  %v2833_v22 = vld [vmem:[#allocation3 + $0x8] sm:$0x1]  ;;  %v3012_v46 = vld [vmem:[#allocation3 + $0xa] sm:$0x1] }
 0x595   :  { %v2859_v24 = vrot.slane %v2845_v19, 7  ;;  %v2937_v61 = vrot.slane %v2833_v22, 7  ;;  %v3102_v25 = vld [vmem:[#allocation3 + $0xb] sm:$0x1]  ;;  %v3026_v63 = vrot.slane %v3012_v46, 7  ;;  %v3290_v22 = vld [vmem:[%s5839_s11] sm:$0xff] }
 0x596   :  { %v3116_v5 = vrot.slane %v3102_v25, 7  ;;  %v3192_v53 = vld [vmem:[#allocation3 + $0xc] sm:$0x1] }
 0x597   :  { %v2861_v3 = vsel %vm2860_vm12, %v2859_v24, %v2844_v28  ;;  %v2938_v20 = vsel %vm2860_vm12, %v2937_v61, %v2832_v33  ;;  %v3027_v27 = vsel %vm2860_vm12, %v3026_v63, %v3011_v8  ;;  %v3206_v21 = vrot.slane %v3192_v53, 7  ;;  %v3291_v19 = vld [vmem:[%s5839_s11 + $0x8] sm:$0xff]  ;;  %v3397_v24 = vld [vmem:[%s5841_s13 + $0x50] sm:$0xf]  ;;  %v3394_v28 = vld [vmem:[%s5841_s13 + $0x38] sm:$0xff] }
 0x598   :  { %3983 = vmatmul.mubr.msk.f32.vlgmr.msra.gmra.mxu0 %vm2862_vm13, %v2861_v3  ;;  %4006 = vmatmul.mubr.msk.f32.vlgmr.msra.gmra.mxu1 %vm2862_vm13, %v2938_v20  ;;  %v3117_v31 = vsel %vm2860_vm12, %v3116_v5, %v3101_v17  ;;  %v3396_v61 = vld [vmem:[%s5841_s13 + $0x48] sm:$0xff]  ;;  %v3393_v33 = vld [vmem:[%s5841_s13 + $0x30] sm:$0xff]  ;;  %v3391_v3 = vld [vmem:[%s5841_s13 + $0x20] sm:$0xff] }
 0x599   :  { %4009 = vmatpush3.msra.mxu0 %v3741_v29  ;;  %4032 = vmatpush3.msra.mxu1 %v3752_v9  ;;  %v3207_v60 = vsel %vm2860_vm12, %v3206_v21, %v3191_v56  ;;  %v3395_v29 = vld [vmem:[%s5841_s13 + $0x40] sm:$0xff]  ;;  %v3392_v9 = vld [vmem:[%s5841_s13 + $0x28] sm:$0xff]  ;;  %v3390_v20 = vld [vmem:[%s5841_s13 + $0x18] sm:$0xff] }
 0x59a   :  { %4010 = vmatprep.subr.mxu0 %v4172_v11  ;;  %4033 = vmatprep.subr.mxu1 %v4172_v11  ;;  %v3387_v63 = vld [vmem:[%s5841_s13] sm:$0xff] }
 0x59b   :  { %4011 = vmatpush3.msra.mxu0 %v3740_v35  ;;  %4034 = vmatpush3.msra.mxu1 %v3751_v14  ;;  %v3766_v5 = vld [vmem:[%s5840_s12] ss:$0 sm:$0xff]  ;;  %s4174_s12 = smov [#allocation4]  }
 0x59c   :  { %4012 = vmatprep.subr.mxu0 %v4172_v11  ;;  %4035 = vmatprep.subr.mxu1 %v4172_v11 }
 0x59d   :  { %4013 = vmatpush3.msra.mxu0 %v3739_v39  ;;  %4036 = vmatpush3.msra.mxu1 %v3750_v40 }
 0x59e   :  { %4014 = vmatprep.subr.mxu0 %v4172_v11  ;;  %4037 = vmatprep.subr.mxu1 %v4172_v11 }
 0x59f   :  { %4015 = vmatpush3.msra.mxu0 %v3738_v41  ;;  %4038 = vmatpush3.msra.mxu1 %v3749_v15 }
 0x5a0   :  { %4016 = vmatprep.subr.mxu0 %v4172_v11  ;;  %4039 = vmatprep.subr.mxu1 %v4172_v11 }
 0x5a1   :  { %4017 = vmatpush3.msra.mxu0 %v3737_v38  ;;  %4040 = vmatpush3.msra.mxu1 %v3748_v13 }
 0x5a2   :  { %4018 = vmatprep.subr.mxu0 %v4172_v11  ;;  %4041 = vmatprep.subr.mxu1 %v4172_v11 }
 0x5a3   :  { %4019 = vmatpush3.msra.mxu0 %v3736_v37  ;;  %4042 = vmatpush3.msra.mxu1 %v3747_v16 }
 0x5a4   :  { %4020 = vmatprep.subr.mxu0 %v4172_v11  ;;  %4043 = vmatprep.subr.mxu1 %v4172_v11 }
 0x5a5   :  { %4021 = vmatpush3.msra.mxu0 %v3735_v30  ;;  %4044 = vmatpush3.msra.mxu1 %v3746_v42 }
 0x5a6   :  { %4022 = vmatprep.subr.mxu0 %v4172_v11  ;;  %4045 = vmatprep.subr.mxu1 %v4172_v11 }
 0x5a7   :  { %4023 = vmatpush3.msra.mxu0 %v3734_v44  ;;  %4046 = vmatpush3.msra.mxu1 %v3745_v49  ;;  %v3765_v44 = vld [vmem:[%s5838_s10] ss:$0 sm:$0xff] }
 0x5a8   :  { %4024 = vmatprep.subr.mxu0 %v4172_v11  ;;  %4047 = vmatprep.subr.mxu1 %v4172_v11 }
 0x5a9   :  { %4025 = vmatpush3.msra.mxu0 %v3733_v32  ;;  %4048 = vmatpush3.msra.mxu1 %v3744_v57  ;;  %v3389_v57 = vld [vmem:[%s5841_s13 + $0x10] sm:$0xff] }
 0x5aa   :  { %4026 = vmatprep.subr.mxu0 %v4172_v11  ;;  %4049 = vmatprep.subr.mxu1 %v4172_v11 }
 0x5ab   :  { %4027 = vmatpush3.msra.mxu0 %v3732_v58  ;;  %4028 = vmatprep.mubr.msk.f32.mxu0 %vm4173_vm8, %v4172_v11  ;;  %v3388_v58 = vld [vmem:[%s5841_s13 + $0x8] sm:$0xff]  ;;  %s3503_s13 = sshll.u32 %s4174_s12, 4  ;;  %s3504_s13 = int_to_ptr.vmem [resolvable:$true] %s3503_s13 }
 0x5ac   :  { %4050 = vmatpush3.msra.mxu1 %v3743_v7  ;;  %4051 = vmatprep.mubr.msk.f32.mxu1 %vm4173_vm8, %v4172_v11  ;;  %p4155_p1 = scmp.lt.s32.totalorder %s3504_s13, %s3504_s13 }
 0x5ad   :  { %4029 = vmatmul.mubr.msk.f32.vlgmr.msra.gmra.mxu0 %vm2862_vm13, %v3027_v27  ;;  %4052 = vmatmul.mubr.msk.f32.vlgmr.msra.gmra.mxu1 %vm2862_vm13, %v3117_v31  ;;  %v3768_v31 = vld [vmem:[%s5842_s14] ss:$0 sm:$0xff]  ;;  %s4150_s14 = scalar_lea.vmem %s3504_s13, 32 }
 0x5ae   :  { %4054 = vmatprep.subr.mxu0 %v4172_v11  ;;  %4074 = vmatprep.mubr.msk.f32.mxu0 %vm4173_vm8, %v4172_v11  ;;  %p4151_p0 = scmp.ne.s32.totalorder %s3504_s13, %s4150_s14  ;;  %p4156_p2 = scmp.lt.s32.totalorder %s4150_s14, %s4150_s14 }
 0x5af   :  { %4055 = vmatpush3.msra.mxu0 %v3763_v34  ;;  %4077 = vmatprep.subr.mxu1 %v4172_v11 }
 0x5b0   :  { %4056 = vmatprep.subr.mxu0 %v4172_v11  ;;  %4107 = vmatprep.mubr.msk.f32.mxu1 %vm4173_vm8, %v4172_v11  ;;  %p4157_p3 = por %p4156_p2, %p4155_p1 }
 0x5b1   :  { %4057 = vmatpush3.msra.mxu0 %v3762_v36  ;;  %4078 = vmatpush3.msra.mxu1 %v3304_v62 }
 0x5b2   :  { %4058 = vmatprep.subr.mxu0 %v4172_v11  ;;  %4079 = vmatprep.subr.mxu1 %v4172_v11  ;;  %p4158_p4 = pnand %p4157_p3, %p4151_p0 }
 0x5b3   :  { %4059 = vmatpush3.msra.mxu0 %v3761_v43  ;;  %4080 = vmatpush3.msra.mxu1 %v3303_v0 }
 0x5b4   :  { %4060 = vmatprep.subr.mxu0 %v4172_v11  ;;  %4081 = vmatprep.subr.mxu1 %v4172_v11 }
 0x5b5   :  { %4061 = vmatpush3.msra.mxu0 %v3760_v45  ;;  %4082 = vmatpush3.msra.mxu1 %v3302_v2 }
 0x5b6   :  { %4062 = vmatprep.subr.mxu0 %v4172_v11  ;;  %4083 = vmatprep.subr.mxu1 %v4172_v11 }
 0x5b7   :  { %4063 = vmatpush3.msra.mxu0 %v3759_v48  ;;  %4084 = vmatpush3.msra.mxu1 %v3301_v4 }
 0x5b8   :  { %4064 = vmatprep.subr.mxu0 %v4172_v11  ;;  %4085 = vmatprep.subr.mxu1 %v4172_v11 }
 0x5b9   :  { %4065 = vmatpush3.msra.mxu0 %v3758_v51  ;;  %4086 = vmatpush3.msra.mxu1 %v3300_v50 }
 0x5ba   :  { %4066 = vmatprep.subr.mxu0 %v4172_v11  ;;  %4087 = vmatprep.subr.mxu1 %v4172_v11 }
 0x5bb   :  { %4067 = vmatpush3.msra.mxu0 %v3757_v18  ;;  %4088 = vmatpush3.msra.mxu1 %v3299_v55 }
 0x5bc   :  { %4068 = vmatprep.subr.mxu0 %v4172_v11  ;;  %4089 = vmatprep.subr.mxu1 %v4172_v11 }
 0x5bd   :  { %4069 = vmatpush3.msra.mxu0 %v3756_v47  ;;  %4090 = vmatpush3.msra.mxu1 %v3298_v23 }
 0x5be   :  { %4070 = vmatprep.subr.mxu0 %v4172_v11  ;;  %4091 = vmatprep.subr.mxu1 %v4172_v11 }
 0x5bf   :  { %4071 = vmatpush3.msra.mxu0 %v3755_v54  ;;  %4092 = vmatpush3.msra.mxu1 %v3297_v59 }
 0x5c0   :  { %4072 = vmatprep.subr.mxu0 %v4172_v11  ;;  %4093 = vmatprep.subr.mxu1 %v4172_v11 }
 0x5c1   :  { %4073 = vmatpush3.msra.mxu0 %v3754_v52  ;;  %4094 = vmatpush3.msra.mxu1 %v3296_v26 }
 0x5c2   :  { %4075 = vmatmul.mubr.msk.f32.vlgmr.msra.gmra.mxu0 %vm2862_vm13, %v3207_v60  ;;  %4110 = vmatprep.subr.mxu0 %v4172_v11 }
 0x5c3   :  { %4132 = vmatprep.mubr.msk.f32.mxu0 %vm4173_vm8, %v4172_v11  ;;  %4095 = vmatprep.subr.mxu1 %v4172_v11 }
 0x5c4   :  { %4096 = vmatpush3.msra.mxu1 %v3295_v1  ;;  %4111 = vmatpush3.msk.msra.mxu0 %vm97_vm0, %v3397_v24  ;;  %vm3482_vm0 = vcmask 74752  }
 0x5c5   :  { %4097 = vmatprep.subr.mxu1 %v4172_v11  ;;  %4112 = vmatprep.subr.mxu0 %v4172_v11 }
 0x5c6   :  { %4098 = vmatpush3.msra.mxu1 %v3294_v6  ;;  %4113 = vmatpush3.msra.mxu0 %v3396_v61 }
 0x5c7   :  { %4099 = vmatprep.subr.mxu1 %v4172_v11  ;;  %4114 = vmatprep.subr.mxu0 %v4172_v11 }
 0x5c8   :  { %4100 = vmatpush3.msra.mxu1 %v3293_v12  ;;  %4115 = vmatpush3.msra.mxu0 %v3395_v29 }
 0x5c9   :  { %4101 = vmatprep.subr.mxu1 %v4172_v11  ;;  %4116 = vmatprep.subr.mxu0 %v4172_v11 }
 0x5ca   :  { %4102 = vmatpush3.msra.mxu1 %v3292_v10  ;;  %4117 = vmatpush3.msra.mxu0 %v3394_v28 }
 0x5cb   :  { %4103 = vmatprep.subr.mxu1 %v4172_v11  ;;  %4118 = vmatprep.subr.mxu0 %v4172_v11 }
 0x5cc   :  { %4104 = vmatpush3.msra.mxu1 %v3291_v19  ;;  %4119 = vmatpush3.msra.mxu0 %v3393_v33 }
 0x5cd   :  { %4105 = vmatprep.subr.mxu1 %v4172_v11  ;;  %4120 = vmatprep.subr.mxu0 %v4172_v11 }
 0x5ce   :  { %4106 = vmatpush3.msra.mxu1 %v3290_v22  ;;  %4121 = vmatpush3.msra.mxu0 %v3392_v9 }
 0x5cf   :  { %4122 = vmatprep.subr.mxu0 %v4172_v11 }
 0x5d0   :  { %4123 = vmatpush3.msra.mxu0 %v3391_v3 }
 0x5d1   :  { %4124 = vmatprep.subr.mxu0 %v4172_v11 }
 0x5d2   :  { %4125 = vmatpush3.msra.mxu0 %v3390_v20 }
 0x5d3   :  { %4126 = vmatprep.subr.mxu0 %v4172_v11 }
 0x5d4   :  { %4127 = vmatpush3.msra.mxu0 %v3389_v57 }
 0x5d5   :  { %4128 = vmatprep.subr.mxu0 %v4172_v11 }
 0x5d6   :  { %4129 = vmatpush3.msra.mxu0 %v3388_v58 }
 0x5d7   :  { %4130 = vmatprep.subr.mxu0 %v4172_v11 }
 0x5d8   :  { %4131 = vmatpush3.msra.mxu0 %v3387_v63 }
 0x658   :  { %v2931_v35 = vpop.f32.mrf.mxu0  ;;  %v3007_v14 = vpop.f32.mrf.mxu1 }
 0x659   :  { %v3008_v37 = vadd.f32 %v3007_v14, %v2931_v35 }
 0x65a   :  { %v3984_v39 = vpop.f32.mrf.mxu0  ;;  %v4007_v40 = vpop.f32.mrf.mxu1 }
 0x66d   :  { %v3096_v41 = vpop.f32.mrf.mxu0  ;;  %v3186_v15 = vpop.f32.mrf.mxu1 }
 0x66e   :  { %v3100_v16 = vadd.f32 %v3096_v41, %v3008_v37 }
 0x66f   :  { %v4030_v38 = vpop.f32.mrf.mxu0  ;;  %v4053_v13 = vpop.f32.mrf.mxu1 }
 0x670   :  { %v3190_v30 = vadd.f32 %v3186_v15, %v3100_v16 }
 0x682   :  { %v3276_v42 = vpop.f32.mrf.mxu0 }
 0x683   :  { %v3280_v49 = vadd.f32 %v3276_v42, %v3190_v30 }
 0x684   :  { %v4076_v46 = vpop.f32.mrf.mxu0 }
 0x685   :  { %v3288_v25 = vadd.f32 %v3765_v44, %v3280_v49 }
 0x687   :  { %v3289_v32 = vmax.f32 %v3288_v25, 0.0 }
 0x689   :  { %4108 = vmatmul.mubr.msk.f32.vlgmr.msra.gmra.mxu1 %vm3312_vm14, %v3289_v32 }
 0x749   :  { %v3382_v7 = vpop.f32.mrf.mxu1 }
 0x74a   :  { %v3383_v8 = vadd.f32 %v3766_v5, %v3382_v7 }
 0x74b   :  { %v4109_v17 = vpop.f32.mrf.mxu1 }
 0x74c   :  { %v3386_v27 = vmax.f32 %v3383_v8, 0.0 }
 0x74e   :  { %4133 = vmatmul.mubr.msk.f32.vlgmr.msra.gmra.mxu0 %vm3405_vm15, %v3386_v27 }
 0x80e   :  { %v3478_v11 = vpop.f32.mrf.mxu0 }
 0x80f   :  { %v3479_v34 = vadd.f32 %v3768_v31, %v3478_v11 }
 0x810   :  { %v4134_v36 = vpop.f32.mrf.mxu0 }
 0x811   :  { %v3483_v43 = vsel %vm3482_vm0, %v3479_v34, -inf }
 0x812   :  { %3484 = vmax.xlane.f32.xlu0 %v3483_v43 }
 0x89b   :  { %v3485_v45 = vpop.xlane.xlu0 %3484 }
 0x89c   :  { %v3486_v48 = vsub.f32 %v3479_v34, %v3485_v45 }
 0x89e   :  { %v3487_v51 = vmul.f32 1.442695, %v3486_v48 }
 0x8a0   :  { %4146 = vpow2.f32 %v3487_v51 }
 0x8ad   :  { %v4147_v18 = vpop.eup %4146 }
 0x8ae   :  { %v3489_v47 = vsel %vm3482_vm0, %v4147_v18, 0.0 }
 0x8af   :  { %3490 = vadd.xlane.f32.xlu0 %v3489_v47 }
 0x938   :  { %v3491_v53 = vpop.xlane.xlu0 %3490 }
 0x939   :  { %4148 = vlog2.f32 %v3491_v53 }
 0x946   :  { %v4149_v54 = vpop.eup %4148 }
 0x947   :  { %v3493_v21 = vmul.f32 0.6931472, %v4149_v54 }
 0x949   :  { %v3494_v52 = vadd.f32 %v3493_v21, %v3485_v45 }
 0x94b   :  { %v3495_v56 = vsub.f32 %v3479_v34, %v3494_v52 }
 0x94d   :  { %3496 = vst.msk [vmem:[#allocation4] sm:$0x3] %vm3482_vm0, %v3495_v56 }
 0x94e   :  { %4161 = shalt.err (!%p4158_p4)
}
 0x94f   :  { %3506 = dma.vmem_to_hbm [thread:$0]  %s3504_s13, 32, %s5843_s15, [#allocation5]  }
 0x950   :  { %4170 = dma.done.wait [#allocation5], 32  }
 0x951   :  { %4171 = vsyncadd [#allocation5], 4294967264 }
 0x952   :  { %3510 = vsyncpa [#allocation5], 1 }

</bundles_post_ra>
